<compile_context>
chip_gen: v7x
topology: tpu7x:2x2x1
jax: 0.10.0
libtpu: 0.0.40
codegen_flags: <defaults>
</compile_context>

<pallas_src>
import math

import jax
import jax.numpy as jnp
from jax.experimental import pallas as pl
from jax.experimental.pallas import tpu as pltpu

IN_FEATURES = 256 * 6 * 6   # 9216
HIDDEN = 200
OUT = 3


def ann_kernel(x_ref, w1_ref, b1_ref, w2_ref, b2_ref, o_ref):
    # fc1: (tb, 9216) f32 tile cast to bf16 in VMEM, MXU matmul, f32 accumulate.
    x_bf = x_ref[...].astype(jnp.bfloat16)
    h = jnp.dot(x_bf, w1_ref[...], preferred_element_type=jnp.float32)
    h = jnp.maximum(h + b1_ref[...], 0.0)
    # fc2: (tb, 200) @ (200, 3) + bias, all f32.
    o = jnp.dot(h, w2_ref[...], preferred_element_type=jnp.float32)
    o_ref[...] = (o + b2_ref[...]).astype(o_ref.dtype)


def ann_forward(x, w1_bf16, b1, w2, b2):
    """x: (B, 256, 6, 6) float32 -> (B, 3) float32.

    Weights are stored transposed vs. torch, i.e. (in_features, out_features),
    so the kernel computes x @ W + b directly on the MXU.  w1_bf16 is already
    bf16 (cast once at init/load time).
    """
    B = x.shape[0]
    # Same row-major flatten as torch's x.view(-1, 256*6*6); stays f32 — the
    # bf16 cast for the MXU happens inside the kernel (no extra HBM pass).
    x2d = x.reshape(B, IN_FEATURES)
    b1_2d = b1.reshape(1, HIDDEN).astype(jnp.float32)
    w2_f = w2.astype(jnp.float32)
    b2_2d = b2.reshape(1, OUT).astype(jnp.float32)

    # Batch tile: full batch for small B (block dim == full array dim is always
    # legal), capped at 256 rows for large B.  256 rows of f32 x double-buffer
    # to ~18.9 MB + ~4.7 MB resident w1 -> fits v7x's 64 MiB physical VMEM and
    # (with the vmem_limit bump below) v5e/v6e.  For B > 256 we get nb >= 2 so
    # the "parallel" batch axis can occupy both v7x TensorCores.
    tb = B if B <= 256 else 256
    nb = pl.cdiv(B, tb)

    cost = pl.CostEstimate(
        flops=2 * B * IN_FEATURES * HIDDEN + 2 * B * HIDDEN * OUT,
        transcendentals=0,
        # w1 is read from HBM exactly once (constant index_map, VMEM-resident).
        bytes_accessed=(x2d.size * 4
                        + w1_bf16.size * 2
                        + b1_2d.size * 4 + w2_f.size * 4 + b2_2d.size * 4
                        + B * OUT * 4),
    )

    return pl.pallas_call(
        ann_kernel,
        out_shape=jax.ShapeDtypeStruct((B, OUT), jnp.float32),
        grid_spec=pltpu.PrefetchScalarGridSpec(
            num_scalar_prefetch=0,
            grid=(nb,),                                          # batch tiles only
            in_specs=[
                pl.BlockSpec((tb, IN_FEATURES), lambda b: (b, 0)),   # x tile (f32)
                pl.BlockSpec((IN_FEATURES, HIDDEN), lambda b: (0, 0)),  # w1, resident
                pl.BlockSpec((1, HIDDEN), lambda b: (0, 0)),         # b1
                pl.BlockSpec((HIDDEN, OUT), lambda b: (0, 0)),       # w2
                pl.BlockSpec((1, OUT), lambda b: (0, 0)),            # b2
            ],
            out_specs=pl.BlockSpec((tb, OUT), lambda b: (b, 0)),
        ),
        compiler_params=pltpu.CompilerParams(
            # Batch axis parallel (v7x 2-TC sharding when nb >= 2).
            # TODO(synk): consider pltpu.CORE_PARALLEL on this axis for large-B
            # v7x deployments once nb >= 2 is guaranteed.
            dimension_semantics=("parallel",),
            # Headroom for f32 x double-buffers + resident bf16 w1 on v5e's
            # 16 MiB default scoped VMEM; 48 MiB is within v7x's 64 MiB physical.
            vmem_limit_bytes=48 << 20,
        ),
        cost_estimate=cost,
    )(x2d, w1_bf16, b1_2d, w2_f, b2_2d)


def init_params(key):
    """Deterministic init mimicking torch nn.Linear default (uniform +/- 1/sqrt(fan_in)).

    w1 is stored bf16 (cast once here, not per forward call); the rest stay f32.
    Weights are stored as (in, out) so the kernel does x @ W.
    """
    k1, k2, k3, k4 = jax.random.split(key, 4)
    bound1 = 1.0 / math.sqrt(IN_FEATURES)
    bound2 = 1.0 / math.sqrt(HIDDEN)
    w1 = jax.random.uniform(k1, (IN_FEATURES, HIDDEN), jnp.float32, -bound1, bound1)
    w1_bf16 = w1.astype(jnp.bfloat16)
    b1 = jax.random.uniform(k2, (HIDDEN,), jnp.float32, -bound1, bound1)
    w2 = jax.random.uniform(k3, (HIDDEN, OUT), jnp.float32, -bound2, bound2)
    b2 = jax.random.uniform(k4, (OUT,), jnp.float32, -bound2, bound2)
    return w1_bf16, b1, w2, b2


if __name__ == "__main__":
    key = jax.random.PRNGKey(0)
    kx, kp = jax.random.split(key)

    B = 2
    x = jax.random.normal(kx, (B, 256, 6, 6), dtype=jnp.float32)
    w1_bf16, b1, w2, b2 = init_params(kp)

    out = ann_forward(x, w1_bf16, b1, w2, b2)
    out = jax.block_until_ready(out)

    # Sanity check against a plain-JAX reference using the same bf16-rounded
    # fc1 inputs (accumulation is f32 in both paths).
    x2d = x.reshape(B, IN_FEATURES)
    xb = x2d.astype(jnp.bfloat16).astype(jnp.float32)
    w1f = w1_bf16.astype(jnp.float32)
    ref = jnp.maximum(xb @ w1f + b1, 0.0) @ w2 + b2

    assert out.shape == (B, OUT)
    assert jnp.allclose(out, ref, atol=1e-2, rtol=1e-2), (out, ref)

    print("KERNEL_OK")
</pallas_src>

<mosaic_0001>
module attributes {stable_mosaic.version = 11 : i64} {
  func.func @ann_kernel(%arg0: i32, %arg1: memref<2x9216xf32, #tpu.memory_space<vmem>>, %arg2: memref<9216x200xbf16, #tpu.memory_space<vmem>>, %arg3: memref<1x200xf32, #tpu.memory_space<vmem>>, %arg4: memref<200x3xf32, #tpu.memory_space<vmem>>, %arg5: memref<1x3xf32, #tpu.memory_space<vmem>>, %arg6: memref<2x3xf32, #tpu.memory_space<vmem>>) attributes {dimension_semantics = [#tpu.dimension_semantics<parallel>], iteration_bounds = array<i64: 1>, scalar_prefetch = 0 : i64, scratch_operands = 0 : i64, tpu.core_type = #tpu.core_type<tc>, window_params = [{transform_indices = @transform_0, window_bounds = array<i64: 2, 9216>}, {pipeline_mode = #tpu.pipeline_mode<synchronous>, transform_indices = @transform_1, window_bounds = array<i64: 9216, 200>}, {pipeline_mode = #tpu.pipeline_mode<synchronous>, transform_indices = @transform_2, window_bounds = array<i64: 1, 200>}, {pipeline_mode = #tpu.pipeline_mode<synchronous>, transform_indices = @transform_3, window_bounds = array<i64: 200, 3>}, {pipeline_mode = #tpu.pipeline_mode<synchronous>, transform_indices = @transform_4, window_bounds = array<i64: 1, 3>}, {transform_indices = @transform_5, window_bounds = array<i64: 2, 3>}]} {
    %c0 = arith.constant 0 : index
    %c0_0 = arith.constant 0 : index
    %0 = vector.load %arg1[%c0, %c0_0] : memref<2x9216xf32, #tpu.memory_space<vmem>>, vector<2x9216xf32>
    %1 = arith.truncf %0 : vector<2x9216xf32> to vector<2x9216xbf16>
    %c0_1 = arith.constant 0 : index
    %c0_2 = arith.constant 0 : index
    %2 = vector.load %arg2[%c0_1, %c0_2] : memref<9216x200xbf16, #tpu.memory_space<vmem>>, vector<9216x200xbf16>
    %cst = arith.constant dense<0.000000e+00> : vector<2x200xf32>
    %3 = tpu.matmul %1, %2, %cst {dimension_numbers = #tpu.dot_dimension_numbers<[1], [0], [0], [1], [0, 0, 1, 1], [], []>} : vector<2x9216xbf16>, vector<9216x200xbf16>, vector<2x200xf32> -> vector<2x200xf32>
    %c0_3 = arith.constant 0 : index
    %c0_4 = arith.constant 0 : index
    %4 = vector.load %arg3[%c0_3, %c0_4] : memref<1x200xf32, #tpu.memory_space<vmem>>, vector<1x200xf32>
    %5 = vector.broadcast %4 : vector<1x200xf32> to vector<2x200xf32>
    %6 = arith.addf %3, %5 : vector<2x200xf32>
    %cst_5 = arith.constant 0.000000e+00 : f32
    %7 = vector.broadcast %cst_5 : f32 to vector<2x200xf32>
    %8 = arith.maximumf %6, %7 : vector<2x200xf32>
    %c0_6 = arith.constant 0 : index
    %c0_7 = arith.constant 0 : index
    %9 = vector.load %arg4[%c0_6, %c0_7] : memref<200x3xf32, #tpu.memory_space<vmem>>, vector<200x3xf32>
    %cst_8 = arith.constant dense<0.000000e+00> : vector<2x3xf32>
    %10 = tpu.matmul %8, %9, %cst_8 {dimension_numbers = #tpu.dot_dimension_numbers<[1], [0], [0], [1], [0, 0, 1, 1], [], []>} : vector<2x200xf32>, vector<200x3xf32>, vector<2x3xf32> -> vector<2x3xf32>
    %c0_9 = arith.constant 0 : index
    %c0_10 = arith.constant 0 : index
    %11 = vector.load %arg5[%c0_9, %c0_10] : memref<1x3xf32, #tpu.memory_space<vmem>>, vector<1x3xf32>
    %12 = vector.broadcast %11 : vector<1x3xf32> to vector<2x3xf32>
    %13 = arith.addf %10, %12 : vector<2x3xf32>
    %c0_11 = arith.constant 0 : index
    %c0_12 = arith.constant 0 : index
    %14 = vector.load %arg6[%c0_11, %c0_12] : memref<2x3xf32, #tpu.memory_space<vmem>>, vector<2x3xf32>
    tpu.vector_store %arg6[%c0_11, %c0_12], %13 {strides = array<i32>} : memref<2x3xf32, #tpu.memory_space<vmem>>, vector<2x3xf32>,
    return
  }
  func.func @transform_0(%arg0: i32) -> (i32, i32) {
    %c0_i32 = arith.constant 0 : i32
    %c0_i32_0 = arith.constant 0 : i32
    return %arg0, %c0_i32 : i32, i32
  }
  func.func @transform_1(%arg0: i32) -> (i32, i32) {
    %c0_i32 = arith.constant 0 : i32
    %c0_i32_0 = arith.constant 0 : i32
    %c0_i32_1 = arith.constant 0 : i32
    return %c0_i32, %c0_i32_0 : i32, i32
  }
  func.func @transform_2(%arg0: i32) -> (i32, i32) {
    %c0_i32 = arith.constant 0 : i32
    %c0_i32_0 = arith.constant 0 : i32
    %c0_i32_1 = arith.constant 0 : i32
    return %c0_i32, %c0_i32_0 : i32, i32
  }
  func.func @transform_3(%arg0: i32) -> (i32, i32) {
    %c0_i32 = arith.constant 0 : i32
    %c0_i32_0 = arith.constant 0 : i32
    %c0_i32_1 = arith.constant 0 : i32
    return %c0_i32, %c0_i32_0 : i32, i32
  }
  func.func @transform_4(%arg0: i32) -> (i32, i32) {
    %c0_i32 = arith.constant 0 : i32
    %c0_i32_0 = arith.constant 0 : i32
    %c0_i32_1 = arith.constant 0 : i32
    return %c0_i32, %c0_i32_0 : i32, i32
  }
  func.func @transform_5(%arg0: i32) -> (i32, i32) {
    %c0_i32 = arith.constant 0 : i32
    %c0_i32_0 = arith.constant 0 : i32
    return %arg0, %c0_i32 : i32, i32
  }
}

</mosaic_0001>

<bundles_post_ra>
// kernel: tpu_custom_call.1
= control target key start
LH: loop header
LB: loop body
LE: loop exit
PB: predicated region body
PF: predicated region fallthrough
CT: control target
= control target key end

     0   :  { %v12135_v36 = vmov 1983009808   ;;  %v61_v38 = vlaneseq  ;;  %s16105_s0 = inlined_call_operand.vmem [shape: f32[2,9216], index: 0, kind: input, shape index: {}]   ;;  %s16106_s1 = inlined_call_operand.vmem [shape: bf16[9216,200], index: 1, kind: input, shape index: {}]   ;;  %s16107_s2 = inlined_call_operand.vmem [shape: f32[1,200], index: 2, kind: input, shape index: {}]   ;;  %s16108_s3 = inlined_call_operand.vmem [shape: f32[200,3], index: 3, kind: input, shape index: {}]   ;;  %s16109_s4 = inlined_call_operand.vmem [shape: f32[1,3], index: 4, kind: input, shape index: {}]   ;;  %s16110_s5 = inlined_call_operand.hbm [shape: f32[2,3], index: 5, kind: output, shape index: {}]  }
   0x1   :  { %v10365_v0 = vld [vmem:[%s16106_s1 + $0x4] ss:$8 sps:$4 sm:$0xff]   ;;  %v10369_v2 = vld [vmem:[%s16106_s1] ss:$8 sps:$4 sm:$0xff]   ;;  %v10371_v4 = vld [vmem:[%s16106_s1 + $0x14] ss:$8 sps:$4 sm:$0xff]   ;;  %v59_v37 = vunpack.c.l.s4 %v12135_v36 }
   0x2   :  { %v10367_v1 = vld [vmem:[%s16106_s1 + $0x1204] ss:$8 sps:$4 sm:$0xff]   ;;  %7431 = vmatprep.subr.bf16.mxu1 %v10365_v0  ;;  %v10370_v3 = vld [vmem:[%s16106_s1 + $0x1200] ss:$8 sps:$4 sm:$0xff]   ;;  %v10373_v5 = vld [vmem:[%s16106_s1 + $0x1214] ss:$8 sps:$4 sm:$0xff]  }
   0x3   :  { %8169 = vmatprep.subr.bf16.mxu0 %v10367_v1  ;;  %7432 = vmatpush1.bf16.msra.mxu1 %v10369_v2  ;;  %v10375_v6 = vld [vmem:[%s16106_s1 + $0x10] ss:$8 sps:$4 sm:$0xff]   ;;  %v10377_v8 = vld [vmem:[%s16106_s1 + $0x24] ss:$8 sps:$4 sm:$0xff]   ;;  %v10381_v10 = vld [vmem:[%s16106_s1 + $0x20] ss:$8 sps:$4 sm:$0xff]   ;;  %v60_v42 = vunpack.c.0.s8 %v59_v37 }
   0x4   :  { %8170 = vmatpush1.bf16.msra.mxu0 %v10370_v3  ;;  %7433 = vmatprep.subr.bf16.mxu1 %v10371_v4  ;;  %v10376_v7 = vld [vmem:[%s16106_s1 + $0x1210] ss:$8 sps:$4 sm:$0xff]   ;;  %v10379_v9 = vld [vmem:[%s16106_s1 + $0x1224] ss:$8 sps:$4 sm:$0xff]   ;;  %v10382_v11 = vld [vmem:[%s16106_s1 + $0x1220] ss:$8 sps:$4 sm:$0xff]  }
   0x5   :  { %8171 = vmatprep.subr.bf16.mxu0 %v10373_v5  ;;  %v10383_v12 = vld [vmem:[%s16106_s1 + $0x34] ss:$8 sps:$4 sm:$0xff]   ;;  %v10387_v14 = vld [vmem:[%s16106_s1 + $0x30] ss:$8 sps:$4 sm:$0xff]   ;;  %v10389_v16 = vld [vmem:[%s16106_s1 + $0x44] ss:$8 sps:$4 sm:$0xff]  }
   0x6   :  { %v10385_v13 = vld [vmem:[%s16106_s1 + $0x1234] ss:$8 sps:$4 sm:$0xff]   ;;  %v10388_v15 = vld [vmem:[%s16106_s1 + $0x1230] ss:$8 sps:$4 sm:$0xff]   ;;  %v10391_v17 = vld [vmem:[%s16106_s1 + $0x1244] ss:$8 sps:$4 sm:$0xff]  }
   0x7   :  { %7434 = vmatpush1.bf16.msra.mxu1 %v10375_v6  ;;  %v10393_v18 = vld [vmem:[%s16106_s1 + $0x40] ss:$8 sps:$4 sm:$0xff]   ;;  %v10395_v20 = vld [vmem:[%s16106_s1 + $0x54] ss:$8 sps:$4 sm:$0xff]   ;;  %v10399_v22 = vld [vmem:[%s16106_s1 + $0x50] ss:$8 sps:$4 sm:$0xff]  }
   0x8   :  { %8172 = vmatpush1.bf16.msra.mxu0 %v10376_v7  ;;  %7435 = vmatprep.subr.bf16.mxu1 %v10377_v8  ;;  %v10394_v19 = vld [vmem:[%s16106_s1 + $0x1240] ss:$8 sps:$4 sm:$0xff]   ;;  %v10397_v21 = vld [vmem:[%s16106_s1 + $0x1254] ss:$8 sps:$4 sm:$0xff]   ;;  %v10400_v23 = vld [vmem:[%s16106_s1 + $0x1250] ss:$8 sps:$4 sm:$0xff]  }
   0x9   :  { %8173 = vmatprep.subr.bf16.mxu0 %v10379_v9  ;;  %v10401_v24 = vld [vmem:[%s16106_s1 + $0x64] ss:$8 sps:$4 sm:$0xff]   ;;  %v10405_v26 = vld [vmem:[%s16106_s1 + $0x60] ss:$8 sps:$4 sm:$0xff]   ;;  %v10407_v28 = vld [vmem:[%s16106_s1 + $0x74] ss:$8 sps:$4 sm:$0xff]  }
   0xa   :  { %v10403_v25 = vld [vmem:[%s16106_s1 + $0x1264] ss:$8 sps:$4 sm:$0xff]   ;;  %v10406_v27 = vld [vmem:[%s16106_s1 + $0x1260] ss:$8 sps:$4 sm:$0xff]   ;;  %v10409_v29 = vld [vmem:[%s16106_s1 + $0x1274] ss:$8 sps:$4 sm:$0xff]  }
   0xb   :  { %7436 = vmatpush1.bf16.msra.mxu1 %v10381_v10  ;;  %v10411_v30 = vld [vmem:[%s16106_s1 + $0x70] ss:$8 sps:$4 sm:$0xff]   ;;  %v10413_v32 = vld [vmem:[%s16106_s1 + $0x84] ss:$8 sps:$4 sm:$0xff]   ;;  %v10417_v34 = vld [vmem:[%s16106_s1 + $0x80] ss:$8 sps:$4 sm:$0xff]  }
   0xc   :  { %8174 = vmatpush1.bf16.msra.mxu0 %v10382_v11  ;;  %7437 = vmatprep.subr.bf16.mxu1 %v10383_v12  ;;  %v10412_v31 = vld [vmem:[%s16106_s1 + $0x1270] ss:$8 sps:$4 sm:$0xff]   ;;  %v10415_v33 = vld [vmem:[%s16106_s1 + $0x1284] ss:$8 sps:$4 sm:$0xff]   ;;  %v10418_v35 = vld [vmem:[%s16106_s1 + $0x1280] ss:$8 sps:$4 sm:$0xff]  }
   0xd   :  { %8175 = vmatprep.subr.bf16.mxu0 %v10385_v13  ;;  %v10419_v39 = vld [vmem:[%s16106_s1 + $0x94] ss:$8 sps:$4 sm:$0xff]   ;;  %v10423_v41 = vld [vmem:[%s16106_s1 + $0x90] ss:$8 sps:$4 sm:$0xff]   ;;  %v12286_v43 = vshrl.u32 %v61_v38, 7  ;;  %v21_v52 = vld [vmem:[%s16105_s0] sm:$0xff] }
   0xe   :  { %v10421_v40 = vld [vmem:[%s16106_s1 + $0x1294] ss:$8 sps:$4 sm:$0xff]   ;;  %v10424_v44 = vld [vmem:[%s16106_s1 + $0x1290] ss:$8 sps:$4 sm:$0xff]   ;;  %v10425_v45 = vld [vmem:[%s16106_s1 + $0xa4] ss:$8 sps:$4 sm:$0xff]   ;;  %v57_v8 = vcombine.high %v21_v52, %v21_v52 }
   0xf   :  { %7438 = vmatpush1.bf16.msra.mxu1 %v10387_v14  ;;  %v10427_v46 = vld [vmem:[%s16106_s1 + $0x12a4] ss:$8 sps:$4 sm:$0xff]   ;;  %v10429_v47 = vld [vmem:[%s16106_s1 + $0xa0] ss:$8 sps:$4 sm:$0xff]   ;;  %v12304_v49 = vsub.s32 %v60_v42, %v12286_v43  ;;  %v10431_v50 = vld [vmem:[%s16106_s1 + $0xb4] ss:$8 sps:$4 sm:$0xff]  }
  0x10   :  { %8176 = vmatpush1.bf16.msra.mxu0 %v10388_v15  ;;  %7439 = vmatprep.subr.bf16.mxu1 %v10389_v16  ;;  %v10430_v48 = vld [vmem:[%s16106_s1 + $0x12a0] ss:$8 sps:$4 sm:$0xff]   ;;  %v10433_v51 = vld [vmem:[%s16106_s1 + $0x12b4] ss:$8 sps:$4 sm:$0xff]   ;;  %v10435_v53 = vld [vmem:[%s16106_s1 + $0xb0] ss:$8 sps:$4 sm:$0xff]  }
  0x11   :  { %8177 = vmatprep.subr.bf16.mxu0 %v10391_v17  ;;  %v12319_v54 = vrot.slane %v21_v52, %v12304_v49  ;;  %v10436_v55 = vld [vmem:[%s16106_s1 + $0x12b0] ss:$8 sps:$4 sm:$0xff]   ;;  %v30_v56 = vld [vmem:[%s16105_s0 + $0x48] sm:$0xff]  ;;  %v10443_v1 = vld [vmem:[%s16106_s1 + $0xd4] ss:$8 sps:$4 sm:$0xff]   ;;  %v12373_v14 = vrot.slane %v57_v8, %v12304_v49 }
  0x12   :  { %v10437_v57 = vld [vmem:[%s16106_s1 + $0xc4] ss:$8 sps:$4 sm:$0xff]   ;;  %v217_v60 = vrot.slane %v30_v56, %v12304_v49  ;;  %v10441_v63 = vld [vmem:[%s16106_s1 + $0xc0] ss:$8 sps:$4 sm:$0xff]   ;;  %v10445_v2 = vld [vmem:[%s16106_s1 + $0x12d4] ss:$8 sps:$4 sm:$0xff]   ;;  %v210_v9 = vcombine.high %v30_v56, %v30_v56 }
  0x13   :  { %7440 = vmatpush1.bf16.msra.mxu1 %v10393_v18  ;;  %v10439_v58 = vld [vmem:[%s16106_s1 + $0x12c4] ss:$8 sps:$4 sm:$0xff]   ;;  %v72_v59 = vcombine.high %v12319_v54, %v12319_v54  ;;  %v10442_v0 = vld [vmem:[%s16106_s1 + $0x12c0] ss:$8 sps:$4 sm:$0xff]   ;;  %v10447_v4 = vld [vmem:[%s16106_s1 + $0xd0] ss:$8 sps:$4 sm:$0xff]  }
  0x14   :  { %8178 = vmatpush1.bf16.msra.mxu0 %v10394_v19  ;;  %7441 = vmatprep.subr.bf16.mxu1 %v10395_v20  ;;  %v225_v62 = vcombine.high %v217_v60, %v217_v60  ;;  %v10448_v5 = vld [vmem:[%s16106_s1 + $0x12d0] ss:$8 sps:$4 sm:$0xff]   ;;  %v10449_v6 = vld [vmem:[%s16106_s1 + $0xe4] ss:$8 sps:$4 sm:$0xff]   ;;  %v10453_v10 = vld [vmem:[%s16106_s1 + $0xe0] ss:$8 sps:$4 sm:$0xff]   ;;  %v12376_v15 = vrot.slane %v210_v9, %v12304_v49  ;;  %v73_v20 = vcombine.high %v12373_v14, %v12373_v14 }
  0x15   :  { %8179 = vmatprep.subr.bf16.mxu0 %v10397_v21  ;;  %v436_v61 = vpack.c.bf16 %v72_v59, %v72_v59  ;;  %v10451_v7 = vld [vmem:[%s16106_s1 + $0x12e4] ss:$8 sps:$4 sm:$0xff]   ;;  %v10454_v11 = vld [vmem:[%s16106_s1 + $0x12e0] ss:$8 sps:$4 sm:$0xff]   ;;  %v10455_v12 = vld [vmem:[%s16106_s1 + $0xf4] ss:$8 sps:$4 sm:$0xff]  }
  0x16   :  { %v472_v3 = vpack.c.bf16 %v225_v62, %v225_v62  ;;  %v10457_v13 = vld [vmem:[%s16106_s1 + $0x12f4] ss:$8 sps:$4 sm:$0xff]   ;;  %v10459_v16 = vld [vmem:[%s16106_s1 + $0xf0] ss:$8 sps:$4 sm:$0xff]   ;;  %v10464_v18 = vld [vmem:[%s16106_s1 + $0x104] ss:$8 sps:$4 sm:$0xff]   ;;  %v226_v21 = vcombine.high %v12376_v15, %v12376_v15 }
  0x17   :  { %7442 = vmatpush1.bf16.msra.mxu1 %v10399_v22  ;;  %7463 = vmatprep.mubr.bf16.mxu1 %v436_v61  ;;  %v10460_v17 = vld [vmem:[%s16106_s1 + $0x12f0] ss:$8 sps:$4 sm:$0xff]   ;;  %v10468_v19 = vld [vmem:[%s16106_s1 + $0x1304] ss:$8 sps:$4 sm:$0xff]   ;;  %v435_v22 = vpack.c.bf16 %v12319_v54, %v12319_v54  ;;  %v10483_v36 = vld [vmem:[%s16106_s1 + $0x134] ss:$8 sps:$4 sm:$0xff]  }
  0x18   :  { %8180 = vmatpush1.bf16.msra.mxu0 %v10400_v23  ;;  %7443 = vmatprep.subr.bf16.mxu1 %v10401_v24  ;;  %v471_v23 = vpack.c.bf16 %v217_v60, %v217_v60  ;;  %v10462_v24 = vld [vmem:[%s16106_s1 + $0x100] ss:$8 sps:$4 sm:$0xff]   ;;  %v10486_v37 = vld [vmem:[%s16106_s1 + $0x1334] ss:$8 sps:$4 sm:$0xff]   ;;  %v10481_v38 = vld [vmem:[%s16106_s1 + $0x130] ss:$8 sps:$4 sm:$0xff]  }
  0x19   :  { %8181 = vmatprep.subr.bf16.mxu0 %v10403_v25  ;;  %8201 = vmatprep.mubr.bf16.mxu0 %v472_v3  ;;  %v10466_v25 = vld [vmem:[%s16106_s1 + $0x1300] ss:$8 sps:$4 sm:$0xff]   ;;  %v10507_v54 = vld [vmem:[%s16106_s1 + $0x174] ss:$8 sps:$4 sm:$0xff]   ;;  %v10505_v56 = vld [vmem:[%s16106_s1 + $0x170] ss:$8 sps:$4 sm:$0xff]  }
  0x1a   :  { %v10487_v42 = vld [vmem:[%s16106_s1 + $0x140] ss:$8 sps:$4 sm:$0xff]   ;;  %v10516_v59 = vld [vmem:[%s16106_s1 + $0x1384] ss:$8 sps:$4 sm:$0xff]   ;;  %v10519_v62 = vld [vmem:[%s16106_s1 + $0x194] ss:$8 sps:$4 sm:$0xff]  }
  0x1b   :  { %7444 = vmatpush1.bf16.msra.mxu1 %v10405_v26  ;;  %v10471_v26 = vld [vmem:[%s16106_s1 + $0x114] ss:$8 sps:$4 sm:$0xff]   ;;  %v10499_v52 = vld [vmem:[%s16106_s1 + $0x160] ss:$8 sps:$4 sm:$0xff]   ;;  %v10528_v3 = vld [vmem:[%s16106_s1 + $0x13a4] ss:$8 sps:$4 sm:$0xff]  }
  0x1c   :  { %8182 = vmatpush1.bf16.msra.mxu0 %v10406_v27  ;;  %7445 = vmatprep.subr.bf16.mxu1 %v10407_v28  ;;  %v10474_v27 = vld [vmem:[%s16106_s1 + $0x1314] ss:$8 sps:$4 sm:$0xff]   ;;  %v438_v28 = vpack.c.bf16 %v73_v20, %v73_v20  ;;  %v10511_v60 = vld [vmem:[%s16106_s1 + $0x180] ss:$8 sps:$4 sm:$0xff]   ;;  %v10529_v8 = vld [vmem:[%s16106_s1 + $0x1b0] ss:$8 sps:$4 sm:$0xff]  }
  0x1d   :  { %8183 = vmatprep.subr.bf16.mxu0 %v10409_v29  ;;  %v474_v29 = vpack.c.bf16 %v226_v21, %v226_v21  ;;  %v10514_v61 = vld [vmem:[%s16106_s1 + $0x1380] ss:$8 sps:$4 sm:$0xff]   ;;  %v10532_v9 = vld [vmem:[%s16106_s1 + $0x13b0] ss:$8 sps:$4 sm:$0xff]   ;;  %v10549_v20 = vld [vmem:[%s16106_s1 + $0x1e4] ss:$8 sps:$4 sm:$0xff]  }
  0x1e   :  { %v10552_v21 = vld [vmem:[%s16106_s1 + $0x13e4] ss:$8 sps:$4 sm:$0xff]  }
  0x1f   :  { %7446 = vmatpush1.bf16.msra.mxu1 %v10411_v30  ;;  %v10469_v30 = vld [vmem:[%s16106_s1 + $0x110] ss:$8 sps:$4 sm:$0xff]  }
  0x20   :  { %8184 = vmatpush1.bf16.msra.mxu0 %v10412_v31  ;;  %7447 = vmatprep.subr.bf16.mxu1 %v10413_v32  ;;  %v10472_v31 = vld [vmem:[%s16106_s1 + $0x1310] ss:$8 sps:$4 sm:$0xff]   ;;  %v10477_v32 = vld [vmem:[%s16106_s1 + $0x124] ss:$8 sps:$4 sm:$0xff]  }
  0x21   :  { %8185 = vmatprep.subr.bf16.mxu0 %v10415_v33  ;;  %v10480_v33 = vld [vmem:[%s16106_s1 + $0x1324] ss:$8 sps:$4 sm:$0xff]  }
  0x23   :  { %7448 = vmatpush1.bf16.msra.mxu1 %v10417_v34  ;;  %v10475_v34 = vld [vmem:[%s16106_s1 + $0x120] ss:$8 sps:$4 sm:$0xff]  }
  0x24   :  { %8186 = vmatpush1.bf16.msra.mxu0 %v10418_v35  ;;  %7449 = vmatprep.subr.bf16.mxu1 %v10419_v39  ;;  %v10478_v35 = vld [vmem:[%s16106_s1 + $0x1320] ss:$8 sps:$4 sm:$0xff]   ;;  %v10484_v39 = vld [vmem:[%s16106_s1 + $0x1330] ss:$8 sps:$4 sm:$0xff]  }
  0x25   :  { %8187 = vmatprep.subr.bf16.mxu0 %v10421_v40  ;;  %v10489_v40 = vld [vmem:[%s16106_s1 + $0x144] ss:$8 sps:$4 sm:$0xff]  }
  0x27   :  { %7450 = vmatpush1.bf16.msra.mxu1 %v10423_v41  ;;  %v10492_v41 = vld [vmem:[%s16106_s1 + $0x1344] ss:$8 sps:$4 sm:$0xff]  }
  0x28   :  { %8188 = vmatpush1.bf16.msra.mxu0 %v10424_v44  ;;  %7451 = vmatprep.subr.bf16.mxu1 %v10425_v45  ;;  %v10490_v44 = vld [vmem:[%s16106_s1 + $0x1340] ss:$8 sps:$4 sm:$0xff]   ;;  %v10495_v45 = vld [vmem:[%s16106_s1 + $0x154] ss:$8 sps:$4 sm:$0xff]  }
  0x29   :  { %8189 = vmatprep.subr.bf16.mxu0 %v10427_v46  ;;  %v10498_v46 = vld [vmem:[%s16106_s1 + $0x1354] ss:$8 sps:$4 sm:$0xff]  }
  0x2b   :  { %7452 = vmatpush1.bf16.msra.mxu1 %v10429_v47  ;;  %v10493_v47 = vld [vmem:[%s16106_s1 + $0x150] ss:$8 sps:$4 sm:$0xff]  }
  0x2c   :  { %8190 = vmatpush1.bf16.msra.mxu0 %v10430_v48  ;;  %7453 = vmatprep.subr.bf16.mxu1 %v10431_v50  ;;  %v10496_v48 = vld [vmem:[%s16106_s1 + $0x1350] ss:$8 sps:$4 sm:$0xff]   ;;  %v10501_v50 = vld [vmem:[%s16106_s1 + $0x164] ss:$8 sps:$4 sm:$0xff]  }
  0x2d   :  { %8191 = vmatprep.subr.bf16.mxu0 %v10433_v51  ;;  %v10504_v51 = vld [vmem:[%s16106_s1 + $0x1364] ss:$8 sps:$4 sm:$0xff]  }
  0x2f   :  { %7454 = vmatpush1.bf16.msra.mxu1 %v10435_v53  ;;  %v10502_v53 = vld [vmem:[%s16106_s1 + $0x1360] ss:$8 sps:$4 sm:$0xff]  }
  0x30   :  { %8192 = vmatpush1.bf16.msra.mxu0 %v10436_v55  ;;  %7455 = vmatprep.subr.bf16.mxu1 %v10437_v57  ;;  %v10510_v55 = vld [vmem:[%s16106_s1 + $0x1374] ss:$8 sps:$4 sm:$0xff]   ;;  %v10508_v57 = vld [vmem:[%s16106_s1 + $0x1370] ss:$8 sps:$4 sm:$0xff]  }
  0x31   :  { %8193 = vmatprep.subr.bf16.mxu0 %v10439_v58  ;;  %v10513_v58 = vld [vmem:[%s16106_s1 + $0x184] ss:$8 sps:$4 sm:$0xff]  }
  0x33   :  { %7456 = vmatpush1.bf16.msra.mxu1 %v10441_v63  ;;  %v10522_v63 = vld [vmem:[%s16106_s1 + $0x1394] ss:$8 sps:$4 sm:$0xff]  }
  0x34   :  { %8194 = vmatpush1.bf16.msra.mxu0 %v10442_v0  ;;  %7457 = vmatprep.subr.bf16.mxu1 %v10443_v1  ;;  %v10517_v0 = vld [vmem:[%s16106_s1 + $0x190] ss:$8 sps:$4 sm:$0xff]  }
  0x35   :  { %8195 = vmatprep.subr.bf16.mxu0 %v10445_v2  ;;  %v10520_v1 = vld [vmem:[%s16106_s1 + $0x1390] ss:$8 sps:$4 sm:$0xff]   ;;  %v10525_v2 = vld [vmem:[%s16106_s1 + $0x1a4] ss:$8 sps:$4 sm:$0xff]  }
  0x37   :  { %7458 = vmatpush1.bf16.msra.mxu1 %v10447_v4  ;;  %v10523_v4 = vld [vmem:[%s16106_s1 + $0x1a0] ss:$8 sps:$4 sm:$0xff]  }
  0x38   :  { %8196 = vmatpush1.bf16.msra.mxu0 %v10448_v5  ;;  %7459 = vmatprep.subr.bf16.mxu1 %v10449_v6  ;;  %v10526_v5 = vld [vmem:[%s16106_s1 + $0x13a0] ss:$8 sps:$4 sm:$0xff]   ;;  %v10531_v6 = vld [vmem:[%s16106_s1 + $0x1b4] ss:$8 sps:$4 sm:$0xff]  }
  0x39   :  { %8197 = vmatprep.subr.bf16.mxu0 %v10451_v7  ;;  %v10534_v7 = vld [vmem:[%s16106_s1 + $0x13b4] ss:$8 sps:$4 sm:$0xff]  }
  0x3b   :  { %7460 = vmatpush1.bf16.msra.mxu1 %v10453_v10  ;;  %v10537_v10 = vld [vmem:[%s16106_s1 + $0x1c4] ss:$8 sps:$4 sm:$0xff]  }
  0x3c   :  { %8198 = vmatpush1.bf16.msra.mxu0 %v10454_v11  ;;  %7461 = vmatprep.subr.bf16.mxu1 %v10455_v12  ;;  %v10540_v11 = vld [vmem:[%s16106_s1 + $0x13c4] ss:$8 sps:$4 sm:$0xff]   ;;  %v10535_v12 = vld [vmem:[%s16106_s1 + $0x1c0] ss:$8 sps:$4 sm:$0xff]  }
  0x3d   :  { %8199 = vmatprep.subr.bf16.mxu0 %v10457_v13  ;;  %v10538_v13 = vld [vmem:[%s16106_s1 + $0x13c0] ss:$8 sps:$4 sm:$0xff]  }
  0x3f   :  { %7462 = vmatpush1.bf16.msra.mxu1 %v10459_v16  ;;  %v10543_v16 = vld [vmem:[%s16106_s1 + $0x1d4] ss:$8 sps:$4 sm:$0xff]  }
  0x40   :  { %8200 = vmatpush1.bf16.msra.mxu0 %v10460_v17  ;;  %7472 = vmatprep.subr.bf16.mxu1 %v10464_v18  ;;  %v10546_v17 = vld [vmem:[%s16106_s1 + $0x13d4] ss:$8 sps:$4 sm:$0xff]   ;;  %v10541_v18 = vld [vmem:[%s16106_s1 + $0x1d0] ss:$8 sps:$4 sm:$0xff]  }
  0x41   :  { %8210 = vmatprep.subr.bf16.mxu0 %v10468_v19  ;;  %v10544_v19 = vld [vmem:[%s16106_s1 + $0x13d0] ss:$8 sps:$4 sm:$0xff]  }
  0x42   :  { %7464 = vmatmul.mubr.bf16.vlgmr.msra.gmra.mrb[0].mxu1 %v435_v22  ;;  %v10547_v22 = vld [vmem:[%s16106_s1 + $0x1e0] ss:$8 sps:$4 sm:$0xff]  }
  0x43   :  { %8202 = vmatmul.mubr.bf16.vlgmr.msra.gmra.mrb[0].mxu0 %v471_v23  ;;  %7473 = vmatpush1.bf16.msra.mxu1 %v10462_v24  ;;  %v10550_v23 = vld [vmem:[%s16106_s1 + $0x13e0] ss:$8 sps:$4 sm:$0xff]   ;;  %v10555_v24 = vld [vmem:[%s16106_s1 + $0x1f4] ss:$8 sps:$4 sm:$0xff]  }
  0x44   :  { %8211 = vmatpush1.bf16.msra.mxu0 %v10466_v25  ;;  %7474 = vmatprep.subr.bf16.mxu1 %v10471_v26  ;;  %v10558_v25 = vld [vmem:[%s16106_s1 + $0x13f4] ss:$8 sps:$4 sm:$0xff]   ;;  %v10553_v26 = vld [vmem:[%s16106_s1 + $0x1f0] ss:$8 sps:$4 sm:$0xff]  }
  0x45   :  { %8212 = vmatprep.subr.bf16.mxu0 %v10474_v27  ;;  %7504 = vmatprep.mubr.bf16.mxu1 %v438_v28  ;;  %v10556_v27 = vld [vmem:[%s16106_s1 + $0x13f0] ss:$8 sps:$4 sm:$0xff]   ;;  %v10561_v28 = vld [vmem:[%s16106_s1 + $0x204] ss:$8 sps:$4 sm:$0xff]  }
  0x46   :  { %8242 = vmatprep.mubr.bf16.mxu0 %v474_v29  ;;  %v10564_v29 = vld [vmem:[%s16106_s1 + $0x1404] ss:$8 sps:$4 sm:$0xff]  }
  0x47   :  { %7475 = vmatpush1.bf16.msra.mxu1 %v10469_v30  ;;  %v10559_v30 = vld [vmem:[%s16106_s1 + $0x200] ss:$8 sps:$4 sm:$0xff]  }
  0x48   :  { %8213 = vmatpush1.bf16.msra.mxu0 %v10472_v31  ;;  %7476 = vmatprep.subr.bf16.mxu1 %v10477_v32  ;;  %v437_v31 = vpack.c.bf16 %v12373_v14, %v12373_v14  ;;  %v473_v32 = vpack.c.bf16 %v12376_v15, %v12376_v15  ;;  %v10570_v14 = vld [vmem:[%s16106_s1 + $0x1414] ss:$8 sps:$4 sm:$0xff]  }
  0x49   :  { %8214 = vmatprep.subr.bf16.mxu0 %v10480_v33  ;;  %v10562_v33 = vld [vmem:[%s16106_s1 + $0x1400] ss:$8 sps:$4 sm:$0xff]  }
  0x4b   :  { %7477 = vmatpush1.bf16.msra.mxu1 %v10475_v34  ;;  %v10567_v34 = vld [vmem:[%s16106_s1 + $0x214] ss:$8 sps:$4 sm:$0xff]  }
  0x4c   :  { %8215 = vmatpush1.bf16.msra.mxu0 %v10478_v35  ;;  %7478 = vmatprep.subr.bf16.mxu1 %v10483_v36  ;;  %v12604_v35 = vld [vmem:[%s16105_s0 + $0x8] sm:$0xff]  ;;  %v12616_v36 = vld [vmem:[%s16105_s0 + $0x50] sm:$0xff] }
  0x4d   :  { %8216 = vmatprep.subr.bf16.mxu0 %v10486_v37  ;;  %v12611_v15 = vrot.slane %v12604_v35, %v12304_v49  ;;  %v10565_v37 = vld [vmem:[%s16106_s1 + $0x210] ss:$8 sps:$4 sm:$0xff]  }
  0x4f   :  { %7479 = vmatpush1.bf16.msra.mxu1 %v10481_v38  ;;  %v10568_v38 = vld [vmem:[%s16106_s1 + $0x1410] ss:$8 sps:$4 sm:$0xff]  }
  0x50   :  { %8217 = vmatpush1.bf16.msra.mxu0 %v10484_v39  ;;  %7480 = vmatprep.subr.bf16.mxu1 %v10489_v40  ;;  %v89_v39 = vcombine.high %v12611_v15, %v12611_v15  ;;  %v12628_v40 = vrot.slane %v12616_v36, %v12304_v49 }
  0x51   :  { %8218 = vmatprep.subr.bf16.mxu0 %v10492_v41  ;;  %v10573_v41 = vld [vmem:[%s16106_s1 + $0x224] ss:$8 sps:$4 sm:$0xff]  }
  0x53   :  { %7481 = vmatpush1.bf16.msra.mxu1 %v10487_v42  ;;  %v10576_v42 = vld [vmem:[%s16106_s1 + $0x1424] ss:$8 sps:$4 sm:$0xff]  }
  0x54   :  { %8219 = vmatpush1.bf16.msra.mxu0 %v10490_v44  ;;  %7482 = vmatprep.subr.bf16.mxu1 %v10495_v45  ;;  %v440_v44 = vpack.c.bf16 %v89_v39, %v89_v39  ;;  %v242_v45 = vcombine.high %v12628_v40, %v12628_v40  ;;  %v10651_v39 = vld [vmem:[%s16106_s1 + $0x2f4] ss:$8 sps:$4 sm:$0xff]  }
  0x55   :  { %8220 = vmatprep.subr.bf16.mxu0 %v10498_v46  ;;  %v10571_v46 = vld [vmem:[%s16106_s1 + $0x220] ss:$8 sps:$4 sm:$0xff]  }
  0x57   :  { %7483 = vmatpush1.bf16.msra.mxu1 %v10493_v47  ;;  %v10574_v47 = vld [vmem:[%s16106_s1 + $0x1420] ss:$8 sps:$4 sm:$0xff]  }
  0x58   :  { %8221 = vmatpush1.bf16.msra.mxu0 %v10496_v48  ;;  %7484 = vmatprep.subr.bf16.mxu1 %v10501_v50  ;;  %v476_v48 = vpack.c.bf16 %v242_v45, %v242_v45  ;;  %v10579_v50 = vld [vmem:[%s16106_s1 + $0x234] ss:$8 sps:$4 sm:$0xff]   ;;  %v10657_v45 = vld [vmem:[%s16106_s1 + $0x304] ss:$8 sps:$4 sm:$0xff]  }
  0x59   :  { %8222 = vmatprep.subr.bf16.mxu0 %v10504_v51  ;;  %v10582_v51 = vld [vmem:[%s16106_s1 + $0x1434] ss:$8 sps:$4 sm:$0xff]  }
  0x5b   :  { %7485 = vmatpush1.bf16.msra.mxu1 %v10499_v52  ;;  %v10577_v52 = vld [vmem:[%s16106_s1 + $0x230] ss:$8 sps:$4 sm:$0xff]  }
  0x5c   :  { %8223 = vmatpush1.bf16.msra.mxu0 %v10502_v53  ;;  %7486 = vmatprep.subr.bf16.mxu1 %v10507_v54  ;;  %v10580_v53 = vld [vmem:[%s16106_s1 + $0x1430] ss:$8 sps:$4 sm:$0xff]   ;;  %v10585_v54 = vld [vmem:[%s16106_s1 + $0x244] ss:$8 sps:$4 sm:$0xff]  }
  0x5d   :  { %8224 = vmatprep.subr.bf16.mxu0 %v10510_v55  ;;  %v10588_v55 = vld [vmem:[%s16106_s1 + $0x1444] ss:$8 sps:$4 sm:$0xff]  }
  0x5f   :  { %7487 = vmatpush1.bf16.msra.mxu1 %v10505_v56  ;;  %v10583_v56 = vld [vmem:[%s16106_s1 + $0x240] ss:$8 sps:$4 sm:$0xff]  }
  0x60   :  { %8225 = vmatpush1.bf16.msra.mxu0 %v10508_v57  ;;  %7488 = vmatprep.subr.bf16.mxu1 %v10513_v58  ;;  %v10586_v57 = vld [vmem:[%s16106_s1 + $0x1440] ss:$8 sps:$4 sm:$0xff]   ;;  %v10591_v58 = vld [vmem:[%s16106_s1 + $0x254] ss:$8 sps:$4 sm:$0xff]  }
  0x61   :  { %8226 = vmatprep.subr.bf16.mxu0 %v10516_v59  ;;  %v10594_v59 = vld [vmem:[%s16106_s1 + $0x1454] ss:$8 sps:$4 sm:$0xff]  }
  0x63   :  { %7489 = vmatpush1.bf16.msra.mxu1 %v10511_v60  ;;  %v10589_v60 = vld [vmem:[%s16106_s1 + $0x250] ss:$8 sps:$4 sm:$0xff]  }
  0x64   :  { %8227 = vmatpush1.bf16.msra.mxu0 %v10514_v61  ;;  %7490 = vmatprep.subr.bf16.mxu1 %v10519_v62  ;;  %v10592_v61 = vld [vmem:[%s16106_s1 + $0x1450] ss:$8 sps:$4 sm:$0xff]   ;;  %v10597_v62 = vld [vmem:[%s16106_s1 + $0x264] ss:$8 sps:$4 sm:$0xff]  }
  0x65   :  { %8228 = vmatprep.subr.bf16.mxu0 %v10522_v63  ;;  %v10600_v63 = vld [vmem:[%s16106_s1 + $0x1464] ss:$8 sps:$4 sm:$0xff]  }
  0x67   :  { %7491 = vmatpush1.bf16.msra.mxu1 %v10517_v0  ;;  %v10595_v0 = vld [vmem:[%s16106_s1 + $0x260] ss:$8 sps:$4 sm:$0xff]  }
  0x68   :  { %8229 = vmatpush1.bf16.msra.mxu0 %v10520_v1  ;;  %7492 = vmatprep.subr.bf16.mxu1 %v10525_v2  ;;  %v10598_v1 = vld [vmem:[%s16106_s1 + $0x1460] ss:$8 sps:$4 sm:$0xff]   ;;  %v10603_v2 = vld [vmem:[%s16106_s1 + $0x274] ss:$8 sps:$4 sm:$0xff]  }
  0x69   :  { %8230 = vmatprep.subr.bf16.mxu0 %v10528_v3  ;;  %v10606_v3 = vld [vmem:[%s16106_s1 + $0x1474] ss:$8 sps:$4 sm:$0xff]  }
  0x6b   :  { %7493 = vmatpush1.bf16.msra.mxu1 %v10523_v4  ;;  %v10601_v4 = vld [vmem:[%s16106_s1 + $0x270] ss:$8 sps:$4 sm:$0xff]  }
  0x6c   :  { %8231 = vmatpush1.bf16.msra.mxu0 %v10526_v5  ;;  %7494 = vmatprep.subr.bf16.mxu1 %v10531_v6  ;;  %v10604_v5 = vld [vmem:[%s16106_s1 + $0x1470] ss:$8 sps:$4 sm:$0xff]   ;;  %v10609_v6 = vld [vmem:[%s16106_s1 + $0x284] ss:$8 sps:$4 sm:$0xff]  }
  0x6d   :  { %8232 = vmatprep.subr.bf16.mxu0 %v10534_v7  ;;  %v10612_v7 = vld [vmem:[%s16106_s1 + $0x1484] ss:$8 sps:$4 sm:$0xff]  }
  0x6f   :  { %7495 = vmatpush1.bf16.msra.mxu1 %v10529_v8  ;;  %v10607_v8 = vld [vmem:[%s16106_s1 + $0x280] ss:$8 sps:$4 sm:$0xff]  }
  0x70   :  { %8233 = vmatpush1.bf16.msra.mxu0 %v10532_v9  ;;  %7496 = vmatprep.subr.bf16.mxu1 %v10537_v10  ;;  %v10610_v9 = vld [vmem:[%s16106_s1 + $0x1480] ss:$8 sps:$4 sm:$0xff]   ;;  %v10615_v10 = vld [vmem:[%s16106_s1 + $0x294] ss:$8 sps:$4 sm:$0xff]  }
  0x71   :  { %8234 = vmatprep.subr.bf16.mxu0 %v10540_v11  ;;  %v10618_v11 = vld [vmem:[%s16106_s1 + $0x1494] ss:$8 sps:$4 sm:$0xff]  }
  0x73   :  { %7497 = vmatpush1.bf16.msra.mxu1 %v10535_v12  ;;  %v10613_v12 = vld [vmem:[%s16106_s1 + $0x290] ss:$8 sps:$4 sm:$0xff]  }
  0x74   :  { %8235 = vmatpush1.bf16.msra.mxu0 %v10538_v13  ;;  %7498 = vmatprep.subr.bf16.mxu1 %v10543_v16  ;;  %v10616_v13 = vld [vmem:[%s16106_s1 + $0x1490] ss:$8 sps:$4 sm:$0xff]   ;;  %v10621_v16 = vld [vmem:[%s16106_s1 + $0x2a4] ss:$8 sps:$4 sm:$0xff]  }
  0x75   :  { %8236 = vmatprep.subr.bf16.mxu0 %v10546_v17  ;;  %v10624_v17 = vld [vmem:[%s16106_s1 + $0x14a4] ss:$8 sps:$4 sm:$0xff]  }
  0x77   :  { %7499 = vmatpush1.bf16.msra.mxu1 %v10541_v18  ;;  %v10619_v18 = vld [vmem:[%s16106_s1 + $0x2a0] ss:$8 sps:$4 sm:$0xff]  }
  0x78   :  { %8237 = vmatpush1.bf16.msra.mxu0 %v10544_v19  ;;  %7500 = vmatprep.subr.bf16.mxu1 %v10549_v20  ;;  %v10622_v19 = vld [vmem:[%s16106_s1 + $0x14a0] ss:$8 sps:$4 sm:$0xff]   ;;  %v10627_v20 = vld [vmem:[%s16106_s1 + $0x2b4] ss:$8 sps:$4 sm:$0xff]  }
  0x79   :  { %8238 = vmatprep.subr.bf16.mxu0 %v10552_v21  ;;  %v10630_v21 = vld [vmem:[%s16106_s1 + $0x14b4] ss:$8 sps:$4 sm:$0xff]  }
  0x7b   :  { %7501 = vmatpush1.bf16.msra.mxu1 %v10547_v22  ;;  %v10625_v22 = vld [vmem:[%s16106_s1 + $0x2b0] ss:$8 sps:$4 sm:$0xff]  }
  0x7c   :  { %8239 = vmatpush1.bf16.msra.mxu0 %v10550_v23  ;;  %7502 = vmatprep.subr.bf16.mxu1 %v10555_v24  ;;  %v10628_v23 = vld [vmem:[%s16106_s1 + $0x14b0] ss:$8 sps:$4 sm:$0xff]   ;;  %v10633_v24 = vld [vmem:[%s16106_s1 + $0x2c4] ss:$8 sps:$4 sm:$0xff]  }
  0x7d   :  { %8240 = vmatprep.subr.bf16.mxu0 %v10558_v25  ;;  %v10636_v25 = vld [vmem:[%s16106_s1 + $0x14c4] ss:$8 sps:$4 sm:$0xff]  }
  0x7f   :  { %7503 = vmatpush1.bf16.msra.mxu1 %v10553_v26  ;;  %v10631_v26 = vld [vmem:[%s16106_s1 + $0x2c0] ss:$8 sps:$4 sm:$0xff]  }
  0x80   :  { %8241 = vmatpush1.bf16.msra.mxu0 %v10556_v27  ;;  %7513 = vmatprep.subr.bf16.mxu1 %v10561_v28  ;;  %v10634_v27 = vld [vmem:[%s16106_s1 + $0x14c0] ss:$8 sps:$4 sm:$0xff]   ;;  %v10639_v28 = vld [vmem:[%s16106_s1 + $0x2d4] ss:$8 sps:$4 sm:$0xff]  }
  0x81   :  { %8251 = vmatprep.subr.bf16.mxu0 %v10564_v29  ;;  %v10642_v29 = vld [vmem:[%s16106_s1 + $0x14d4] ss:$8 sps:$4 sm:$0xff]  }
  0x82   :  { %7505 = vmatmul.mubr.bf16.vlgmr.msra.gmra.mrb[0].mxu1 %v437_v31  ;;  %v10640_v31 = vld [vmem:[%s16106_s1 + $0x14d0] ss:$8 sps:$4 sm:$0xff]  }
  0x83   :  { %8243 = vmatmul.mubr.bf16.vlgmr.msra.gmra.mrb[0].mxu0 %v473_v32  ;;  %7514 = vmatpush1.bf16.msra.mxu1 %v10559_v30  ;;  %v10637_v30 = vld [vmem:[%s16106_s1 + $0x2d0] ss:$8 sps:$4 sm:$0xff]   ;;  %v10645_v32 = vld [vmem:[%s16106_s1 + $0x2e4] ss:$8 sps:$4 sm:$0xff]  }
  0x84   :  { %8252 = vmatpush1.bf16.msra.mxu0 %v10562_v33  ;;  %7515 = vmatprep.subr.bf16.mxu1 %v10567_v34  ;;  %v10648_v33 = vld [vmem:[%s16106_s1 + $0x14e4] ss:$8 sps:$4 sm:$0xff]   ;;  %v74_v34 = vcombine.high %v12604_v35, %v12604_v35  ;;  %v10654_v35 = vld [vmem:[%s16106_s1 + $0x14f4] ss:$8 sps:$4 sm:$0xff]  }
  0x85   :  { %8253 = vmatprep.subr.bf16.mxu0 %v10570_v14  ;;  %7545 = vmatprep.mubr.bf16.mxu1 %v440_v44  ;;  %v227_v14 = vcombine.high %v12616_v36, %v12616_v36  ;;  %v10652_v44 = vld [vmem:[%s16106_s1 + $0x14f0] ss:$8 sps:$4 sm:$0xff]  }
  0x86   :  { %8283 = vmatprep.mubr.bf16.mxu0 %v476_v48  ;;  %v12799_v36 = vrot.slane %v74_v34, %v12304_v49  ;;  %v10721_v34 = vld [vmem:[%s16106_s1 + $0x3b0] ss:$8 sps:$4 sm:$0xff]  }
  0x87   :  { %7516 = vmatpush1.bf16.msra.mxu1 %v10565_v37  ;;  %v10643_v37 = vld [vmem:[%s16106_s1 + $0x2e0] ss:$8 sps:$4 sm:$0xff]  }
  0x88   :  { %8254 = vmatpush1.bf16.msra.mxu0 %v10568_v38  ;;  %7517 = vmatprep.subr.bf16.mxu1 %v10573_v41  ;;  %v10646_v38 = vld [vmem:[%s16106_s1 + $0x14e0] ss:$8 sps:$4 sm:$0xff]   ;;  %v12802_v41 = vrot.slane %v227_v14, %v12304_v49  ;;  %v10724_v14 = vld [vmem:[%s16106_s1 + $0x15b0] ss:$8 sps:$4 sm:$0xff]  }
  0x89   :  { %8255 = vmatprep.subr.bf16.mxu0 %v10576_v42  ;;  %v10649_v42 = vld [vmem:[%s16106_s1 + $0x2f0] ss:$8 sps:$4 sm:$0xff]  }
  0x8a   :  { %v243_v48 = vcombine.high %v12802_v41, %v12802_v41 }
  0x8b   :  { %7518 = vmatpush1.bf16.msra.mxu1 %v10571_v46  ;;  %v10660_v46 = vld [vmem:[%s16106_s1 + $0x1504] ss:$8 sps:$4 sm:$0xff]  }
  0x8c   :  { %8256 = vmatpush1.bf16.msra.mxu0 %v10574_v47  ;;  %7519 = vmatprep.subr.bf16.mxu1 %v10579_v50  ;;  %v90_v47 = vcombine.high %v12799_v36, %v12799_v36  ;;  %v10655_v50 = vld [vmem:[%s16106_s1 + $0x300] ss:$8 sps:$4 sm:$0xff]  }
  0x8d   :  { %8257 = vmatprep.subr.bf16.mxu0 %v10582_v51  ;;  %v10658_v51 = vld [vmem:[%s16106_s1 + $0x1500] ss:$8 sps:$4 sm:$0xff]  }
  0x8f   :  { %7520 = vmatpush1.bf16.msra.mxu1 %v10577_v52  ;;  %v439_v52 = vpack.c.bf16 %v12611_v15, %v12611_v15  ;;  %v10661_v15 = vld [vmem:[%s16106_s1 + $0x310] ss:$8 sps:$4 sm:$0xff]  }
  0x90   :  { %8258 = vmatpush1.bf16.msra.mxu0 %v10580_v53  ;;  %7521 = vmatprep.subr.bf16.mxu1 %v10585_v54  ;;  %v475_v53 = vpack.c.bf16 %v12628_v40, %v12628_v40  ;;  %v10663_v54 = vld [vmem:[%s16106_s1 + $0x314] ss:$8 sps:$4 sm:$0xff]   ;;  %v10664_v40 = vld [vmem:[%s16106_s1 + $0x1510] ss:$8 sps:$4 sm:$0xff]  }
  0x91   :  { %8259 = vmatprep.subr.bf16.mxu0 %v10588_v55  ;;  %v10666_v55 = vld [vmem:[%s16106_s1 + $0x1514] ss:$8 sps:$4 sm:$0xff]  }
  0x93   :  { %7522 = vmatpush1.bf16.msra.mxu1 %v10583_v56  ;;  %v442_v56 = vpack.c.bf16 %v90_v47, %v90_v47  ;;  %v10741_v47 = vld [vmem:[%s16106_s1 + $0x3e4] ss:$8 sps:$4 sm:$0xff]  }
  0x94   :  { %8260 = vmatpush1.bf16.msra.mxu0 %v10586_v57  ;;  %7523 = vmatprep.subr.bf16.mxu1 %v10591_v58  ;;  %v478_v57 = vpack.c.bf16 %v243_v48, %v243_v48  ;;  %v10669_v58 = vld [vmem:[%s16106_s1 + $0x324] ss:$8 sps:$4 sm:$0xff]  }
  0x95   :  { %8261 = vmatprep.subr.bf16.mxu0 %v10594_v59  ;;  %v10672_v59 = vld [vmem:[%s16106_s1 + $0x1524] ss:$8 sps:$4 sm:$0xff]  }
  0x96   :  { %v10744_v48 = vld [vmem:[%s16106_s1 + $0x15e4] ss:$8 sps:$4 sm:$0xff]  }
  0x97   :  { %7524 = vmatpush1.bf16.msra.mxu1 %v10589_v60  ;;  %v10667_v60 = vld [vmem:[%s16106_s1 + $0x320] ss:$8 sps:$4 sm:$0xff]  }
  0x98   :  { %8262 = vmatpush1.bf16.msra.mxu0 %v10592_v61  ;;  %7525 = vmatprep.subr.bf16.mxu1 %v10597_v62  ;;  %v10670_v61 = vld [vmem:[%s16106_s1 + $0x1520] ss:$8 sps:$4 sm:$0xff]   ;;  %v10675_v62 = vld [vmem:[%s16106_s1 + $0x334] ss:$8 sps:$4 sm:$0xff]  }
  0x99   :  { %8263 = vmatprep.subr.bf16.mxu0 %v10600_v63  ;;  %v10678_v63 = vld [vmem:[%s16106_s1 + $0x1534] ss:$8 sps:$4 sm:$0xff]  }
  0x9b   :  { %7526 = vmatpush1.bf16.msra.mxu1 %v10595_v0  ;;  %v10673_v0 = vld [vmem:[%s16106_s1 + $0x330] ss:$8 sps:$4 sm:$0xff]  }
  0x9c   :  { %8264 = vmatpush1.bf16.msra.mxu0 %v10598_v1  ;;  %7527 = vmatprep.subr.bf16.mxu1 %v10603_v2  ;;  %v10676_v1 = vld [vmem:[%s16106_s1 + $0x1530] ss:$8 sps:$4 sm:$0xff]   ;;  %v10681_v2 = vld [vmem:[%s16106_s1 + $0x344] ss:$8 sps:$4 sm:$0xff]  }
  0x9d   :  { %8265 = vmatprep.subr.bf16.mxu0 %v10606_v3  ;;  %v10684_v3 = vld [vmem:[%s16106_s1 + $0x1544] ss:$8 sps:$4 sm:$0xff]  }
  0x9f   :  { %7528 = vmatpush1.bf16.msra.mxu1 %v10601_v4  ;;  %v10679_v4 = vld [vmem:[%s16106_s1 + $0x340] ss:$8 sps:$4 sm:$0xff]  }
  0xa0   :  { %8266 = vmatpush1.bf16.msra.mxu0 %v10604_v5  ;;  %7529 = vmatprep.subr.bf16.mxu1 %v10609_v6  ;;  %v10682_v5 = vld [vmem:[%s16106_s1 + $0x1540] ss:$8 sps:$4 sm:$0xff]   ;;  %v10687_v6 = vld [vmem:[%s16106_s1 + $0x354] ss:$8 sps:$4 sm:$0xff]  }
  0xa1   :  { %8267 = vmatprep.subr.bf16.mxu0 %v10612_v7  ;;  %v10690_v7 = vld [vmem:[%s16106_s1 + $0x1554] ss:$8 sps:$4 sm:$0xff]  }
  0xa3   :  { %7530 = vmatpush1.bf16.msra.mxu1 %v10607_v8  ;;  %v10685_v8 = vld [vmem:[%s16106_s1 + $0x350] ss:$8 sps:$4 sm:$0xff]  }
  0xa4   :  { %8268 = vmatpush1.bf16.msra.mxu0 %v10610_v9  ;;  %7531 = vmatprep.subr.bf16.mxu1 %v10615_v10  ;;  %v10688_v9 = vld [vmem:[%s16106_s1 + $0x1550] ss:$8 sps:$4 sm:$0xff]   ;;  %v10693_v10 = vld [vmem:[%s16106_s1 + $0x364] ss:$8 sps:$4 sm:$0xff]  }
  0xa5   :  { %8269 = vmatprep.subr.bf16.mxu0 %v10618_v11  ;;  %v10696_v11 = vld [vmem:[%s16106_s1 + $0x1564] ss:$8 sps:$4 sm:$0xff]  }
  0xa7   :  { %7532 = vmatpush1.bf16.msra.mxu1 %v10613_v12  ;;  %v10691_v12 = vld [vmem:[%s16106_s1 + $0x360] ss:$8 sps:$4 sm:$0xff]  }
  0xa8   :  { %8270 = vmatpush1.bf16.msra.mxu0 %v10616_v13  ;;  %7533 = vmatprep.subr.bf16.mxu1 %v10621_v16  ;;  %v10694_v13 = vld [vmem:[%s16106_s1 + $0x1560] ss:$8 sps:$4 sm:$0xff]   ;;  %v10699_v16 = vld [vmem:[%s16106_s1 + $0x374] ss:$8 sps:$4 sm:$0xff]  }
  0xa9   :  { %8271 = vmatprep.subr.bf16.mxu0 %v10624_v17  ;;  %v10702_v17 = vld [vmem:[%s16106_s1 + $0x1574] ss:$8 sps:$4 sm:$0xff]  }
  0xab   :  { %7534 = vmatpush1.bf16.msra.mxu1 %v10619_v18  ;;  %v10697_v18 = vld [vmem:[%s16106_s1 + $0x370] ss:$8 sps:$4 sm:$0xff]  }
  0xac   :  { %8272 = vmatpush1.bf16.msra.mxu0 %v10622_v19  ;;  %7535 = vmatprep.subr.bf16.mxu1 %v10627_v20  ;;  %v10700_v19 = vld [vmem:[%s16106_s1 + $0x1570] ss:$8 sps:$4 sm:$0xff]   ;;  %v10705_v20 = vld [vmem:[%s16106_s1 + $0x384] ss:$8 sps:$4 sm:$0xff]  }
  0xad   :  { %8273 = vmatprep.subr.bf16.mxu0 %v10630_v21  ;;  %v10708_v21 = vld [vmem:[%s16106_s1 + $0x1584] ss:$8 sps:$4 sm:$0xff]  }
  0xaf   :  { %7536 = vmatpush1.bf16.msra.mxu1 %v10625_v22  ;;  %v10703_v22 = vld [vmem:[%s16106_s1 + $0x380] ss:$8 sps:$4 sm:$0xff]  }
  0xb0   :  { %8274 = vmatpush1.bf16.msra.mxu0 %v10628_v23  ;;  %7537 = vmatprep.subr.bf16.mxu1 %v10633_v24  ;;  %v10706_v23 = vld [vmem:[%s16106_s1 + $0x1580] ss:$8 sps:$4 sm:$0xff]   ;;  %v10711_v24 = vld [vmem:[%s16106_s1 + $0x394] ss:$8 sps:$4 sm:$0xff]  }
  0xb1   :  { %8275 = vmatprep.subr.bf16.mxu0 %v10636_v25  ;;  %v10714_v25 = vld [vmem:[%s16106_s1 + $0x1594] ss:$8 sps:$4 sm:$0xff]  }
  0xb3   :  { %7538 = vmatpush1.bf16.msra.mxu1 %v10631_v26  ;;  %v10709_v26 = vld [vmem:[%s16106_s1 + $0x390] ss:$8 sps:$4 sm:$0xff]  }
  0xb4   :  { %8276 = vmatpush1.bf16.msra.mxu0 %v10634_v27  ;;  %7539 = vmatprep.subr.bf16.mxu1 %v10639_v28  ;;  %v10712_v27 = vld [vmem:[%s16106_s1 + $0x1590] ss:$8 sps:$4 sm:$0xff]   ;;  %v10717_v28 = vld [vmem:[%s16106_s1 + $0x3a4] ss:$8 sps:$4 sm:$0xff]  }
  0xb5   :  { %8277 = vmatprep.subr.bf16.mxu0 %v10642_v29  ;;  %v10720_v29 = vld [vmem:[%s16106_s1 + $0x15a4] ss:$8 sps:$4 sm:$0xff]  }
  0xb7   :  { %7540 = vmatpush1.bf16.msra.mxu1 %v10637_v30  ;;  %v10715_v30 = vld [vmem:[%s16106_s1 + $0x3a0] ss:$8 sps:$4 sm:$0xff]  }
  0xb8   :  { %8278 = vmatpush1.bf16.msra.mxu0 %v10640_v31  ;;  %7541 = vmatprep.subr.bf16.mxu1 %v10645_v32  ;;  %v10718_v31 = vld [vmem:[%s16106_s1 + $0x15a0] ss:$8 sps:$4 sm:$0xff]   ;;  %v10723_v32 = vld [vmem:[%s16106_s1 + $0x3b4] ss:$8 sps:$4 sm:$0xff]  }
  0xb9   :  { %8279 = vmatprep.subr.bf16.mxu0 %v10648_v33  ;;  %v10726_v33 = vld [vmem:[%s16106_s1 + $0x15b4] ss:$8 sps:$4 sm:$0xff]  }
  0xbb   :  { %7542 = vmatpush1.bf16.msra.mxu1 %v10643_v37  ;;  %v10729_v37 = vld [vmem:[%s16106_s1 + $0x3c4] ss:$8 sps:$4 sm:$0xff]  }
  0xbc   :  { %8280 = vmatpush1.bf16.msra.mxu0 %v10646_v38  ;;  %7543 = vmatprep.subr.bf16.mxu1 %v10651_v39  ;;  %v10732_v38 = vld [vmem:[%s16106_s1 + $0x15c4] ss:$8 sps:$4 sm:$0xff]   ;;  %v10727_v39 = vld [vmem:[%s16106_s1 + $0x3c0] ss:$8 sps:$4 sm:$0xff]  }
  0xbd   :  { %8281 = vmatprep.subr.bf16.mxu0 %v10654_v35  ;;  %v10730_v35 = vld [vmem:[%s16106_s1 + $0x15c0] ss:$8 sps:$4 sm:$0xff]  }
  0xbf   :  { %7544 = vmatpush1.bf16.msra.mxu1 %v10649_v42  ;;  %v10735_v42 = vld [vmem:[%s16106_s1 + $0x3d4] ss:$8 sps:$4 sm:$0xff]  }
  0xc0   :  { %8282 = vmatpush1.bf16.msra.mxu0 %v10652_v44  ;;  %7554 = vmatprep.subr.bf16.mxu1 %v10657_v45  ;;  %v10738_v44 = vld [vmem:[%s16106_s1 + $0x15d4] ss:$8 sps:$4 sm:$0xff]   ;;  %v10733_v45 = vld [vmem:[%s16106_s1 + $0x3d0] ss:$8 sps:$4 sm:$0xff]  }
  0xc1   :  { %8292 = vmatprep.subr.bf16.mxu0 %v10660_v46  ;;  %v10736_v46 = vld [vmem:[%s16106_s1 + $0x15d0] ss:$8 sps:$4 sm:$0xff]  }
  0xc2   :  { %7546 = vmatmul.mubr.bf16.vlgmr.msra.gmra.mrb[0].mxu1 %v439_v52  ;;  %v10739_v52 = vld [vmem:[%s16106_s1 + $0x3e0] ss:$8 sps:$4 sm:$0xff]  }
  0xc3   :  { %8284 = vmatmul.mubr.bf16.vlgmr.msra.gmra.mrb[0].mxu0 %v475_v53  ;;  %7555 = vmatpush1.bf16.msra.mxu1 %v10655_v50  ;;  %v12995_v50 = vld [vmem:[%s16105_s0 + $0x10] sm:$0xff]  ;;  %v10742_v53 = vld [vmem:[%s16106_s1 + $0x15e0] ss:$8 sps:$4 sm:$0xff]  }
  0xc4   :  { %8293 = vmatpush1.bf16.msra.mxu0 %v10658_v51  ;;  %7556 = vmatprep.subr.bf16.mxu1 %v10663_v54  ;;  %v13000_v51 = vld [vmem:[%s16105_s0 + $0x58] sm:$0xff] }
  0xc5   :  { %8294 = vmatprep.subr.bf16.mxu0 %v10666_v55  ;;  %7586 = vmatprep.mubr.bf16.mxu1 %v442_v56  ;;  %v10747_v54 = vld [vmem:[%s16106_s1 + $0x3f4] ss:$8 sps:$4 sm:$0xff]   ;;  %v13016_v56 = vrot.slane %v12995_v50, %v12304_v49 }
  0xc6   :  { %8324 = vmatprep.mubr.bf16.mxu0 %v478_v57  ;;  %v10750_v55 = vld [vmem:[%s16106_s1 + $0x15f4] ss:$8 sps:$4 sm:$0xff]   ;;  %v13020_v57 = vrot.slane %v13000_v51, %v12304_v49 }
  0xc7   :  { %7557 = vmatpush1.bf16.msra.mxu1 %v10661_v15  ;;  %v10745_v15 = vld [vmem:[%s16106_s1 + $0x3f0] ss:$8 sps:$4 sm:$0xff]  }
  0xc8   :  { %8295 = vmatpush1.bf16.msra.mxu0 %v10664_v40  ;;  %7558 = vmatprep.subr.bf16.mxu1 %v10669_v58  ;;  %v10748_v40 = vld [vmem:[%s16106_s1 + $0x15f0] ss:$8 sps:$4 sm:$0xff]   ;;  %v10754_v58 = vld [vmem:[%s16106_s1 + $0x404] ss:$8 sps:$4 sm:$0xff]  }
  0xc9   :  { %8296 = vmatprep.subr.bf16.mxu0 %v10672_v59  ;;  %v10758_v59 = vld [vmem:[%s16106_s1 + $0x1604] ss:$8 sps:$4 sm:$0xff]  }
  0xcb   :  { %7559 = vmatpush1.bf16.msra.mxu1 %v10667_v60  ;;  %v106_v60 = vcombine.high %v13016_v56, %v13016_v56 }
  0xcc   :  { %8297 = vmatpush1.bf16.msra.mxu0 %v10670_v61  ;;  %7560 = vmatprep.subr.bf16.mxu1 %v10675_v62  ;;  %v259_v61 = vcombine.high %v13020_v57, %v13020_v57  ;;  %v441_v62 = vpack.c.bf16 %v12799_v36, %v12799_v36  ;;  %v10764_v36 = vld [vmem:[%s16106_s1 + $0x1614] ss:$8 sps:$4 sm:$0xff]  }
  0xcd   :  { %8298 = vmatprep.subr.bf16.mxu0 %v10678_v63  ;;  %v477_v63 = vpack.c.bf16 %v12802_v41, %v12802_v41  ;;  %v444_v41 = vpack.c.bf16 %v106_v60, %v106_v60  ;;  %v10831_v60 = vld [vmem:[%s16106_s1 + $0x4d0] ss:$8 sps:$4 sm:$0xff]  }
  0xcf   :  { %7561 = vmatpush1.bf16.msra.mxu1 %v10673_v0  ;;  %v10752_v0 = vld [vmem:[%s16106_s1 + $0x400] ss:$8 sps:$4 sm:$0xff]  }
  0xd0   :  { %8299 = vmatpush1.bf16.msra.mxu0 %v10676_v1  ;;  %7562 = vmatprep.subr.bf16.mxu1 %v10681_v2  ;;  %v10756_v1 = vld [vmem:[%s16106_s1 + $0x1600] ss:$8 sps:$4 sm:$0xff]   ;;  %v10761_v2 = vld [vmem:[%s16106_s1 + $0x414] ss:$8 sps:$4 sm:$0xff]  }
  0xd1   :  { %8300 = vmatprep.subr.bf16.mxu0 %v10684_v3  ;;  %v480_v3 = vpack.c.bf16 %v259_v61, %v259_v61  ;;  %v10834_v61 = vld [vmem:[%s16106_s1 + $0x16d0] ss:$8 sps:$4 sm:$0xff]  }
  0xd3   :  { %7563 = vmatpush1.bf16.msra.mxu1 %v10679_v4  ;;  %v10759_v4 = vld [vmem:[%s16106_s1 + $0x410] ss:$8 sps:$4 sm:$0xff]  }
  0xd4   :  { %8301 = vmatpush1.bf16.msra.mxu0 %v10682_v5  ;;  %7564 = vmatprep.subr.bf16.mxu1 %v10687_v6  ;;  %v10762_v5 = vld [vmem:[%s16106_s1 + $0x1610] ss:$8 sps:$4 sm:$0xff]   ;;  %v10767_v6 = vld [vmem:[%s16106_s1 + $0x424] ss:$8 sps:$4 sm:$0xff]  }
  0xd5   :  { %8302 = vmatprep.subr.bf16.mxu0 %v10690_v7  ;;  %v10770_v7 = vld [vmem:[%s16106_s1 + $0x1624] ss:$8 sps:$4 sm:$0xff]  }
  0xd7   :  { %7565 = vmatpush1.bf16.msra.mxu1 %v10685_v8  ;;  %v10765_v8 = vld [vmem:[%s16106_s1 + $0x420] ss:$8 sps:$4 sm:$0xff]  }
  0xd8   :  { %8303 = vmatpush1.bf16.msra.mxu0 %v10688_v9  ;;  %7566 = vmatprep.subr.bf16.mxu1 %v10693_v10  ;;  %v10768_v9 = vld [vmem:[%s16106_s1 + $0x1620] ss:$8 sps:$4 sm:$0xff]   ;;  %v10773_v10 = vld [vmem:[%s16106_s1 + $0x434] ss:$8 sps:$4 sm:$0xff]  }
  0xd9   :  { %8304 = vmatprep.subr.bf16.mxu0 %v10696_v11  ;;  %v10776_v11 = vld [vmem:[%s16106_s1 + $0x1634] ss:$8 sps:$4 sm:$0xff]  }
  0xdb   :  { %7567 = vmatpush1.bf16.msra.mxu1 %v10691_v12  ;;  %v10771_v12 = vld [vmem:[%s16106_s1 + $0x430] ss:$8 sps:$4 sm:$0xff]  }
  0xdc   :  { %8305 = vmatpush1.bf16.msra.mxu0 %v10694_v13  ;;  %7568 = vmatprep.subr.bf16.mxu1 %v10699_v16  ;;  %v10774_v13 = vld [vmem:[%s16106_s1 + $0x1630] ss:$8 sps:$4 sm:$0xff]   ;;  %v10779_v16 = vld [vmem:[%s16106_s1 + $0x444] ss:$8 sps:$4 sm:$0xff]  }
  0xdd   :  { %8306 = vmatprep.subr.bf16.mxu0 %v10702_v17  ;;  %v10782_v17 = vld [vmem:[%s16106_s1 + $0x1644] ss:$8 sps:$4 sm:$0xff]  }
  0xdf   :  { %7569 = vmatpush1.bf16.msra.mxu1 %v10697_v18  ;;  %v10777_v18 = vld [vmem:[%s16106_s1 + $0x440] ss:$8 sps:$4 sm:$0xff]  }
  0xe0   :  { %8307 = vmatpush1.bf16.msra.mxu0 %v10700_v19  ;;  %7570 = vmatprep.subr.bf16.mxu1 %v10705_v20  ;;  %v10780_v19 = vld [vmem:[%s16106_s1 + $0x1640] ss:$8 sps:$4 sm:$0xff]   ;;  %v10785_v20 = vld [vmem:[%s16106_s1 + $0x454] ss:$8 sps:$4 sm:$0xff]  }
  0xe1   :  { %8308 = vmatprep.subr.bf16.mxu0 %v10708_v21  ;;  %v10788_v21 = vld [vmem:[%s16106_s1 + $0x1654] ss:$8 sps:$4 sm:$0xff]  }
  0xe3   :  { %7571 = vmatpush1.bf16.msra.mxu1 %v10703_v22  ;;  %v10783_v22 = vld [vmem:[%s16106_s1 + $0x450] ss:$8 sps:$4 sm:$0xff]  }
  0xe4   :  { %8309 = vmatpush1.bf16.msra.mxu0 %v10706_v23  ;;  %7572 = vmatprep.subr.bf16.mxu1 %v10711_v24  ;;  %v10786_v23 = vld [vmem:[%s16106_s1 + $0x1650] ss:$8 sps:$4 sm:$0xff]   ;;  %v10791_v24 = vld [vmem:[%s16106_s1 + $0x464] ss:$8 sps:$4 sm:$0xff]  }
  0xe5   :  { %8310 = vmatprep.subr.bf16.mxu0 %v10714_v25  ;;  %v10794_v25 = vld [vmem:[%s16106_s1 + $0x1664] ss:$8 sps:$4 sm:$0xff]  }
  0xe7   :  { %7573 = vmatpush1.bf16.msra.mxu1 %v10709_v26  ;;  %v10789_v26 = vld [vmem:[%s16106_s1 + $0x460] ss:$8 sps:$4 sm:$0xff]  }
  0xe8   :  { %8311 = vmatpush1.bf16.msra.mxu0 %v10712_v27  ;;  %7574 = vmatprep.subr.bf16.mxu1 %v10717_v28  ;;  %v10792_v27 = vld [vmem:[%s16106_s1 + $0x1660] ss:$8 sps:$4 sm:$0xff]   ;;  %v10797_v28 = vld [vmem:[%s16106_s1 + $0x474] ss:$8 sps:$4 sm:$0xff]  }
  0xe9   :  { %8312 = vmatprep.subr.bf16.mxu0 %v10720_v29  ;;  %v10800_v29 = vld [vmem:[%s16106_s1 + $0x1674] ss:$8 sps:$4 sm:$0xff]  }
  0xeb   :  { %7575 = vmatpush1.bf16.msra.mxu1 %v10715_v30  ;;  %v10795_v30 = vld [vmem:[%s16106_s1 + $0x470] ss:$8 sps:$4 sm:$0xff]  }
  0xec   :  { %8313 = vmatpush1.bf16.msra.mxu0 %v10718_v31  ;;  %7576 = vmatprep.subr.bf16.mxu1 %v10723_v32  ;;  %v10798_v31 = vld [vmem:[%s16106_s1 + $0x1670] ss:$8 sps:$4 sm:$0xff]   ;;  %v10803_v32 = vld [vmem:[%s16106_s1 + $0x484] ss:$8 sps:$4 sm:$0xff]  }
  0xed   :  { %8314 = vmatprep.subr.bf16.mxu0 %v10726_v33  ;;  %v10806_v33 = vld [vmem:[%s16106_s1 + $0x1684] ss:$8 sps:$4 sm:$0xff]  }
  0xef   :  { %7577 = vmatpush1.bf16.msra.mxu1 %v10721_v34  ;;  %v10801_v34 = vld [vmem:[%s16106_s1 + $0x480] ss:$8 sps:$4 sm:$0xff]  }
  0xf0   :  { %8315 = vmatpush1.bf16.msra.mxu0 %v10724_v14  ;;  %7578 = vmatprep.subr.bf16.mxu1 %v10729_v37  ;;  %v10804_v14 = vld [vmem:[%s16106_s1 + $0x1680] ss:$8 sps:$4 sm:$0xff]   ;;  %v10809_v37 = vld [vmem:[%s16106_s1 + $0x494] ss:$8 sps:$4 sm:$0xff]  }
  0xf1   :  { %8316 = vmatprep.subr.bf16.mxu0 %v10732_v38  ;;  %v10812_v38 = vld [vmem:[%s16106_s1 + $0x1694] ss:$8 sps:$4 sm:$0xff]  }
  0xf3   :  { %7579 = vmatpush1.bf16.msra.mxu1 %v10727_v39  ;;  %v10807_v39 = vld [vmem:[%s16106_s1 + $0x490] ss:$8 sps:$4 sm:$0xff]  }
  0xf4   :  { %8317 = vmatpush1.bf16.msra.mxu0 %v10730_v35  ;;  %7580 = vmatprep.subr.bf16.mxu1 %v10735_v42  ;;  %v10810_v35 = vld [vmem:[%s16106_s1 + $0x1690] ss:$8 sps:$4 sm:$0xff]   ;;  %v10815_v42 = vld [vmem:[%s16106_s1 + $0x4a4] ss:$8 sps:$4 sm:$0xff]  }
  0xf5   :  { %8318 = vmatprep.subr.bf16.mxu0 %v10738_v44  ;;  %v10818_v44 = vld [vmem:[%s16106_s1 + $0x16a4] ss:$8 sps:$4 sm:$0xff]  }
  0xf7   :  { %7581 = vmatpush1.bf16.msra.mxu1 %v10733_v45  ;;  %v10813_v45 = vld [vmem:[%s16106_s1 + $0x4a0] ss:$8 sps:$4 sm:$0xff]  }
  0xf8   :  { %8319 = vmatpush1.bf16.msra.mxu0 %v10736_v46  ;;  %7582 = vmatprep.subr.bf16.mxu1 %v10741_v47  ;;  %v10816_v46 = vld [vmem:[%s16106_s1 + $0x16a0] ss:$8 sps:$4 sm:$0xff]   ;;  %v10821_v47 = vld [vmem:[%s16106_s1 + $0x4b4] ss:$8 sps:$4 sm:$0xff]  }
  0xf9   :  { %8320 = vmatprep.subr.bf16.mxu0 %v10744_v48  ;;  %v10824_v48 = vld [vmem:[%s16106_s1 + $0x16b4] ss:$8 sps:$4 sm:$0xff]  }
  0xfb   :  { %7583 = vmatpush1.bf16.msra.mxu1 %v10739_v52  ;;  %v10819_v52 = vld [vmem:[%s16106_s1 + $0x4b0] ss:$8 sps:$4 sm:$0xff]  }
  0xfc   :  { %8321 = vmatpush1.bf16.msra.mxu0 %v10742_v53  ;;  %7584 = vmatprep.subr.bf16.mxu1 %v10747_v54  ;;  %v10822_v53 = vld [vmem:[%s16106_s1 + $0x16b0] ss:$8 sps:$4 sm:$0xff]   ;;  %v10827_v54 = vld [vmem:[%s16106_s1 + $0x4c4] ss:$8 sps:$4 sm:$0xff]  }
  0xfd   :  { %8322 = vmatprep.subr.bf16.mxu0 %v10750_v55  ;;  %v10830_v55 = vld [vmem:[%s16106_s1 + $0x16c4] ss:$8 sps:$4 sm:$0xff]  }
  0xff   :  { %7585 = vmatpush1.bf16.msra.mxu1 %v10745_v15  ;;  %v10825_v15 = vld [vmem:[%s16106_s1 + $0x4c0] ss:$8 sps:$4 sm:$0xff]  }
 0x100   :  { %8323 = vmatpush1.bf16.msra.mxu0 %v10748_v40  ;;  %7595 = vmatprep.subr.bf16.mxu1 %v10754_v58  ;;  %v10828_v40 = vld [vmem:[%s16106_s1 + $0x16c0] ss:$8 sps:$4 sm:$0xff]   ;;  %v10833_v58 = vld [vmem:[%s16106_s1 + $0x4d4] ss:$8 sps:$4 sm:$0xff]  }
 0x101   :  { %8333 = vmatprep.subr.bf16.mxu0 %v10758_v59  ;;  %v10836_v59 = vld [vmem:[%s16106_s1 + $0x16d4] ss:$8 sps:$4 sm:$0xff]  }
 0x102   :  { %7587 = vmatmul.mubr.bf16.vlgmr.msra.gmra.mrb[0].mxu1 %v441_v62  ;;  %v10839_v62 = vld [vmem:[%s16106_s1 + $0x4e4] ss:$8 sps:$4 sm:$0xff]  }
 0x103   :  { %8325 = vmatmul.mubr.bf16.vlgmr.msra.gmra.mrb[0].mxu0 %v477_v63  ;;  %7596 = vmatpush1.bf16.msra.mxu1 %v10752_v0  ;;  %v10842_v63 = vld [vmem:[%s16106_s1 + $0x16e4] ss:$8 sps:$4 sm:$0xff]   ;;  %v91_v0 = vcombine.high %v12995_v50, %v12995_v50  ;;  %v10848_v50 = vld [vmem:[%s16106_s1 + $0x16f4] ss:$8 sps:$4 sm:$0xff]  }
 0x104   :  { %8334 = vmatpush1.bf16.msra.mxu0 %v10756_v1  ;;  %7597 = vmatprep.subr.bf16.mxu1 %v10761_v2  ;;  %v244_v1 = vcombine.high %v13000_v51, %v13000_v51  ;;  %v10837_v2 = vld [vmem:[%s16106_s1 + $0x4e0] ss:$8 sps:$4 sm:$0xff]  }
 0x105   :  { %8335 = vmatprep.subr.bf16.mxu0 %v10764_v36  ;;  %7627 = vmatprep.mubr.bf16.mxu1 %v444_v41  ;;  %v10840_v36 = vld [vmem:[%s16106_s1 + $0x16e0] ss:$8 sps:$4 sm:$0xff]   ;;  %v10845_v41 = vld [vmem:[%s16106_s1 + $0x4f4] ss:$8 sps:$4 sm:$0xff]   ;;  %v13227_v51 = vrot.slane %v91_v0, %v12304_v49  ;;  %v10915_v0 = vld [vmem:[%s16106_s1 + $0x5b0] ss:$8 sps:$4 sm:$0xff]  }
 0x106   :  { %8365 = vmatprep.mubr.bf16.mxu0 %v480_v3  ;;  %v13230_v3 = vrot.slane %v244_v1, %v12304_v49  ;;  %v10918_v1 = vld [vmem:[%s16106_s1 + $0x17b0] ss:$8 sps:$4 sm:$0xff]  }
 0x107   :  { %7598 = vmatpush1.bf16.msra.mxu1 %v10759_v4  ;;  %v10843_v4 = vld [vmem:[%s16106_s1 + $0x4f0] ss:$8 sps:$4 sm:$0xff]  }
 0x108   :  { %8336 = vmatpush1.bf16.msra.mxu0 %v10762_v5  ;;  %7599 = vmatprep.subr.bf16.mxu1 %v10767_v6  ;;  %v10846_v5 = vld [vmem:[%s16106_s1 + $0x16f0] ss:$8 sps:$4 sm:$0xff]   ;;  %v10851_v6 = vld [vmem:[%s16106_s1 + $0x504] ss:$8 sps:$4 sm:$0xff]  }
 0x109   :  { %8337 = vmatprep.subr.bf16.mxu0 %v10770_v7  ;;  %v10854_v7 = vld [vmem:[%s16106_s1 + $0x1704] ss:$8 sps:$4 sm:$0xff]  }
 0x10b   :  { %7600 = vmatpush1.bf16.msra.mxu1 %v10765_v8  ;;  %v107_v8 = vcombine.high %v13227_v51, %v13227_v51 }
 0x10c   :  { %8338 = vmatpush1.bf16.msra.mxu0 %v10768_v9  ;;  %7601 = vmatprep.subr.bf16.mxu1 %v10773_v10  ;;  %v260_v9 = vcombine.high %v13230_v3, %v13230_v3  ;;  %v443_v10 = vpack.c.bf16 %v13016_v56, %v13016_v56  ;;  %v10860_v56 = vld [vmem:[%s16106_s1 + $0x1714] ss:$8 sps:$4 sm:$0xff]  }
 0x10d   :  { %8339 = vmatprep.subr.bf16.mxu0 %v10776_v11  ;;  %v479_v11 = vpack.c.bf16 %v13020_v57, %v13020_v57  ;;  %v446_v57 = vpack.c.bf16 %v107_v8, %v107_v8  ;;  %v10935_v8 = vld [vmem:[%s16106_s1 + $0x5e4] ss:$8 sps:$4 sm:$0xff]  }
 0x10f   :  { %7602 = vmatpush1.bf16.msra.mxu1 %v10771_v12  ;;  %v10849_v12 = vld [vmem:[%s16106_s1 + $0x500] ss:$8 sps:$4 sm:$0xff]  }
 0x110   :  { %8340 = vmatpush1.bf16.msra.mxu0 %v10774_v13  ;;  %7603 = vmatprep.subr.bf16.mxu1 %v10779_v16  ;;  %v10852_v13 = vld [vmem:[%s16106_s1 + $0x1700] ss:$8 sps:$4 sm:$0xff]   ;;  %v10857_v16 = vld [vmem:[%s16106_s1 + $0x514] ss:$8 sps:$4 sm:$0xff]  }
 0x111   :  { %8341 = vmatprep.subr.bf16.mxu0 %v10782_v17  ;;  %v482_v17 = vpack.c.bf16 %v260_v9, %v260_v9  ;;  %v10938_v9 = vld [vmem:[%s16106_s1 + $0x17e4] ss:$8 sps:$4 sm:$0xff]  }
 0x113   :  { %7604 = vmatpush1.bf16.msra.mxu1 %v10777_v18  ;;  %v10855_v18 = vld [vmem:[%s16106_s1 + $0x510] ss:$8 sps:$4 sm:$0xff]  }
 0x114   :  { %8342 = vmatpush1.bf16.msra.mxu0 %v10780_v19  ;;  %7605 = vmatprep.subr.bf16.mxu1 %v10785_v20  ;;  %v10858_v19 = vld [vmem:[%s16106_s1 + $0x1710] ss:$8 sps:$4 sm:$0xff]   ;;  %v10863_v20 = vld [vmem:[%s16106_s1 + $0x524] ss:$8 sps:$4 sm:$0xff]  }
 0x115   :  { %8343 = vmatprep.subr.bf16.mxu0 %v10788_v21  ;;  %v10866_v21 = vld [vmem:[%s16106_s1 + $0x1724] ss:$8 sps:$4 sm:$0xff]  }
 0x117   :  { %7606 = vmatpush1.bf16.msra.mxu1 %v10783_v22  ;;  %v10861_v22 = vld [vmem:[%s16106_s1 + $0x520] ss:$8 sps:$4 sm:$0xff]  }
 0x118   :  { %8344 = vmatpush1.bf16.msra.mxu0 %v10786_v23  ;;  %7607 = vmatprep.subr.bf16.mxu1 %v10791_v24  ;;  %v10864_v23 = vld [vmem:[%s16106_s1 + $0x1720] ss:$8 sps:$4 sm:$0xff]   ;;  %v10869_v24 = vld [vmem:[%s16106_s1 + $0x534] ss:$8 sps:$4 sm:$0xff]  }
 0x119   :  { %8345 = vmatprep.subr.bf16.mxu0 %v10794_v25  ;;  %v10872_v25 = vld [vmem:[%s16106_s1 + $0x1734] ss:$8 sps:$4 sm:$0xff]  }
 0x11b   :  { %7608 = vmatpush1.bf16.msra.mxu1 %v10789_v26  ;;  %v10867_v26 = vld [vmem:[%s16106_s1 + $0x530] ss:$8 sps:$4 sm:$0xff]  }
 0x11c   :  { %8346 = vmatpush1.bf16.msra.mxu0 %v10792_v27  ;;  %7609 = vmatprep.subr.bf16.mxu1 %v10797_v28  ;;  %v10870_v27 = vld [vmem:[%s16106_s1 + $0x1730] ss:$8 sps:$4 sm:$0xff]   ;;  %v10875_v28 = vld [vmem:[%s16106_s1 + $0x544] ss:$8 sps:$4 sm:$0xff]  }
 0x11d   :  { %8347 = vmatprep.subr.bf16.mxu0 %v10800_v29  ;;  %v10878_v29 = vld [vmem:[%s16106_s1 + $0x1744] ss:$8 sps:$4 sm:$0xff]  }
 0x11f   :  { %7610 = vmatpush1.bf16.msra.mxu1 %v10795_v30  ;;  %v10873_v30 = vld [vmem:[%s16106_s1 + $0x540] ss:$8 sps:$4 sm:$0xff]  }
 0x120   :  { %8348 = vmatpush1.bf16.msra.mxu0 %v10798_v31  ;;  %7611 = vmatprep.subr.bf16.mxu1 %v10803_v32  ;;  %v10876_v31 = vld [vmem:[%s16106_s1 + $0x1740] ss:$8 sps:$4 sm:$0xff]   ;;  %v10881_v32 = vld [vmem:[%s16106_s1 + $0x554] ss:$8 sps:$4 sm:$0xff]  }
 0x121   :  { %8349 = vmatprep.subr.bf16.mxu0 %v10806_v33  ;;  %v10884_v33 = vld [vmem:[%s16106_s1 + $0x1754] ss:$8 sps:$4 sm:$0xff]  }
 0x123   :  { %7612 = vmatpush1.bf16.msra.mxu1 %v10801_v34  ;;  %v10879_v34 = vld [vmem:[%s16106_s1 + $0x550] ss:$8 sps:$4 sm:$0xff]  }
 0x124   :  { %8350 = vmatpush1.bf16.msra.mxu0 %v10804_v14  ;;  %7613 = vmatprep.subr.bf16.mxu1 %v10809_v37  ;;  %v10882_v14 = vld [vmem:[%s16106_s1 + $0x1750] ss:$8 sps:$4 sm:$0xff]   ;;  %v10887_v37 = vld [vmem:[%s16106_s1 + $0x564] ss:$8 sps:$4 sm:$0xff]  }
 0x125   :  { %8351 = vmatprep.subr.bf16.mxu0 %v10812_v38  ;;  %v10890_v38 = vld [vmem:[%s16106_s1 + $0x1764] ss:$8 sps:$4 sm:$0xff]  }
 0x127   :  { %7614 = vmatpush1.bf16.msra.mxu1 %v10807_v39  ;;  %v10885_v39 = vld [vmem:[%s16106_s1 + $0x560] ss:$8 sps:$4 sm:$0xff]  }
 0x128   :  { %8352 = vmatpush1.bf16.msra.mxu0 %v10810_v35  ;;  %7615 = vmatprep.subr.bf16.mxu1 %v10815_v42  ;;  %v10888_v35 = vld [vmem:[%s16106_s1 + $0x1760] ss:$8 sps:$4 sm:$0xff]   ;;  %v10893_v42 = vld [vmem:[%s16106_s1 + $0x574] ss:$8 sps:$4 sm:$0xff]  }
 0x129   :  { %8353 = vmatprep.subr.bf16.mxu0 %v10818_v44  ;;  %v10896_v44 = vld [vmem:[%s16106_s1 + $0x1774] ss:$8 sps:$4 sm:$0xff]  }
 0x12b   :  { %7616 = vmatpush1.bf16.msra.mxu1 %v10813_v45  ;;  %v10891_v45 = vld [vmem:[%s16106_s1 + $0x570] ss:$8 sps:$4 sm:$0xff]  }
 0x12c   :  { %8354 = vmatpush1.bf16.msra.mxu0 %v10816_v46  ;;  %7617 = vmatprep.subr.bf16.mxu1 %v10821_v47  ;;  %v10894_v46 = vld [vmem:[%s16106_s1 + $0x1770] ss:$8 sps:$4 sm:$0xff]   ;;  %v10899_v47 = vld [vmem:[%s16106_s1 + $0x584] ss:$8 sps:$4 sm:$0xff]  }
 0x12d   :  { %8355 = vmatprep.subr.bf16.mxu0 %v10824_v48  ;;  %v10902_v48 = vld [vmem:[%s16106_s1 + $0x1784] ss:$8 sps:$4 sm:$0xff]  }
 0x12f   :  { %7618 = vmatpush1.bf16.msra.mxu1 %v10819_v52  ;;  %v10897_v52 = vld [vmem:[%s16106_s1 + $0x580] ss:$8 sps:$4 sm:$0xff]  }
 0x130   :  { %8356 = vmatpush1.bf16.msra.mxu0 %v10822_v53  ;;  %7619 = vmatprep.subr.bf16.mxu1 %v10827_v54  ;;  %v10900_v53 = vld [vmem:[%s16106_s1 + $0x1780] ss:$8 sps:$4 sm:$0xff]   ;;  %v10905_v54 = vld [vmem:[%s16106_s1 + $0x594] ss:$8 sps:$4 sm:$0xff]  }
 0x131   :  { %8357 = vmatprep.subr.bf16.mxu0 %v10830_v55  ;;  %v10908_v55 = vld [vmem:[%s16106_s1 + $0x1794] ss:$8 sps:$4 sm:$0xff]  }
 0x133   :  { %7620 = vmatpush1.bf16.msra.mxu1 %v10825_v15  ;;  %v10903_v15 = vld [vmem:[%s16106_s1 + $0x590] ss:$8 sps:$4 sm:$0xff]  }
 0x134   :  { %8358 = vmatpush1.bf16.msra.mxu0 %v10828_v40  ;;  %7621 = vmatprep.subr.bf16.mxu1 %v10833_v58  ;;  %v10906_v40 = vld [vmem:[%s16106_s1 + $0x1790] ss:$8 sps:$4 sm:$0xff]   ;;  %v10911_v58 = vld [vmem:[%s16106_s1 + $0x5a4] ss:$8 sps:$4 sm:$0xff]  }
 0x135   :  { %8359 = vmatprep.subr.bf16.mxu0 %v10836_v59  ;;  %v10914_v59 = vld [vmem:[%s16106_s1 + $0x17a4] ss:$8 sps:$4 sm:$0xff]  }
 0x137   :  { %7622 = vmatpush1.bf16.msra.mxu1 %v10831_v60  ;;  %v10909_v60 = vld [vmem:[%s16106_s1 + $0x5a0] ss:$8 sps:$4 sm:$0xff]  }
 0x138   :  { %8360 = vmatpush1.bf16.msra.mxu0 %v10834_v61  ;;  %7623 = vmatprep.subr.bf16.mxu1 %v10839_v62  ;;  %v10912_v61 = vld [vmem:[%s16106_s1 + $0x17a0] ss:$8 sps:$4 sm:$0xff]   ;;  %v10917_v62 = vld [vmem:[%s16106_s1 + $0x5b4] ss:$8 sps:$4 sm:$0xff]  }
 0x139   :  { %8361 = vmatprep.subr.bf16.mxu0 %v10842_v63  ;;  %v10920_v63 = vld [vmem:[%s16106_s1 + $0x17b4] ss:$8 sps:$4 sm:$0xff]  }
 0x13b   :  { %7624 = vmatpush1.bf16.msra.mxu1 %v10837_v2  ;;  %v10923_v2 = vld [vmem:[%s16106_s1 + $0x5c4] ss:$8 sps:$4 sm:$0xff]  }
 0x13c   :  { %8362 = vmatpush1.bf16.msra.mxu0 %v10840_v36  ;;  %7625 = vmatprep.subr.bf16.mxu1 %v10845_v41  ;;  %v10926_v36 = vld [vmem:[%s16106_s1 + $0x17c4] ss:$8 sps:$4 sm:$0xff]   ;;  %v10921_v41 = vld [vmem:[%s16106_s1 + $0x5c0] ss:$8 sps:$4 sm:$0xff]  }
 0x13d   :  { %8363 = vmatprep.subr.bf16.mxu0 %v10848_v50  ;;  %v10924_v50 = vld [vmem:[%s16106_s1 + $0x17c0] ss:$8 sps:$4 sm:$0xff]  }
 0x13f   :  { %7626 = vmatpush1.bf16.msra.mxu1 %v10843_v4  ;;  %v10929_v4 = vld [vmem:[%s16106_s1 + $0x5d4] ss:$8 sps:$4 sm:$0xff]  }
 0x140   :  { %8364 = vmatpush1.bf16.msra.mxu0 %v10846_v5  ;;  %7636 = vmatprep.subr.bf16.mxu1 %v10851_v6  ;;  %v10932_v5 = vld [vmem:[%s16106_s1 + $0x17d4] ss:$8 sps:$4 sm:$0xff]   ;;  %v10927_v6 = vld [vmem:[%s16106_s1 + $0x5d0] ss:$8 sps:$4 sm:$0xff]  }
 0x141   :  { %8374 = vmatprep.subr.bf16.mxu0 %v10854_v7  ;;  %v10930_v7 = vld [vmem:[%s16106_s1 + $0x17d0] ss:$8 sps:$4 sm:$0xff]  }
 0x142   :  { %7628 = vmatmul.mubr.bf16.vlgmr.msra.gmra.mrb[0].mxu1 %v443_v10  ;;  %v13423_v10 = vld [vmem:[%s16105_s0 + $0x18] sm:$0xff] }
 0x143   :  { %8366 = vmatmul.mubr.bf16.vlgmr.msra.gmra.mrb[0].mxu0 %v479_v11  ;;  %7637 = vmatpush1.bf16.msra.mxu1 %v10849_v12  ;;  %v13428_v11 = vld [vmem:[%s16105_s0 + $0x60] sm:$0xff] }
 0x144   :  { %8375 = vmatpush1.bf16.msra.mxu0 %v10852_v13  ;;  %7638 = vmatprep.subr.bf16.mxu1 %v10857_v16  ;;  %v10933_v12 = vld [vmem:[%s16106_s1 + $0x5e0] ss:$8 sps:$4 sm:$0xff]   ;;  %v10941_v16 = vld [vmem:[%s16106_s1 + $0x5f4] ss:$8 sps:$4 sm:$0xff]  }
 0x145   :  { %8376 = vmatprep.subr.bf16.mxu0 %v10860_v56  ;;  %7668 = vmatprep.mubr.bf16.mxu1 %v446_v57  ;;  %v10936_v13 = vld [vmem:[%s16106_s1 + $0x17e0] ss:$8 sps:$4 sm:$0xff]   ;;  %v10944_v56 = vld [vmem:[%s16106_s1 + $0x17f4] ss:$8 sps:$4 sm:$0xff]   ;;  %v13444_v57 = vrot.slane %v13423_v10, %v12304_v49 }
 0x146   :  { %8406 = vmatprep.mubr.bf16.mxu0 %v482_v17  ;;  %v13448_v17 = vrot.slane %v13428_v11, %v12304_v49 }
 0x147   :  { %7639 = vmatpush1.bf16.msra.mxu1 %v10855_v18  ;;  %v10939_v18 = vld [vmem:[%s16106_s1 + $0x5f0] ss:$8 sps:$4 sm:$0xff]  }
 0x148   :  { %8377 = vmatpush1.bf16.msra.mxu0 %v10858_v19  ;;  %7640 = vmatprep.subr.bf16.mxu1 %v10863_v20  ;;  %v10942_v19 = vld [vmem:[%s16106_s1 + $0x17f0] ss:$8 sps:$4 sm:$0xff]   ;;  %v10948_v20 = vld [vmem:[%s16106_s1 + $0x604] ss:$8 sps:$4 sm:$0xff]  }
 0x149   :  { %8378 = vmatprep.subr.bf16.mxu0 %v10866_v21  ;;  %v10952_v21 = vld [vmem:[%s16106_s1 + $0x1804] ss:$8 sps:$4 sm:$0xff]  }
 0x14b   :  { %7641 = vmatpush1.bf16.msra.mxu1 %v10861_v22  ;;  %v123_v22 = vcombine.high %v13444_v57, %v13444_v57 }
 0x14c   :  { %8379 = vmatpush1.bf16.msra.mxu0 %v10864_v23  ;;  %7642 = vmatprep.subr.bf16.mxu1 %v10869_v24  ;;  %v276_v23 = vcombine.high %v13448_v17, %v13448_v17  ;;  %v445_v24 = vpack.c.bf16 %v13227_v51, %v13227_v51  ;;  %v10958_v51 = vld [vmem:[%s16106_s1 + $0x1814] ss:$8 sps:$4 sm:$0xff]  }
 0x14d   :  { %8380 = vmatprep.subr.bf16.mxu0 %v10872_v25  ;;  %v481_v25 = vpack.c.bf16 %v13230_v3, %v13230_v3  ;;  %v448_v3 = vpack.c.bf16 %v123_v22, %v123_v22  ;;  %v11025_v22 = vld [vmem:[%s16106_s1 + $0x6d0] ss:$8 sps:$4 sm:$0xff]  }
 0x14f   :  { %7643 = vmatpush1.bf16.msra.mxu1 %v10867_v26  ;;  %v10946_v26 = vld [vmem:[%s16106_s1 + $0x600] ss:$8 sps:$4 sm:$0xff]  }
 0x150   :  { %8381 = vmatpush1.bf16.msra.mxu0 %v10870_v27  ;;  %7644 = vmatprep.subr.bf16.mxu1 %v10875_v28  ;;  %v10950_v27 = vld [vmem:[%s16106_s1 + $0x1800] ss:$8 sps:$4 sm:$0xff]   ;;  %v10955_v28 = vld [vmem:[%s16106_s1 + $0x614] ss:$8 sps:$4 sm:$0xff]  }
 0x151   :  { %8382 = vmatprep.subr.bf16.mxu0 %v10878_v29  ;;  %v484_v29 = vpack.c.bf16 %v276_v23, %v276_v23  ;;  %v11028_v23 = vld [vmem:[%s16106_s1 + $0x18d0] ss:$8 sps:$4 sm:$0xff]  }
 0x153   :  { %7645 = vmatpush1.bf16.msra.mxu1 %v10873_v30  ;;  %v10953_v30 = vld [vmem:[%s16106_s1 + $0x610] ss:$8 sps:$4 sm:$0xff]  }
 0x154   :  { %8383 = vmatpush1.bf16.msra.mxu0 %v10876_v31  ;;  %7646 = vmatprep.subr.bf16.mxu1 %v10881_v32  ;;  %v10956_v31 = vld [vmem:[%s16106_s1 + $0x1810] ss:$8 sps:$4 sm:$0xff]   ;;  %v10961_v32 = vld [vmem:[%s16106_s1 + $0x624] ss:$8 sps:$4 sm:$0xff]  }
 0x155   :  { %8384 = vmatprep.subr.bf16.mxu0 %v10884_v33  ;;  %v10964_v33 = vld [vmem:[%s16106_s1 + $0x1824] ss:$8 sps:$4 sm:$0xff]  }
 0x157   :  { %7647 = vmatpush1.bf16.msra.mxu1 %v10879_v34  ;;  %v10959_v34 = vld [vmem:[%s16106_s1 + $0x620] ss:$8 sps:$4 sm:$0xff]  }
 0x158   :  { %8385 = vmatpush1.bf16.msra.mxu0 %v10882_v14  ;;  %7648 = vmatprep.subr.bf16.mxu1 %v10887_v37  ;;  %v10962_v14 = vld [vmem:[%s16106_s1 + $0x1820] ss:$8 sps:$4 sm:$0xff]   ;;  %v10967_v37 = vld [vmem:[%s16106_s1 + $0x634] ss:$8 sps:$4 sm:$0xff]  }
 0x159   :  { %8386 = vmatprep.subr.bf16.mxu0 %v10890_v38  ;;  %v10970_v38 = vld [vmem:[%s16106_s1 + $0x1834] ss:$8 sps:$4 sm:$0xff]  }
 0x15b   :  { %7649 = vmatpush1.bf16.msra.mxu1 %v10885_v39  ;;  %v10965_v39 = vld [vmem:[%s16106_s1 + $0x630] ss:$8 sps:$4 sm:$0xff]  }
 0x15c   :  { %8387 = vmatpush1.bf16.msra.mxu0 %v10888_v35  ;;  %7650 = vmatprep.subr.bf16.mxu1 %v10893_v42  ;;  %v10968_v35 = vld [vmem:[%s16106_s1 + $0x1830] ss:$8 sps:$4 sm:$0xff]   ;;  %v10973_v42 = vld [vmem:[%s16106_s1 + $0x644] ss:$8 sps:$4 sm:$0xff]  }
 0x15d   :  { %8388 = vmatprep.subr.bf16.mxu0 %v10896_v44  ;;  %v10976_v44 = vld [vmem:[%s16106_s1 + $0x1844] ss:$8 sps:$4 sm:$0xff]  }
 0x15f   :  { %7651 = vmatpush1.bf16.msra.mxu1 %v10891_v45  ;;  %v10971_v45 = vld [vmem:[%s16106_s1 + $0x640] ss:$8 sps:$4 sm:$0xff]  }
 0x160   :  { %8389 = vmatpush1.bf16.msra.mxu0 %v10894_v46  ;;  %7652 = vmatprep.subr.bf16.mxu1 %v10899_v47  ;;  %v10974_v46 = vld [vmem:[%s16106_s1 + $0x1840] ss:$8 sps:$4 sm:$0xff]   ;;  %v10979_v47 = vld [vmem:[%s16106_s1 + $0x654] ss:$8 sps:$4 sm:$0xff]  }
 0x161   :  { %8390 = vmatprep.subr.bf16.mxu0 %v10902_v48  ;;  %v10982_v48 = vld [vmem:[%s16106_s1 + $0x1854] ss:$8 sps:$4 sm:$0xff]  }
 0x163   :  { %7653 = vmatpush1.bf16.msra.mxu1 %v10897_v52  ;;  %v10977_v52 = vld [vmem:[%s16106_s1 + $0x650] ss:$8 sps:$4 sm:$0xff]  }
 0x164   :  { %8391 = vmatpush1.bf16.msra.mxu0 %v10900_v53  ;;  %7654 = vmatprep.subr.bf16.mxu1 %v10905_v54  ;;  %v10980_v53 = vld [vmem:[%s16106_s1 + $0x1850] ss:$8 sps:$4 sm:$0xff]   ;;  %v10985_v54 = vld [vmem:[%s16106_s1 + $0x664] ss:$8 sps:$4 sm:$0xff]  }
 0x165   :  { %8392 = vmatprep.subr.bf16.mxu0 %v10908_v55  ;;  %v10988_v55 = vld [vmem:[%s16106_s1 + $0x1864] ss:$8 sps:$4 sm:$0xff]  }
 0x167   :  { %7655 = vmatpush1.bf16.msra.mxu1 %v10903_v15  ;;  %v10983_v15 = vld [vmem:[%s16106_s1 + $0x660] ss:$8 sps:$4 sm:$0xff]  }
 0x168   :  { %8393 = vmatpush1.bf16.msra.mxu0 %v10906_v40  ;;  %7656 = vmatprep.subr.bf16.mxu1 %v10911_v58  ;;  %v10986_v40 = vld [vmem:[%s16106_s1 + $0x1860] ss:$8 sps:$4 sm:$0xff]   ;;  %v10991_v58 = vld [vmem:[%s16106_s1 + $0x674] ss:$8 sps:$4 sm:$0xff]  }
 0x169   :  { %8394 = vmatprep.subr.bf16.mxu0 %v10914_v59  ;;  %v10994_v59 = vld [vmem:[%s16106_s1 + $0x1874] ss:$8 sps:$4 sm:$0xff]  }
 0x16b   :  { %7657 = vmatpush1.bf16.msra.mxu1 %v10909_v60  ;;  %v10989_v60 = vld [vmem:[%s16106_s1 + $0x670] ss:$8 sps:$4 sm:$0xff]  }
 0x16c   :  { %8395 = vmatpush1.bf16.msra.mxu0 %v10912_v61  ;;  %7658 = vmatprep.subr.bf16.mxu1 %v10917_v62  ;;  %v10992_v61 = vld [vmem:[%s16106_s1 + $0x1870] ss:$8 sps:$4 sm:$0xff]   ;;  %v10997_v62 = vld [vmem:[%s16106_s1 + $0x684] ss:$8 sps:$4 sm:$0xff]  }
 0x16d   :  { %8396 = vmatprep.subr.bf16.mxu0 %v10920_v63  ;;  %v11000_v63 = vld [vmem:[%s16106_s1 + $0x1884] ss:$8 sps:$4 sm:$0xff]  }
 0x16f   :  { %7659 = vmatpush1.bf16.msra.mxu1 %v10915_v0  ;;  %v10995_v0 = vld [vmem:[%s16106_s1 + $0x680] ss:$8 sps:$4 sm:$0xff]  }
 0x170   :  { %8397 = vmatpush1.bf16.msra.mxu0 %v10918_v1  ;;  %7660 = vmatprep.subr.bf16.mxu1 %v10923_v2  ;;  %v10998_v1 = vld [vmem:[%s16106_s1 + $0x1880] ss:$8 sps:$4 sm:$0xff]   ;;  %v11003_v2 = vld [vmem:[%s16106_s1 + $0x694] ss:$8 sps:$4 sm:$0xff]  }
 0x171   :  { %8398 = vmatprep.subr.bf16.mxu0 %v10926_v36  ;;  %v11006_v36 = vld [vmem:[%s16106_s1 + $0x1894] ss:$8 sps:$4 sm:$0xff]  }
 0x173   :  { %7661 = vmatpush1.bf16.msra.mxu1 %v10921_v41  ;;  %v11001_v41 = vld [vmem:[%s16106_s1 + $0x690] ss:$8 sps:$4 sm:$0xff]  }
 0x174   :  { %8399 = vmatpush1.bf16.msra.mxu0 %v10924_v50  ;;  %7662 = vmatprep.subr.bf16.mxu1 %v10929_v4  ;;  %v11004_v50 = vld [vmem:[%s16106_s1 + $0x1890] ss:$8 sps:$4 sm:$0xff]   ;;  %v11009_v4 = vld [vmem:[%s16106_s1 + $0x6a4] ss:$8 sps:$4 sm:$0xff]  }
 0x175   :  { %8400 = vmatprep.subr.bf16.mxu0 %v10932_v5  ;;  %v11012_v5 = vld [vmem:[%s16106_s1 + $0x18a4] ss:$8 sps:$4 sm:$0xff]  }
 0x177   :  { %7663 = vmatpush1.bf16.msra.mxu1 %v10927_v6  ;;  %v11007_v6 = vld [vmem:[%s16106_s1 + $0x6a0] ss:$8 sps:$4 sm:$0xff]  }
 0x178   :  { %8401 = vmatpush1.bf16.msra.mxu0 %v10930_v7  ;;  %7664 = vmatprep.subr.bf16.mxu1 %v10935_v8  ;;  %v11010_v7 = vld [vmem:[%s16106_s1 + $0x18a0] ss:$8 sps:$4 sm:$0xff]   ;;  %v11015_v8 = vld [vmem:[%s16106_s1 + $0x6b4] ss:$8 sps:$4 sm:$0xff]  }
 0x179   :  { %8402 = vmatprep.subr.bf16.mxu0 %v10938_v9  ;;  %v11018_v9 = vld [vmem:[%s16106_s1 + $0x18b4] ss:$8 sps:$4 sm:$0xff]  }
 0x17b   :  { %7665 = vmatpush1.bf16.msra.mxu1 %v10933_v12  ;;  %v11013_v12 = vld [vmem:[%s16106_s1 + $0x6b0] ss:$8 sps:$4 sm:$0xff]  }
 0x17c   :  { %8403 = vmatpush1.bf16.msra.mxu0 %v10936_v13  ;;  %7666 = vmatprep.subr.bf16.mxu1 %v10941_v16  ;;  %v11016_v13 = vld [vmem:[%s16106_s1 + $0x18b0] ss:$8 sps:$4 sm:$0xff]   ;;  %v11021_v16 = vld [vmem:[%s16106_s1 + $0x6c4] ss:$8 sps:$4 sm:$0xff]  }
 0x17d   :  { %8404 = vmatprep.subr.bf16.mxu0 %v10944_v56  ;;  %v11024_v56 = vld [vmem:[%s16106_s1 + $0x18c4] ss:$8 sps:$4 sm:$0xff]  }
 0x17f   :  { %7667 = vmatpush1.bf16.msra.mxu1 %v10939_v18  ;;  %v11019_v18 = vld [vmem:[%s16106_s1 + $0x6c0] ss:$8 sps:$4 sm:$0xff]  }
 0x180   :  { %8405 = vmatpush1.bf16.msra.mxu0 %v10942_v19  ;;  %7677 = vmatprep.subr.bf16.mxu1 %v10948_v20  ;;  %v11022_v19 = vld [vmem:[%s16106_s1 + $0x18c0] ss:$8 sps:$4 sm:$0xff]   ;;  %v11027_v20 = vld [vmem:[%s16106_s1 + $0x6d4] ss:$8 sps:$4 sm:$0xff]  }
 0x181   :  { %8415 = vmatprep.subr.bf16.mxu0 %v10952_v21  ;;  %v11030_v21 = vld [vmem:[%s16106_s1 + $0x18d4] ss:$8 sps:$4 sm:$0xff]  }
 0x182   :  { %7669 = vmatmul.mubr.bf16.vlgmr.msra.gmra.mrb[0].mxu1 %v445_v24  ;;  %v11033_v24 = vld [vmem:[%s16106_s1 + $0x6e4] ss:$8 sps:$4 sm:$0xff]  }
 0x183   :  { %8407 = vmatmul.mubr.bf16.vlgmr.msra.gmra.mrb[0].mxu0 %v481_v25  ;;  %7678 = vmatpush1.bf16.msra.mxu1 %v10946_v26  ;;  %v11036_v25 = vld [vmem:[%s16106_s1 + $0x18e4] ss:$8 sps:$4 sm:$0xff]   ;;  %v108_v26 = vcombine.high %v13423_v10, %v13423_v10  ;;  %v11042_v10 = vld [vmem:[%s16106_s1 + $0x18f4] ss:$8 sps:$4 sm:$0xff]  }
 0x184   :  { %8416 = vmatpush1.bf16.msra.mxu0 %v10950_v27  ;;  %7679 = vmatprep.subr.bf16.mxu1 %v10955_v28  ;;  %v261_v27 = vcombine.high %v13428_v11, %v13428_v11  ;;  %v11031_v28 = vld [vmem:[%s16106_s1 + $0x6e0] ss:$8 sps:$4 sm:$0xff]  }
 0x185   :  { %8417 = vmatprep.subr.bf16.mxu0 %v10958_v51  ;;  %7709 = vmatprep.mubr.bf16.mxu1 %v448_v3  ;;  %v11034_v51 = vld [vmem:[%s16106_s1 + $0x18e0] ss:$8 sps:$4 sm:$0xff]   ;;  %v11039_v3 = vld [vmem:[%s16106_s1 + $0x6f4] ss:$8 sps:$4 sm:$0xff]   ;;  %v13655_v11 = vrot.slane %v108_v26, %v12304_v49  ;;  %v11109_v26 = vld [vmem:[%s16106_s1 + $0x7b0] ss:$8 sps:$4 sm:$0xff]  }
 0x186   :  { %8447 = vmatprep.mubr.bf16.mxu0 %v484_v29  ;;  %v13658_v29 = vrot.slane %v261_v27, %v12304_v49  ;;  %v11112_v27 = vld [vmem:[%s16106_s1 + $0x19b0] ss:$8 sps:$4 sm:$0xff]  }
 0x187   :  { %7680 = vmatpush1.bf16.msra.mxu1 %v10953_v30  ;;  %v11037_v30 = vld [vmem:[%s16106_s1 + $0x6f0] ss:$8 sps:$4 sm:$0xff]  }
 0x188   :  { %8418 = vmatpush1.bf16.msra.mxu0 %v10956_v31  ;;  %7681 = vmatprep.subr.bf16.mxu1 %v10961_v32  ;;  %v11040_v31 = vld [vmem:[%s16106_s1 + $0x18f0] ss:$8 sps:$4 sm:$0xff]   ;;  %v11045_v32 = vld [vmem:[%s16106_s1 + $0x704] ss:$8 sps:$4 sm:$0xff]  }
 0x189   :  { %8419 = vmatprep.subr.bf16.mxu0 %v10964_v33  ;;  %v11048_v33 = vld [vmem:[%s16106_s1 + $0x1904] ss:$8 sps:$4 sm:$0xff]  }
 0x18b   :  { %7682 = vmatpush1.bf16.msra.mxu1 %v10959_v34  ;;  %v124_v34 = vcombine.high %v13655_v11, %v13655_v11 }
 0x18c   :  { %8420 = vmatpush1.bf16.msra.mxu0 %v10962_v14  ;;  %7683 = vmatprep.subr.bf16.mxu1 %v10967_v37  ;;  %v277_v14 = vcombine.high %v13658_v29, %v13658_v29  ;;  %v447_v37 = vpack.c.bf16 %v13444_v57, %v13444_v57  ;;  %v11054_v57 = vld [vmem:[%s16106_s1 + $0x1914] ss:$8 sps:$4 sm:$0xff]  }
 0x18d   :  { %8421 = vmatprep.subr.bf16.mxu0 %v10970_v38  ;;  %v483_v38 = vpack.c.bf16 %v13448_v17, %v13448_v17  ;;  %v450_v17 = vpack.c.bf16 %v124_v34, %v124_v34  ;;  %v11129_v34 = vld [vmem:[%s16106_s1 + $0x7e4] ss:$8 sps:$4 sm:$0xff]  }
 0x18f   :  { %7684 = vmatpush1.bf16.msra.mxu1 %v10965_v39  ;;  %v11043_v39 = vld [vmem:[%s16106_s1 + $0x700] ss:$8 sps:$4 sm:$0xff]  }
 0x190   :  { %8422 = vmatpush1.bf16.msra.mxu0 %v10968_v35  ;;  %7685 = vmatprep.subr.bf16.mxu1 %v10973_v42  ;;  %v11046_v35 = vld [vmem:[%s16106_s1 + $0x1900] ss:$8 sps:$4 sm:$0xff]   ;;  %v11051_v42 = vld [vmem:[%s16106_s1 + $0x714] ss:$8 sps:$4 sm:$0xff]  }
 0x191   :  { %8423 = vmatprep.subr.bf16.mxu0 %v10976_v44  ;;  %v486_v44 = vpack.c.bf16 %v277_v14, %v277_v14  ;;  %v11132_v14 = vld [vmem:[%s16106_s1 + $0x19e4] ss:$8 sps:$4 sm:$0xff]  }
 0x193   :  { %7686 = vmatpush1.bf16.msra.mxu1 %v10971_v45  ;;  %v11049_v45 = vld [vmem:[%s16106_s1 + $0x710] ss:$8 sps:$4 sm:$0xff]  }
 0x194   :  { %8424 = vmatpush1.bf16.msra.mxu0 %v10974_v46  ;;  %7687 = vmatprep.subr.bf16.mxu1 %v10979_v47  ;;  %v11052_v46 = vld [vmem:[%s16106_s1 + $0x1910] ss:$8 sps:$4 sm:$0xff]   ;;  %v11057_v47 = vld [vmem:[%s16106_s1 + $0x724] ss:$8 sps:$4 sm:$0xff]  }
 0x195   :  { %8425 = vmatprep.subr.bf16.mxu0 %v10982_v48  ;;  %v11060_v48 = vld [vmem:[%s16106_s1 + $0x1924] ss:$8 sps:$4 sm:$0xff]  }
 0x197   :  { %7688 = vmatpush1.bf16.msra.mxu1 %v10977_v52  ;;  %v11055_v52 = vld [vmem:[%s16106_s1 + $0x720] ss:$8 sps:$4 sm:$0xff]  }
 0x198   :  { %8426 = vmatpush1.bf16.msra.mxu0 %v10980_v53  ;;  %7689 = vmatprep.subr.bf16.mxu1 %v10985_v54  ;;  %v11058_v53 = vld [vmem:[%s16106_s1 + $0x1920] ss:$8 sps:$4 sm:$0xff]   ;;  %v11063_v54 = vld [vmem:[%s16106_s1 + $0x734] ss:$8 sps:$4 sm:$0xff]  }
 0x199   :  { %8427 = vmatprep.subr.bf16.mxu0 %v10988_v55  ;;  %v11066_v55 = vld [vmem:[%s16106_s1 + $0x1934] ss:$8 sps:$4 sm:$0xff]  }
 0x19b   :  { %7690 = vmatpush1.bf16.msra.mxu1 %v10983_v15  ;;  %v11061_v15 = vld [vmem:[%s16106_s1 + $0x730] ss:$8 sps:$4 sm:$0xff]  }
 0x19c   :  { %8428 = vmatpush1.bf16.msra.mxu0 %v10986_v40  ;;  %7691 = vmatprep.subr.bf16.mxu1 %v10991_v58  ;;  %v11064_v40 = vld [vmem:[%s16106_s1 + $0x1930] ss:$8 sps:$4 sm:$0xff]   ;;  %v11069_v58 = vld [vmem:[%s16106_s1 + $0x744] ss:$8 sps:$4 sm:$0xff]  }
 0x19d   :  { %8429 = vmatprep.subr.bf16.mxu0 %v10994_v59  ;;  %v11072_v59 = vld [vmem:[%s16106_s1 + $0x1944] ss:$8 sps:$4 sm:$0xff]  }
 0x19f   :  { %7692 = vmatpush1.bf16.msra.mxu1 %v10989_v60  ;;  %v11067_v60 = vld [vmem:[%s16106_s1 + $0x740] ss:$8 sps:$4 sm:$0xff]  }
 0x1a0   :  { %8430 = vmatpush1.bf16.msra.mxu0 %v10992_v61  ;;  %7693 = vmatprep.subr.bf16.mxu1 %v10997_v62  ;;  %v11070_v61 = vld [vmem:[%s16106_s1 + $0x1940] ss:$8 sps:$4 sm:$0xff]   ;;  %v11075_v62 = vld [vmem:[%s16106_s1 + $0x754] ss:$8 sps:$4 sm:$0xff]  }
 0x1a1   :  { %8431 = vmatprep.subr.bf16.mxu0 %v11000_v63  ;;  %v11078_v63 = vld [vmem:[%s16106_s1 + $0x1954] ss:$8 sps:$4 sm:$0xff]  }
 0x1a3   :  { %7694 = vmatpush1.bf16.msra.mxu1 %v10995_v0  ;;  %v11073_v0 = vld [vmem:[%s16106_s1 + $0x750] ss:$8 sps:$4 sm:$0xff]  }
 0x1a4   :  { %8432 = vmatpush1.bf16.msra.mxu0 %v10998_v1  ;;  %7695 = vmatprep.subr.bf16.mxu1 %v11003_v2  ;;  %v11076_v1 = vld [vmem:[%s16106_s1 + $0x1950] ss:$8 sps:$4 sm:$0xff]   ;;  %v11081_v2 = vld [vmem:[%s16106_s1 + $0x764] ss:$8 sps:$4 sm:$0xff]  }
 0x1a5   :  { %8433 = vmatprep.subr.bf16.mxu0 %v11006_v36  ;;  %v11084_v36 = vld [vmem:[%s16106_s1 + $0x1964] ss:$8 sps:$4 sm:$0xff]  }
 0x1a7   :  { %7696 = vmatpush1.bf16.msra.mxu1 %v11001_v41  ;;  %v11079_v41 = vld [vmem:[%s16106_s1 + $0x760] ss:$8 sps:$4 sm:$0xff]  }
 0x1a8   :  { %8434 = vmatpush1.bf16.msra.mxu0 %v11004_v50  ;;  %7697 = vmatprep.subr.bf16.mxu1 %v11009_v4  ;;  %v11082_v50 = vld [vmem:[%s16106_s1 + $0x1960] ss:$8 sps:$4 sm:$0xff]   ;;  %v11087_v4 = vld [vmem:[%s16106_s1 + $0x774] ss:$8 sps:$4 sm:$0xff]  }
 0x1a9   :  { %8435 = vmatprep.subr.bf16.mxu0 %v11012_v5  ;;  %v11090_v5 = vld [vmem:[%s16106_s1 + $0x1974] ss:$8 sps:$4 sm:$0xff]  }
 0x1ab   :  { %7698 = vmatpush1.bf16.msra.mxu1 %v11007_v6  ;;  %v11085_v6 = vld [vmem:[%s16106_s1 + $0x770] ss:$8 sps:$4 sm:$0xff]  }
 0x1ac   :  { %8436 = vmatpush1.bf16.msra.mxu0 %v11010_v7  ;;  %7699 = vmatprep.subr.bf16.mxu1 %v11015_v8  ;;  %v11088_v7 = vld [vmem:[%s16106_s1 + $0x1970] ss:$8 sps:$4 sm:$0xff]   ;;  %v11093_v8 = vld [vmem:[%s16106_s1 + $0x784] ss:$8 sps:$4 sm:$0xff]  }
 0x1ad   :  { %8437 = vmatprep.subr.bf16.mxu0 %v11018_v9  ;;  %v11096_v9 = vld [vmem:[%s16106_s1 + $0x1984] ss:$8 sps:$4 sm:$0xff]  }
 0x1af   :  { %7700 = vmatpush1.bf16.msra.mxu1 %v11013_v12  ;;  %v11091_v12 = vld [vmem:[%s16106_s1 + $0x780] ss:$8 sps:$4 sm:$0xff]  }
 0x1b0   :  { %8438 = vmatpush1.bf16.msra.mxu0 %v11016_v13  ;;  %7701 = vmatprep.subr.bf16.mxu1 %v11021_v16  ;;  %v11094_v13 = vld [vmem:[%s16106_s1 + $0x1980] ss:$8 sps:$4 sm:$0xff]   ;;  %v11099_v16 = vld [vmem:[%s16106_s1 + $0x794] ss:$8 sps:$4 sm:$0xff]  }
 0x1b1   :  { %8439 = vmatprep.subr.bf16.mxu0 %v11024_v56  ;;  %v11102_v56 = vld [vmem:[%s16106_s1 + $0x1994] ss:$8 sps:$4 sm:$0xff]  }
 0x1b3   :  { %7702 = vmatpush1.bf16.msra.mxu1 %v11019_v18  ;;  %v11097_v18 = vld [vmem:[%s16106_s1 + $0x790] ss:$8 sps:$4 sm:$0xff]  }
 0x1b4   :  { %8440 = vmatpush1.bf16.msra.mxu0 %v11022_v19  ;;  %7703 = vmatprep.subr.bf16.mxu1 %v11027_v20  ;;  %v11100_v19 = vld [vmem:[%s16106_s1 + $0x1990] ss:$8 sps:$4 sm:$0xff]   ;;  %v11105_v20 = vld [vmem:[%s16106_s1 + $0x7a4] ss:$8 sps:$4 sm:$0xff]  }
 0x1b5   :  { %8441 = vmatprep.subr.bf16.mxu0 %v11030_v21  ;;  %v11108_v21 = vld [vmem:[%s16106_s1 + $0x19a4] ss:$8 sps:$4 sm:$0xff]  }
 0x1b7   :  { %7704 = vmatpush1.bf16.msra.mxu1 %v11025_v22  ;;  %v11103_v22 = vld [vmem:[%s16106_s1 + $0x7a0] ss:$8 sps:$4 sm:$0xff]  }
 0x1b8   :  { %8442 = vmatpush1.bf16.msra.mxu0 %v11028_v23  ;;  %7705 = vmatprep.subr.bf16.mxu1 %v11033_v24  ;;  %v11106_v23 = vld [vmem:[%s16106_s1 + $0x19a0] ss:$8 sps:$4 sm:$0xff]   ;;  %v11111_v24 = vld [vmem:[%s16106_s1 + $0x7b4] ss:$8 sps:$4 sm:$0xff]  }
 0x1b9   :  { %8443 = vmatprep.subr.bf16.mxu0 %v11036_v25  ;;  %v11114_v25 = vld [vmem:[%s16106_s1 + $0x19b4] ss:$8 sps:$4 sm:$0xff]  }
 0x1bb   :  { %7706 = vmatpush1.bf16.msra.mxu1 %v11031_v28  ;;  %v11117_v28 = vld [vmem:[%s16106_s1 + $0x7c4] ss:$8 sps:$4 sm:$0xff]  }
 0x1bc   :  { %8444 = vmatpush1.bf16.msra.mxu0 %v11034_v51  ;;  %7707 = vmatprep.subr.bf16.mxu1 %v11039_v3  ;;  %v11120_v51 = vld [vmem:[%s16106_s1 + $0x19c4] ss:$8 sps:$4 sm:$0xff]   ;;  %v11115_v3 = vld [vmem:[%s16106_s1 + $0x7c0] ss:$8 sps:$4 sm:$0xff]  }
 0x1bd   :  { %8445 = vmatprep.subr.bf16.mxu0 %v11042_v10  ;;  %v11118_v10 = vld [vmem:[%s16106_s1 + $0x19c0] ss:$8 sps:$4 sm:$0xff]  }
 0x1bf   :  { %7708 = vmatpush1.bf16.msra.mxu1 %v11037_v30  ;;  %v11123_v30 = vld [vmem:[%s16106_s1 + $0x7d4] ss:$8 sps:$4 sm:$0xff]  }
 0x1c0   :  { %8446 = vmatpush1.bf16.msra.mxu0 %v11040_v31  ;;  %7718 = vmatprep.subr.bf16.mxu1 %v11045_v32  ;;  %v11126_v31 = vld [vmem:[%s16106_s1 + $0x19d4] ss:$8 sps:$4 sm:$0xff]   ;;  %v11121_v32 = vld [vmem:[%s16106_s1 + $0x7d0] ss:$8 sps:$4 sm:$0xff]  }
 0x1c1   :  { %8456 = vmatprep.subr.bf16.mxu0 %v11048_v33  ;;  %v11124_v33 = vld [vmem:[%s16106_s1 + $0x19d0] ss:$8 sps:$4 sm:$0xff]  }
 0x1c2   :  { %7710 = vmatmul.mubr.bf16.vlgmr.msra.gmra.mrb[0].mxu1 %v447_v37  ;;  %v13851_v37 = vld [vmem:[%s16105_s0 + $0x20] sm:$0xff] }
 0x1c3   :  { %8448 = vmatmul.mubr.bf16.vlgmr.msra.gmra.mrb[0].mxu0 %v483_v38  ;;  %7719 = vmatpush1.bf16.msra.mxu1 %v11043_v39  ;;  %v13856_v38 = vld [vmem:[%s16105_s0 + $0x68] sm:$0xff] }
 0x1c4   :  { %8457 = vmatpush1.bf16.msra.mxu0 %v11046_v35  ;;  %7720 = vmatprep.subr.bf16.mxu1 %v11051_v42  ;;  %v11127_v39 = vld [vmem:[%s16106_s1 + $0x7e0] ss:$8 sps:$4 sm:$0xff]   ;;  %v11135_v42 = vld [vmem:[%s16106_s1 + $0x7f4] ss:$8 sps:$4 sm:$0xff]  }
 0x1c5   :  { %8458 = vmatprep.subr.bf16.mxu0 %v11054_v57  ;;  %7750 = vmatprep.mubr.bf16.mxu1 %v450_v17  ;;  %v11130_v35 = vld [vmem:[%s16106_s1 + $0x19e0] ss:$8 sps:$4 sm:$0xff]   ;;  %v11138_v57 = vld [vmem:[%s16106_s1 + $0x19f4] ss:$8 sps:$4 sm:$0xff]   ;;  %v13872_v17 = vrot.slane %v13851_v37, %v12304_v49 }
 0x1c6   :  { %8488 = vmatprep.mubr.bf16.mxu0 %v486_v44  ;;  %v13876_v44 = vrot.slane %v13856_v38, %v12304_v49 }
 0x1c7   :  { %7721 = vmatpush1.bf16.msra.mxu1 %v11049_v45  ;;  %v11133_v45 = vld [vmem:[%s16106_s1 + $0x7f0] ss:$8 sps:$4 sm:$0xff]  }
 0x1c8   :  { %8459 = vmatpush1.bf16.msra.mxu0 %v11052_v46  ;;  %7722 = vmatprep.subr.bf16.mxu1 %v11057_v47  ;;  %v11136_v46 = vld [vmem:[%s16106_s1 + $0x19f0] ss:$8 sps:$4 sm:$0xff]   ;;  %v11142_v47 = vld [vmem:[%s16106_s1 + $0x804] ss:$8 sps:$4 sm:$0xff]  }
 0x1c9   :  { %8460 = vmatprep.subr.bf16.mxu0 %v11060_v48  ;;  %v11146_v48 = vld [vmem:[%s16106_s1 + $0x1a04] ss:$8 sps:$4 sm:$0xff]  }
 0x1cb   :  { %7723 = vmatpush1.bf16.msra.mxu1 %v11055_v52  ;;  %v140_v52 = vcombine.high %v13872_v17, %v13872_v17 }
 0x1cc   :  { %8461 = vmatpush1.bf16.msra.mxu0 %v11058_v53  ;;  %7724 = vmatprep.subr.bf16.mxu1 %v11063_v54  ;;  %v293_v53 = vcombine.high %v13876_v44, %v13876_v44  ;;  %v449_v54 = vpack.c.bf16 %v13655_v11, %v13655_v11  ;;  %v11152_v11 = vld [vmem:[%s16106_s1 + $0x1a14] ss:$8 sps:$4 sm:$0xff]  }
 0x1cd   :  { %8462 = vmatprep.subr.bf16.mxu0 %v11066_v55  ;;  %v485_v55 = vpack.c.bf16 %v13658_v29, %v13658_v29  ;;  %v452_v29 = vpack.c.bf16 %v140_v52, %v140_v52  ;;  %v11219_v52 = vld [vmem:[%s16106_s1 + $0x8d0] ss:$8 sps:$4 sm:$0xff]  }
 0x1cf   :  { %7725 = vmatpush1.bf16.msra.mxu1 %v11061_v15  ;;  %v11140_v15 = vld [vmem:[%s16106_s1 + $0x800] ss:$8 sps:$4 sm:$0xff]  }
 0x1d0   :  { %8463 = vmatpush1.bf16.msra.mxu0 %v11064_v40  ;;  %7726 = vmatprep.subr.bf16.mxu1 %v11069_v58  ;;  %v11144_v40 = vld [vmem:[%s16106_s1 + $0x1a00] ss:$8 sps:$4 sm:$0xff]   ;;  %v11149_v58 = vld [vmem:[%s16106_s1 + $0x814] ss:$8 sps:$4 sm:$0xff]  }
 0x1d1   :  { %8464 = vmatprep.subr.bf16.mxu0 %v11072_v59  ;;  %v488_v59 = vpack.c.bf16 %v293_v53, %v293_v53  ;;  %v11222_v53 = vld [vmem:[%s16106_s1 + $0x1ad0] ss:$8 sps:$4 sm:$0xff]  }
 0x1d3   :  { %7727 = vmatpush1.bf16.msra.mxu1 %v11067_v60  ;;  %v11147_v60 = vld [vmem:[%s16106_s1 + $0x810] ss:$8 sps:$4 sm:$0xff]  }
 0x1d4   :  { %8465 = vmatpush1.bf16.msra.mxu0 %v11070_v61  ;;  %7728 = vmatprep.subr.bf16.mxu1 %v11075_v62  ;;  %v11150_v61 = vld [vmem:[%s16106_s1 + $0x1a10] ss:$8 sps:$4 sm:$0xff]   ;;  %v11155_v62 = vld [vmem:[%s16106_s1 + $0x824] ss:$8 sps:$4 sm:$0xff]  }
 0x1d5   :  { %8466 = vmatprep.subr.bf16.mxu0 %v11078_v63  ;;  %v11158_v63 = vld [vmem:[%s16106_s1 + $0x1a24] ss:$8 sps:$4 sm:$0xff]  }
 0x1d7   :  { %7729 = vmatpush1.bf16.msra.mxu1 %v11073_v0  ;;  %v11153_v0 = vld [vmem:[%s16106_s1 + $0x820] ss:$8 sps:$4 sm:$0xff]  }
 0x1d8   :  { %8467 = vmatpush1.bf16.msra.mxu0 %v11076_v1  ;;  %7730 = vmatprep.subr.bf16.mxu1 %v11081_v2  ;;  %v11156_v1 = vld [vmem:[%s16106_s1 + $0x1a20] ss:$8 sps:$4 sm:$0xff]   ;;  %v11161_v2 = vld [vmem:[%s16106_s1 + $0x834] ss:$8 sps:$4 sm:$0xff]  }
 0x1d9   :  { %8468 = vmatprep.subr.bf16.mxu0 %v11084_v36  ;;  %v11164_v36 = vld [vmem:[%s16106_s1 + $0x1a34] ss:$8 sps:$4 sm:$0xff]  }
 0x1db   :  { %7731 = vmatpush1.bf16.msra.mxu1 %v11079_v41  ;;  %v11159_v41 = vld [vmem:[%s16106_s1 + $0x830] ss:$8 sps:$4 sm:$0xff]  }
 0x1dc   :  { %8469 = vmatpush1.bf16.msra.mxu0 %v11082_v50  ;;  %7732 = vmatprep.subr.bf16.mxu1 %v11087_v4  ;;  %v11162_v50 = vld [vmem:[%s16106_s1 + $0x1a30] ss:$8 sps:$4 sm:$0xff]   ;;  %v11167_v4 = vld [vmem:[%s16106_s1 + $0x844] ss:$8 sps:$4 sm:$0xff]  }
 0x1dd   :  { %8470 = vmatprep.subr.bf16.mxu0 %v11090_v5  ;;  %v11170_v5 = vld [vmem:[%s16106_s1 + $0x1a44] ss:$8 sps:$4 sm:$0xff]  }
 0x1df   :  { %7733 = vmatpush1.bf16.msra.mxu1 %v11085_v6  ;;  %v11165_v6 = vld [vmem:[%s16106_s1 + $0x840] ss:$8 sps:$4 sm:$0xff]  }
 0x1e0   :  { %8471 = vmatpush1.bf16.msra.mxu0 %v11088_v7  ;;  %7734 = vmatprep.subr.bf16.mxu1 %v11093_v8  ;;  %v11168_v7 = vld [vmem:[%s16106_s1 + $0x1a40] ss:$8 sps:$4 sm:$0xff]   ;;  %v11173_v8 = vld [vmem:[%s16106_s1 + $0x854] ss:$8 sps:$4 sm:$0xff]  }
 0x1e1   :  { %8472 = vmatprep.subr.bf16.mxu0 %v11096_v9  ;;  %v11176_v9 = vld [vmem:[%s16106_s1 + $0x1a54] ss:$8 sps:$4 sm:$0xff]  }
 0x1e3   :  { %7735 = vmatpush1.bf16.msra.mxu1 %v11091_v12  ;;  %v11171_v12 = vld [vmem:[%s16106_s1 + $0x850] ss:$8 sps:$4 sm:$0xff]  }
 0x1e4   :  { %8473 = vmatpush1.bf16.msra.mxu0 %v11094_v13  ;;  %7736 = vmatprep.subr.bf16.mxu1 %v11099_v16  ;;  %v11174_v13 = vld [vmem:[%s16106_s1 + $0x1a50] ss:$8 sps:$4 sm:$0xff]   ;;  %v11179_v16 = vld [vmem:[%s16106_s1 + $0x864] ss:$8 sps:$4 sm:$0xff]  }
 0x1e5   :  { %8474 = vmatprep.subr.bf16.mxu0 %v11102_v56  ;;  %v11182_v56 = vld [vmem:[%s16106_s1 + $0x1a64] ss:$8 sps:$4 sm:$0xff]  }
 0x1e7   :  { %7737 = vmatpush1.bf16.msra.mxu1 %v11097_v18  ;;  %v11177_v18 = vld [vmem:[%s16106_s1 + $0x860] ss:$8 sps:$4 sm:$0xff]  }
 0x1e8   :  { %8475 = vmatpush1.bf16.msra.mxu0 %v11100_v19  ;;  %7738 = vmatprep.subr.bf16.mxu1 %v11105_v20  ;;  %v11180_v19 = vld [vmem:[%s16106_s1 + $0x1a60] ss:$8 sps:$4 sm:$0xff]   ;;  %v11185_v20 = vld [vmem:[%s16106_s1 + $0x874] ss:$8 sps:$4 sm:$0xff]  }
 0x1e9   :  { %8476 = vmatprep.subr.bf16.mxu0 %v11108_v21  ;;  %v11188_v21 = vld [vmem:[%s16106_s1 + $0x1a74] ss:$8 sps:$4 sm:$0xff]  }
 0x1eb   :  { %7739 = vmatpush1.bf16.msra.mxu1 %v11103_v22  ;;  %v11183_v22 = vld [vmem:[%s16106_s1 + $0x870] ss:$8 sps:$4 sm:$0xff]  }
 0x1ec   :  { %8477 = vmatpush1.bf16.msra.mxu0 %v11106_v23  ;;  %7740 = vmatprep.subr.bf16.mxu1 %v11111_v24  ;;  %v11186_v23 = vld [vmem:[%s16106_s1 + $0x1a70] ss:$8 sps:$4 sm:$0xff]   ;;  %v11191_v24 = vld [vmem:[%s16106_s1 + $0x884] ss:$8 sps:$4 sm:$0xff]  }
 0x1ed   :  { %8478 = vmatprep.subr.bf16.mxu0 %v11114_v25  ;;  %v11194_v25 = vld [vmem:[%s16106_s1 + $0x1a84] ss:$8 sps:$4 sm:$0xff]  }
 0x1ef   :  { %7741 = vmatpush1.bf16.msra.mxu1 %v11109_v26  ;;  %v11189_v26 = vld [vmem:[%s16106_s1 + $0x880] ss:$8 sps:$4 sm:$0xff]  }
 0x1f0   :  { %8479 = vmatpush1.bf16.msra.mxu0 %v11112_v27  ;;  %7742 = vmatprep.subr.bf16.mxu1 %v11117_v28  ;;  %v11192_v27 = vld [vmem:[%s16106_s1 + $0x1a80] ss:$8 sps:$4 sm:$0xff]   ;;  %v11197_v28 = vld [vmem:[%s16106_s1 + $0x894] ss:$8 sps:$4 sm:$0xff]  }
 0x1f1   :  { %8480 = vmatprep.subr.bf16.mxu0 %v11120_v51  ;;  %v11200_v51 = vld [vmem:[%s16106_s1 + $0x1a94] ss:$8 sps:$4 sm:$0xff]  }
 0x1f3   :  { %7743 = vmatpush1.bf16.msra.mxu1 %v11115_v3  ;;  %v11195_v3 = vld [vmem:[%s16106_s1 + $0x890] ss:$8 sps:$4 sm:$0xff]  }
 0x1f4   :  { %8481 = vmatpush1.bf16.msra.mxu0 %v11118_v10  ;;  %7744 = vmatprep.subr.bf16.mxu1 %v11123_v30  ;;  %v11198_v10 = vld [vmem:[%s16106_s1 + $0x1a90] ss:$8 sps:$4 sm:$0xff]   ;;  %v11203_v30 = vld [vmem:[%s16106_s1 + $0x8a4] ss:$8 sps:$4 sm:$0xff]  }
 0x1f5   :  { %8482 = vmatprep.subr.bf16.mxu0 %v11126_v31  ;;  %v11206_v31 = vld [vmem:[%s16106_s1 + $0x1aa4] ss:$8 sps:$4 sm:$0xff]  }
 0x1f7   :  { %7745 = vmatpush1.bf16.msra.mxu1 %v11121_v32  ;;  %v11201_v32 = vld [vmem:[%s16106_s1 + $0x8a0] ss:$8 sps:$4 sm:$0xff]  }
 0x1f8   :  { %8483 = vmatpush1.bf16.msra.mxu0 %v11124_v33  ;;  %7746 = vmatprep.subr.bf16.mxu1 %v11129_v34  ;;  %v11204_v33 = vld [vmem:[%s16106_s1 + $0x1aa0] ss:$8 sps:$4 sm:$0xff]   ;;  %v11209_v34 = vld [vmem:[%s16106_s1 + $0x8b4] ss:$8 sps:$4 sm:$0xff]  }
 0x1f9   :  { %8484 = vmatprep.subr.bf16.mxu0 %v11132_v14  ;;  %v11212_v14 = vld [vmem:[%s16106_s1 + $0x1ab4] ss:$8 sps:$4 sm:$0xff]  }
 0x1fb   :  { %7747 = vmatpush1.bf16.msra.mxu1 %v11127_v39  ;;  %v11207_v39 = vld [vmem:[%s16106_s1 + $0x8b0] ss:$8 sps:$4 sm:$0xff]  }
 0x1fc   :  { %8485 = vmatpush1.bf16.msra.mxu0 %v11130_v35  ;;  %7748 = vmatprep.subr.bf16.mxu1 %v11135_v42  ;;  %v11210_v35 = vld [vmem:[%s16106_s1 + $0x1ab0] ss:$8 sps:$4 sm:$0xff]   ;;  %v11215_v42 = vld [vmem:[%s16106_s1 + $0x8c4] ss:$8 sps:$4 sm:$0xff]  }
 0x1fd   :  { %8486 = vmatprep.subr.bf16.mxu0 %v11138_v57  ;;  %v11218_v57 = vld [vmem:[%s16106_s1 + $0x1ac4] ss:$8 sps:$4 sm:$0xff]  }
 0x1ff   :  { %7749 = vmatpush1.bf16.msra.mxu1 %v11133_v45  ;;  %v11213_v45 = vld [vmem:[%s16106_s1 + $0x8c0] ss:$8 sps:$4 sm:$0xff]  }
 0x200   :  { %8487 = vmatpush1.bf16.msra.mxu0 %v11136_v46  ;;  %7759 = vmatprep.subr.bf16.mxu1 %v11142_v47  ;;  %v11216_v46 = vld [vmem:[%s16106_s1 + $0x1ac0] ss:$8 sps:$4 sm:$0xff]   ;;  %v11221_v47 = vld [vmem:[%s16106_s1 + $0x8d4] ss:$8 sps:$4 sm:$0xff]  }
 0x201   :  { %8497 = vmatprep.subr.bf16.mxu0 %v11146_v48  ;;  %v11224_v48 = vld [vmem:[%s16106_s1 + $0x1ad4] ss:$8 sps:$4 sm:$0xff]  }
 0x202   :  { %7751 = vmatmul.mubr.bf16.vlgmr.msra.gmra.mrb[0].mxu1 %v449_v54  ;;  %v11227_v54 = vld [vmem:[%s16106_s1 + $0x8e4] ss:$8 sps:$4 sm:$0xff]  }
 0x203   :  { %8489 = vmatmul.mubr.bf16.vlgmr.msra.gmra.mrb[0].mxu0 %v485_v55  ;;  %7760 = vmatpush1.bf16.msra.mxu1 %v11140_v15  ;;  %v11230_v55 = vld [vmem:[%s16106_s1 + $0x1ae4] ss:$8 sps:$4 sm:$0xff]   ;;  %v125_v15 = vcombine.high %v13851_v37, %v13851_v37  ;;  %v11236_v37 = vld [vmem:[%s16106_s1 + $0x1af4] ss:$8 sps:$4 sm:$0xff]  }
 0x204   :  { %8498 = vmatpush1.bf16.msra.mxu0 %v11144_v40  ;;  %7761 = vmatprep.subr.bf16.mxu1 %v11149_v58  ;;  %v278_v40 = vcombine.high %v13856_v38, %v13856_v38  ;;  %v11225_v58 = vld [vmem:[%s16106_s1 + $0x8e0] ss:$8 sps:$4 sm:$0xff]  }
 0x205   :  { %8499 = vmatprep.subr.bf16.mxu0 %v11152_v11  ;;  %7791 = vmatprep.mubr.bf16.mxu1 %v452_v29  ;;  %v11228_v11 = vld [vmem:[%s16106_s1 + $0x1ae0] ss:$8 sps:$4 sm:$0xff]   ;;  %v11233_v29 = vld [vmem:[%s16106_s1 + $0x8f4] ss:$8 sps:$4 sm:$0xff]   ;;  %v14083_v38 = vrot.slane %v125_v15, %v12304_v49  ;;  %v11303_v15 = vld [vmem:[%s16106_s1 + $0x9b0] ss:$8 sps:$4 sm:$0xff]  }
 0x206   :  { %8529 = vmatprep.mubr.bf16.mxu0 %v488_v59  ;;  %v14086_v59 = vrot.slane %v278_v40, %v12304_v49  ;;  %v11306_v40 = vld [vmem:[%s16106_s1 + $0x1bb0] ss:$8 sps:$4 sm:$0xff]  }
 0x207   :  { %7762 = vmatpush1.bf16.msra.mxu1 %v11147_v60  ;;  %v11231_v60 = vld [vmem:[%s16106_s1 + $0x8f0] ss:$8 sps:$4 sm:$0xff]  }
 0x208   :  { %8500 = vmatpush1.bf16.msra.mxu0 %v11150_v61  ;;  %7763 = vmatprep.subr.bf16.mxu1 %v11155_v62  ;;  %v11234_v61 = vld [vmem:[%s16106_s1 + $0x1af0] ss:$8 sps:$4 sm:$0xff]   ;;  %v11239_v62 = vld [vmem:[%s16106_s1 + $0x904] ss:$8 sps:$4 sm:$0xff]  }
 0x209   :  { %8501 = vmatprep.subr.bf16.mxu0 %v11158_v63  ;;  %v11242_v63 = vld [vmem:[%s16106_s1 + $0x1b04] ss:$8 sps:$4 sm:$0xff]  }
 0x20b   :  { %7764 = vmatpush1.bf16.msra.mxu1 %v11153_v0  ;;  %v141_v0 = vcombine.high %v14083_v38, %v14083_v38 }
 0x20c   :  { %8502 = vmatpush1.bf16.msra.mxu0 %v11156_v1  ;;  %7765 = vmatprep.subr.bf16.mxu1 %v11161_v2  ;;  %v294_v1 = vcombine.high %v14086_v59, %v14086_v59  ;;  %v451_v2 = vpack.c.bf16 %v13872_v17, %v13872_v17  ;;  %v11248_v17 = vld [vmem:[%s16106_s1 + $0x1b14] ss:$8 sps:$4 sm:$0xff]  }
 0x20d   :  { %8503 = vmatprep.subr.bf16.mxu0 %v11164_v36  ;;  %v487_v36 = vpack.c.bf16 %v13876_v44, %v13876_v44  ;;  %v454_v44 = vpack.c.bf16 %v141_v0, %v141_v0  ;;  %v11323_v0 = vld [vmem:[%s16106_s1 + $0x9e4] ss:$8 sps:$4 sm:$0xff]  }
 0x20f   :  { %7766 = vmatpush1.bf16.msra.mxu1 %v11159_v41  ;;  %v11237_v41 = vld [vmem:[%s16106_s1 + $0x900] ss:$8 sps:$4 sm:$0xff]  }
 0x210   :  { %8504 = vmatpush1.bf16.msra.mxu0 %v11162_v50  ;;  %7767 = vmatprep.subr.bf16.mxu1 %v11167_v4  ;;  %v11240_v50 = vld [vmem:[%s16106_s1 + $0x1b00] ss:$8 sps:$4 sm:$0xff]   ;;  %v11245_v4 = vld [vmem:[%s16106_s1 + $0x914] ss:$8 sps:$4 sm:$0xff]  }
 0x211   :  { %8505 = vmatprep.subr.bf16.mxu0 %v11170_v5  ;;  %v490_v5 = vpack.c.bf16 %v294_v1, %v294_v1  ;;  %v11326_v1 = vld [vmem:[%s16106_s1 + $0x1be4] ss:$8 sps:$4 sm:$0xff]  }
 0x213   :  { %7768 = vmatpush1.bf16.msra.mxu1 %v11165_v6  ;;  %v11243_v6 = vld [vmem:[%s16106_s1 + $0x910] ss:$8 sps:$4 sm:$0xff]  }
 0x214   :  { %8506 = vmatpush1.bf16.msra.mxu0 %v11168_v7  ;;  %7769 = vmatprep.subr.bf16.mxu1 %v11173_v8  ;;  %v11246_v7 = vld [vmem:[%s16106_s1 + $0x1b10] ss:$8 sps:$4 sm:$0xff]   ;;  %v11251_v8 = vld [vmem:[%s16106_s1 + $0x924] ss:$8 sps:$4 sm:$0xff]  }
 0x215   :  { %8507 = vmatprep.subr.bf16.mxu0 %v11176_v9  ;;  %v11254_v9 = vld [vmem:[%s16106_s1 + $0x1b24] ss:$8 sps:$4 sm:$0xff]  }
 0x217   :  { %7770 = vmatpush1.bf16.msra.mxu1 %v11171_v12  ;;  %v11249_v12 = vld [vmem:[%s16106_s1 + $0x920] ss:$8 sps:$4 sm:$0xff]  }
 0x218   :  { %8508 = vmatpush1.bf16.msra.mxu0 %v11174_v13  ;;  %7771 = vmatprep.subr.bf16.mxu1 %v11179_v16  ;;  %v11252_v13 = vld [vmem:[%s16106_s1 + $0x1b20] ss:$8 sps:$4 sm:$0xff]   ;;  %v11257_v16 = vld [vmem:[%s16106_s1 + $0x934] ss:$8 sps:$4 sm:$0xff]  }
 0x219   :  { %8509 = vmatprep.subr.bf16.mxu0 %v11182_v56  ;;  %v11260_v56 = vld [vmem:[%s16106_s1 + $0x1b34] ss:$8 sps:$4 sm:$0xff]  }
 0x21b   :  { %7772 = vmatpush1.bf16.msra.mxu1 %v11177_v18  ;;  %v11255_v18 = vld [vmem:[%s16106_s1 + $0x930] ss:$8 sps:$4 sm:$0xff]  }
 0x21c   :  { %8510 = vmatpush1.bf16.msra.mxu0 %v11180_v19  ;;  %7773 = vmatprep.subr.bf16.mxu1 %v11185_v20  ;;  %v11258_v19 = vld [vmem:[%s16106_s1 + $0x1b30] ss:$8 sps:$4 sm:$0xff]   ;;  %v11263_v20 = vld [vmem:[%s16106_s1 + $0x944] ss:$8 sps:$4 sm:$0xff]  }
 0x21d   :  { %8511 = vmatprep.subr.bf16.mxu0 %v11188_v21  ;;  %v11266_v21 = vld [vmem:[%s16106_s1 + $0x1b44] ss:$8 sps:$4 sm:$0xff]  }
 0x21f   :  { %7774 = vmatpush1.bf16.msra.mxu1 %v11183_v22  ;;  %v11261_v22 = vld [vmem:[%s16106_s1 + $0x940] ss:$8 sps:$4 sm:$0xff]  }
 0x220   :  { %8512 = vmatpush1.bf16.msra.mxu0 %v11186_v23  ;;  %7775 = vmatprep.subr.bf16.mxu1 %v11191_v24  ;;  %v11264_v23 = vld [vmem:[%s16106_s1 + $0x1b40] ss:$8 sps:$4 sm:$0xff]   ;;  %v11269_v24 = vld [vmem:[%s16106_s1 + $0x954] ss:$8 sps:$4 sm:$0xff]  }
 0x221   :  { %8513 = vmatprep.subr.bf16.mxu0 %v11194_v25  ;;  %v11272_v25 = vld [vmem:[%s16106_s1 + $0x1b54] ss:$8 sps:$4 sm:$0xff]  }
 0x223   :  { %7776 = vmatpush1.bf16.msra.mxu1 %v11189_v26  ;;  %v11267_v26 = vld [vmem:[%s16106_s1 + $0x950] ss:$8 sps:$4 sm:$0xff]  }
 0x224   :  { %8514 = vmatpush1.bf16.msra.mxu0 %v11192_v27  ;;  %7777 = vmatprep.subr.bf16.mxu1 %v11197_v28  ;;  %v11270_v27 = vld [vmem:[%s16106_s1 + $0x1b50] ss:$8 sps:$4 sm:$0xff]   ;;  %v11275_v28 = vld [vmem:[%s16106_s1 + $0x964] ss:$8 sps:$4 sm:$0xff]  }
 0x225   :  { %8515 = vmatprep.subr.bf16.mxu0 %v11200_v51  ;;  %v11278_v51 = vld [vmem:[%s16106_s1 + $0x1b64] ss:$8 sps:$4 sm:$0xff]  }
 0x227   :  { %7778 = vmatpush1.bf16.msra.mxu1 %v11195_v3  ;;  %v11273_v3 = vld [vmem:[%s16106_s1 + $0x960] ss:$8 sps:$4 sm:$0xff]  }
 0x228   :  { %8516 = vmatpush1.bf16.msra.mxu0 %v11198_v10  ;;  %7779 = vmatprep.subr.bf16.mxu1 %v11203_v30  ;;  %v11276_v10 = vld [vmem:[%s16106_s1 + $0x1b60] ss:$8 sps:$4 sm:$0xff]   ;;  %v11281_v30 = vld [vmem:[%s16106_s1 + $0x974] ss:$8 sps:$4 sm:$0xff]  }
 0x229   :  { %8517 = vmatprep.subr.bf16.mxu0 %v11206_v31  ;;  %v11284_v31 = vld [vmem:[%s16106_s1 + $0x1b74] ss:$8 sps:$4 sm:$0xff]  }
 0x22b   :  { %7780 = vmatpush1.bf16.msra.mxu1 %v11201_v32  ;;  %v11279_v32 = vld [vmem:[%s16106_s1 + $0x970] ss:$8 sps:$4 sm:$0xff]  }
 0x22c   :  { %8518 = vmatpush1.bf16.msra.mxu0 %v11204_v33  ;;  %7781 = vmatprep.subr.bf16.mxu1 %v11209_v34  ;;  %v11282_v33 = vld [vmem:[%s16106_s1 + $0x1b70] ss:$8 sps:$4 sm:$0xff]   ;;  %v11287_v34 = vld [vmem:[%s16106_s1 + $0x984] ss:$8 sps:$4 sm:$0xff]  }
 0x22d   :  { %8519 = vmatprep.subr.bf16.mxu0 %v11212_v14  ;;  %v11290_v14 = vld [vmem:[%s16106_s1 + $0x1b84] ss:$8 sps:$4 sm:$0xff]  }
 0x22f   :  { %7782 = vmatpush1.bf16.msra.mxu1 %v11207_v39  ;;  %v11285_v39 = vld [vmem:[%s16106_s1 + $0x980] ss:$8 sps:$4 sm:$0xff]  }
 0x230   :  { %8520 = vmatpush1.bf16.msra.mxu0 %v11210_v35  ;;  %7783 = vmatprep.subr.bf16.mxu1 %v11215_v42  ;;  %v11288_v35 = vld [vmem:[%s16106_s1 + $0x1b80] ss:$8 sps:$4 sm:$0xff]   ;;  %v11293_v42 = vld [vmem:[%s16106_s1 + $0x994] ss:$8 sps:$4 sm:$0xff]  }
 0x231   :  { %8521 = vmatprep.subr.bf16.mxu0 %v11218_v57  ;;  %v11296_v57 = vld [vmem:[%s16106_s1 + $0x1b94] ss:$8 sps:$4 sm:$0xff]  }
 0x233   :  { %7784 = vmatpush1.bf16.msra.mxu1 %v11213_v45  ;;  %v11291_v45 = vld [vmem:[%s16106_s1 + $0x990] ss:$8 sps:$4 sm:$0xff]  }
 0x234   :  { %8522 = vmatpush1.bf16.msra.mxu0 %v11216_v46  ;;  %7785 = vmatprep.subr.bf16.mxu1 %v11221_v47  ;;  %v11294_v46 = vld [vmem:[%s16106_s1 + $0x1b90] ss:$8 sps:$4 sm:$0xff]   ;;  %v11299_v47 = vld [vmem:[%s16106_s1 + $0x9a4] ss:$8 sps:$4 sm:$0xff]  }
 0x235   :  { %8523 = vmatprep.subr.bf16.mxu0 %v11224_v48  ;;  %v11302_v48 = vld [vmem:[%s16106_s1 + $0x1ba4] ss:$8 sps:$4 sm:$0xff]  }
 0x237   :  { %7786 = vmatpush1.bf16.msra.mxu1 %v11219_v52  ;;  %v11297_v52 = vld [vmem:[%s16106_s1 + $0x9a0] ss:$8 sps:$4 sm:$0xff]  }
 0x238   :  { %8524 = vmatpush1.bf16.msra.mxu0 %v11222_v53  ;;  %7787 = vmatprep.subr.bf16.mxu1 %v11227_v54  ;;  %v11300_v53 = vld [vmem:[%s16106_s1 + $0x1ba0] ss:$8 sps:$4 sm:$0xff]   ;;  %v11305_v54 = vld [vmem:[%s16106_s1 + $0x9b4] ss:$8 sps:$4 sm:$0xff]  }
 0x239   :  { %8525 = vmatprep.subr.bf16.mxu0 %v11230_v55  ;;  %v11308_v55 = vld [vmem:[%s16106_s1 + $0x1bb4] ss:$8 sps:$4 sm:$0xff]  }
 0x23b   :  { %7788 = vmatpush1.bf16.msra.mxu1 %v11225_v58  ;;  %v11311_v58 = vld [vmem:[%s16106_s1 + $0x9c4] ss:$8 sps:$4 sm:$0xff]  }
 0x23c   :  { %8526 = vmatpush1.bf16.msra.mxu0 %v11228_v11  ;;  %7789 = vmatprep.subr.bf16.mxu1 %v11233_v29  ;;  %v11314_v11 = vld [vmem:[%s16106_s1 + $0x1bc4] ss:$8 sps:$4 sm:$0xff]   ;;  %v11309_v29 = vld [vmem:[%s16106_s1 + $0x9c0] ss:$8 sps:$4 sm:$0xff]  }
 0x23d   :  { %8527 = vmatprep.subr.bf16.mxu0 %v11236_v37  ;;  %v11312_v37 = vld [vmem:[%s16106_s1 + $0x1bc0] ss:$8 sps:$4 sm:$0xff]  }
 0x23f   :  { %7790 = vmatpush1.bf16.msra.mxu1 %v11231_v60  ;;  %v11317_v60 = vld [vmem:[%s16106_s1 + $0x9d4] ss:$8 sps:$4 sm:$0xff]  }
 0x240   :  { %8528 = vmatpush1.bf16.msra.mxu0 %v11234_v61  ;;  %7800 = vmatprep.subr.bf16.mxu1 %v11239_v62  ;;  %v11320_v61 = vld [vmem:[%s16106_s1 + $0x1bd4] ss:$8 sps:$4 sm:$0xff]   ;;  %v11315_v62 = vld [vmem:[%s16106_s1 + $0x9d0] ss:$8 sps:$4 sm:$0xff]  }
 0x241   :  { %8538 = vmatprep.subr.bf16.mxu0 %v11242_v63  ;;  %v11318_v63 = vld [vmem:[%s16106_s1 + $0x1bd0] ss:$8 sps:$4 sm:$0xff]  }
 0x242   :  { %7792 = vmatmul.mubr.bf16.vlgmr.msra.gmra.mrb[0].mxu1 %v451_v2  ;;  %v14279_v2 = vld [vmem:[%s16105_s0 + $0x28] sm:$0xff] }
 0x243   :  { %8530 = vmatmul.mubr.bf16.vlgmr.msra.gmra.mrb[0].mxu0 %v487_v36  ;;  %7801 = vmatpush1.bf16.msra.mxu1 %v11237_v41  ;;  %v14284_v36 = vld [vmem:[%s16105_s0 + $0x70] sm:$0xff]  ;;  %v11321_v41 = vld [vmem:[%s16106_s1 + $0x9e0] ss:$8 sps:$4 sm:$0xff]  }
 0x244   :  { %8539 = vmatpush1.bf16.msra.mxu0 %v11240_v50  ;;  %7802 = vmatprep.subr.bf16.mxu1 %v11245_v4  ;;  %v11324_v50 = vld [vmem:[%s16106_s1 + $0x1be0] ss:$8 sps:$4 sm:$0xff]   ;;  %v11329_v4 = vld [vmem:[%s16106_s1 + $0x9f4] ss:$8 sps:$4 sm:$0xff]  }
 0x245   :  { %8540 = vmatprep.subr.bf16.mxu0 %v11248_v17  ;;  %7832 = vmatprep.mubr.bf16.mxu1 %v454_v44  ;;  %v11332_v17 = vld [vmem:[%s16106_s1 + $0x1bf4] ss:$8 sps:$4 sm:$0xff]   ;;  %v14300_v44 = vrot.slane %v14279_v2, %v12304_v49 }
 0x246   :  { %8570 = vmatprep.mubr.bf16.mxu0 %v490_v5  ;;  %v14304_v5 = vrot.slane %v14284_v36, %v12304_v49 }
 0x247   :  { %7803 = vmatpush1.bf16.msra.mxu1 %v11243_v6  ;;  %v11327_v6 = vld [vmem:[%s16106_s1 + $0x9f0] ss:$8 sps:$4 sm:$0xff]  }
 0x248   :  { %8541 = vmatpush1.bf16.msra.mxu0 %v11246_v7  ;;  %7804 = vmatprep.subr.bf16.mxu1 %v11251_v8  ;;  %v11330_v7 = vld [vmem:[%s16106_s1 + $0x1bf0] ss:$8 sps:$4 sm:$0xff]   ;;  %v11336_v8 = vld [vmem:[%s16106_s1 + $0xa04] ss:$8 sps:$4 sm:$0xff]  }
 0x249   :  { %8542 = vmatprep.subr.bf16.mxu0 %v11254_v9  ;;  %v11340_v9 = vld [vmem:[%s16106_s1 + $0x1c04] ss:$8 sps:$4 sm:$0xff]  }
 0x24b   :  { %7805 = vmatpush1.bf16.msra.mxu1 %v11249_v12  ;;  %v157_v12 = vcombine.high %v14300_v44, %v14300_v44 }
 0x24c   :  { %8543 = vmatpush1.bf16.msra.mxu0 %v11252_v13  ;;  %7806 = vmatprep.subr.bf16.mxu1 %v11257_v16  ;;  %v310_v13 = vcombine.high %v14304_v5, %v14304_v5  ;;  %v453_v16 = vpack.c.bf16 %v14083_v38, %v14083_v38  ;;  %v11346_v38 = vld [vmem:[%s16106_s1 + $0x1c14] ss:$8 sps:$4 sm:$0xff]  }
 0x24d   :  { %8544 = vmatprep.subr.bf16.mxu0 %v11260_v56  ;;  %v489_v56 = vpack.c.bf16 %v14086_v59, %v14086_v59  ;;  %v456_v59 = vpack.c.bf16 %v157_v12, %v157_v12 }
 0x24f   :  { %7807 = vmatpush1.bf16.msra.mxu1 %v11255_v18  ;;  %v11334_v18 = vld [vmem:[%s16106_s1 + $0xa00] ss:$8 sps:$4 sm:$0xff]  }
 0x250   :  { %8545 = vmatpush1.bf16.msra.mxu0 %v11258_v19  ;;  %7808 = vmatprep.subr.bf16.mxu1 %v11263_v20  ;;  %v11338_v19 = vld [vmem:[%s16106_s1 + $0x1c00] ss:$8 sps:$4 sm:$0xff]   ;;  %v11343_v20 = vld [vmem:[%s16106_s1 + $0xa14] ss:$8 sps:$4 sm:$0xff]  }
 0x251   :  { %8546 = vmatprep.subr.bf16.mxu0 %v11266_v21  ;;  %v492_v21 = vpack.c.bf16 %v310_v13, %v310_v13 }
 0x253   :  { %7809 = vmatpush1.bf16.msra.mxu1 %v11261_v22  ;;  %v11341_v22 = vld [vmem:[%s16106_s1 + $0xa10] ss:$8 sps:$4 sm:$0xff]  }
 0x254   :  { %8547 = vmatpush1.bf16.msra.mxu0 %v11264_v23  ;;  %7810 = vmatprep.subr.bf16.mxu1 %v11269_v24  ;;  %v11344_v23 = vld [vmem:[%s16106_s1 + $0x1c10] ss:$8 sps:$4 sm:$0xff]   ;;  %v11349_v24 = vld [vmem:[%s16106_s1 + $0xa24] ss:$8 sps:$4 sm:$0xff]  }
 0x255   :  { %8548 = vmatprep.subr.bf16.mxu0 %v11272_v25  ;;  %v11352_v25 = vld [vmem:[%s16106_s1 + $0x1c24] ss:$8 sps:$4 sm:$0xff]  }
 0x257   :  { %7811 = vmatpush1.bf16.msra.mxu1 %v11267_v26 }
 0x258   :  { %8549 = vmatpush1.bf16.msra.mxu0 %v11270_v27  ;;  %7812 = vmatprep.subr.bf16.mxu1 %v11275_v28 }
 0x259   :  { %8550 = vmatprep.subr.bf16.mxu0 %v11278_v51 }
 0x25b   :  { %7813 = vmatpush1.bf16.msra.mxu1 %v11273_v3 }
 0x25c   :  { %8551 = vmatpush1.bf16.msra.mxu0 %v11276_v10  ;;  %7814 = vmatprep.subr.bf16.mxu1 %v11281_v30 }
 0x25d   :  { %8552 = vmatprep.subr.bf16.mxu0 %v11284_v31 }
 0x25f   :  { %7815 = vmatpush1.bf16.msra.mxu1 %v11279_v32 }
 0x260   :  { %8553 = vmatpush1.bf16.msra.mxu0 %v11282_v33  ;;  %7816 = vmatprep.subr.bf16.mxu1 %v11287_v34 }
 0x261   :  { %8554 = vmatprep.subr.bf16.mxu0 %v11290_v14 }
 0x263   :  { %7817 = vmatpush1.bf16.msra.mxu1 %v11285_v39 }
 0x264   :  { %8555 = vmatpush1.bf16.msra.mxu0 %v11288_v35  ;;  %7818 = vmatprep.subr.bf16.mxu1 %v11293_v42 }
 0x265   :  { %8556 = vmatprep.subr.bf16.mxu0 %v11296_v57 }
 0x267   :  { %7819 = vmatpush1.bf16.msra.mxu1 %v11291_v45 }
 0x268   :  { %8557 = vmatpush1.bf16.msra.mxu0 %v11294_v46  ;;  %7820 = vmatprep.subr.bf16.mxu1 %v11299_v47 }
 0x269   :  { %8558 = vmatprep.subr.bf16.mxu0 %v11302_v48 }
 0x26b   :  { %7821 = vmatpush1.bf16.msra.mxu1 %v11297_v52 }
 0x26c   :  { %8559 = vmatpush1.bf16.msra.mxu0 %v11300_v53  ;;  %7822 = vmatprep.subr.bf16.mxu1 %v11305_v54 }
 0x26d   :  { %8560 = vmatprep.subr.bf16.mxu0 %v11308_v55 }
 0x26f   :  { %7823 = vmatpush1.bf16.msra.mxu1 %v11303_v15 }
 0x270   :  { %8561 = vmatpush1.bf16.msra.mxu0 %v11306_v40  ;;  %7824 = vmatprep.subr.bf16.mxu1 %v11311_v58 }
 0x271   :  { %8562 = vmatprep.subr.bf16.mxu0 %v11314_v11 }
 0x273   :  { %7825 = vmatpush1.bf16.msra.mxu1 %v11309_v29 }
 0x274   :  { %8563 = vmatpush1.bf16.msra.mxu0 %v11312_v37  ;;  %7826 = vmatprep.subr.bf16.mxu1 %v11317_v60 }
 0x275   :  { %8564 = vmatprep.subr.bf16.mxu0 %v11320_v61 }
 0x277   :  { %7827 = vmatpush1.bf16.msra.mxu1 %v11315_v62 }
 0x278   :  { %8565 = vmatpush1.bf16.msra.mxu0 %v11318_v63  ;;  %7828 = vmatprep.subr.bf16.mxu1 %v11323_v0 }
 0x279   :  { %8566 = vmatprep.subr.bf16.mxu0 %v11326_v1 }
 0x27b   :  { %7829 = vmatpush1.bf16.msra.mxu1 %v11321_v41 }
 0x27c   :  { %8567 = vmatpush1.bf16.msra.mxu0 %v11324_v50  ;;  %7830 = vmatprep.subr.bf16.mxu1 %v11329_v4 }
 0x27d   :  { %8568 = vmatprep.subr.bf16.mxu0 %v11332_v17 }
 0x27f   :  { %7831 = vmatpush1.bf16.msra.mxu1 %v11327_v6 }
 0x280   :  { %8569 = vmatpush1.bf16.msra.mxu0 %v11330_v7  ;;  %7841 = vmatprep.subr.bf16.mxu1 %v11336_v8 }
 0x281   :  { %8579 = vmatprep.subr.bf16.mxu0 %v11340_v9 }
 0x282   :  { %7833 = vmatmul.mubr.bf16.vlgmr.msra.gmra.mrb[0].mxu1 %v453_v16 }
 0x283   :  { %8571 = vmatmul.mubr.bf16.vlgmr.msra.gmra.mrb[0].mxu0 %v489_v56  ;;  %7842 = vmatpush1.bf16.msra.mxu1 %v11334_v18 }
 0x284   :  { %8580 = vmatpush1.bf16.msra.mxu0 %v11338_v19  ;;  %7843 = vmatprep.subr.bf16.mxu1 %v11343_v20 }
 0x285   :  { %8581 = vmatprep.subr.bf16.mxu0 %v11346_v38  ;;  %7873 = vmatprep.mubr.bf16.mxu1 %v456_v59 }
 0x286   :  { %8611 = vmatprep.mubr.bf16.mxu0 %v492_v21 }
 0x287   :  { %10 = vsyncpa [#allocation3], 0  ;;  %7844 = vmatpush1.bf16.msra.mxu1 %v11341_v22  ;;  %v11347_v26 = vld [vmem:[%s16106_s1 + $0xa20] ss:$8 sps:$4 sm:$0xff]   ;;  %v11355_v28 = vld [vmem:[%s16106_s1 + $0xa34] ss:$8 sps:$4 sm:$0xff]   ;;  %v142_v18 = vcombine.high %v14279_v2, %v14279_v2  ;;  %v295_v19 = vcombine.high %v14284_v36, %v14284_v36 }
 0x288   :  { %8582 = vmatpush1.bf16.msra.mxu0 %v11344_v23  ;;  %v11350_v27 = vld [vmem:[%s16106_s1 + $0x1c20] ss:$8 sps:$4 sm:$0xff]   ;;  %7845 = vmatprep.subr.bf16.mxu1 %v11349_v24  ;;  %v11358_v51 = vld [vmem:[%s16106_s1 + $0x1c34] ss:$8 sps:$4 sm:$0xff]   ;;  %v11353_v3 = vld [vmem:[%s16106_s1 + $0xa30] ss:$8 sps:$4 sm:$0xff]  }
 0x289   :  { %8583 = vmatprep.subr.bf16.mxu0 %v11352_v25  ;;  %v11356_v10 = vld [vmem:[%s16106_s1 + $0x1c30] ss:$8 sps:$4 sm:$0xff]   ;;  %v11361_v30 = vld [vmem:[%s16106_s1 + $0xa44] ss:$8 sps:$4 sm:$0xff]   ;;  %v11359_v32 = vld [vmem:[%s16106_s1 + $0xa40] ss:$8 sps:$4 sm:$0xff]   ;;  %v14511_v36 = vrot.slane %v142_v18, %v12304_v49  ;;  %v14514_v21 = vrot.slane %v295_v19, %v12304_v49 }
 0x28a   :  { %v11364_v31 = vld [vmem:[%s16106_s1 + $0x1c44] ss:$8 sps:$4 sm:$0xff]   ;;  %v11362_v33 = vld [vmem:[%s16106_s1 + $0x1c40] ss:$8 sps:$4 sm:$0xff]   ;;  %v11367_v34 = vld [vmem:[%s16106_s1 + $0xa54] ss:$8 sps:$4 sm:$0xff]  }
 0x28b   :  { %7846 = vmatpush1.bf16.msra.mxu1 %v11347_v26  ;;  %v11370_v14 = vld [vmem:[%s16106_s1 + $0x1c54] ss:$8 sps:$4 sm:$0xff]   ;;  %v11365_v39 = vld [vmem:[%s16106_s1 + $0xa50] ss:$8 sps:$4 sm:$0xff]   ;;  %v11373_v42 = vld [vmem:[%s16106_s1 + $0xa64] ss:$8 sps:$4 sm:$0xff]   ;;  %v158_v26 = vcombine.high %v14511_v36, %v14511_v36 }
 0x28c   :  { %8584 = vmatpush1.bf16.msra.mxu0 %v11350_v27  ;;  %7847 = vmatprep.subr.bf16.mxu1 %v11355_v28  ;;  %v11368_v35 = vld [vmem:[%s16106_s1 + $0x1c50] ss:$8 sps:$4 sm:$0xff]   ;;  %v11376_v57 = vld [vmem:[%s16106_s1 + $0x1c64] ss:$8 sps:$4 sm:$0xff]   ;;  %v11371_v45 = vld [vmem:[%s16106_s1 + $0xa60] ss:$8 sps:$4 sm:$0xff]   ;;  %v311_v27 = vcombine.high %v14514_v21, %v14514_v21  ;;  %v455_v28 = vpack.c.bf16 %v14300_v44, %v14300_v44 }
 0x28d   :  { %8585 = vmatprep.subr.bf16.mxu0 %v11358_v51  ;;  %v11374_v46 = vld [vmem:[%s16106_s1 + $0x1c60] ss:$8 sps:$4 sm:$0xff]   ;;  %v11379_v47 = vld [vmem:[%s16106_s1 + $0xa74] ss:$8 sps:$4 sm:$0xff]   ;;  %v11377_v52 = vld [vmem:[%s16106_s1 + $0xa70] ss:$8 sps:$4 sm:$0xff]   ;;  %v491_v51 = vpack.c.bf16 %v14304_v5, %v14304_v5  ;;  %v458_v5 = vpack.c.bf16 %v158_v26, %v158_v26 }
 0x28e   :  { %v11382_v48 = vld [vmem:[%s16106_s1 + $0x1c74] ss:$8 sps:$4 sm:$0xff]   ;;  %v11380_v53 = vld [vmem:[%s16106_s1 + $0x1c70] ss:$8 sps:$4 sm:$0xff]   ;;  %v11385_v54 = vld [vmem:[%s16106_s1 + $0xa84] ss:$8 sps:$4 sm:$0xff]  }
 0x28f   :  { %7848 = vmatpush1.bf16.msra.mxu1 %v11353_v3  ;;  %v11388_v55 = vld [vmem:[%s16106_s1 + $0x1c84] ss:$8 sps:$4 sm:$0xff]   ;;  %v11383_v15 = vld [vmem:[%s16106_s1 + $0xa80] ss:$8 sps:$4 sm:$0xff]   ;;  %v11391_v58 = vld [vmem:[%s16106_s1 + $0xa94] ss:$8 sps:$4 sm:$0xff]  }
 0x290   :  { %8586 = vmatpush1.bf16.msra.mxu0 %v11356_v10  ;;  %7849 = vmatprep.subr.bf16.mxu1 %v11361_v30  ;;  %v11386_v40 = vld [vmem:[%s16106_s1 + $0x1c80] ss:$8 sps:$4 sm:$0xff]   ;;  %v11394_v11 = vld [vmem:[%s16106_s1 + $0x1c94] ss:$8 sps:$4 sm:$0xff]   ;;  %v11389_v29 = vld [vmem:[%s16106_s1 + $0xa90] ss:$8 sps:$4 sm:$0xff]  }
 0x291   :  { %8587 = vmatprep.subr.bf16.mxu0 %v11364_v31  ;;  %v11392_v37 = vld [vmem:[%s16106_s1 + $0x1c90] ss:$8 sps:$4 sm:$0xff]   ;;  %v11397_v60 = vld [vmem:[%s16106_s1 + $0xaa4] ss:$8 sps:$4 sm:$0xff]   ;;  %v11395_v62 = vld [vmem:[%s16106_s1 + $0xaa0] ss:$8 sps:$4 sm:$0xff]   ;;  %v494_v31 = vpack.c.bf16 %v311_v27, %v311_v27 }
 0x292   :  { %v11400_v61 = vld [vmem:[%s16106_s1 + $0x1ca4] ss:$8 sps:$4 sm:$0xff]   ;;  %v11398_v63 = vld [vmem:[%s16106_s1 + $0x1ca0] ss:$8 sps:$4 sm:$0xff]   ;;  %v11403_v0 = vld [vmem:[%s16106_s1 + $0xab4] ss:$8 sps:$4 sm:$0xff]  }
 0x293   :  { %7850 = vmatpush1.bf16.msra.mxu1 %v11359_v32  ;;  %v11406_v1 = vld [vmem:[%s16106_s1 + $0x1cb4] ss:$8 sps:$4 sm:$0xff]   ;;  %v11401_v41 = vld [vmem:[%s16106_s1 + $0xab0] ss:$8 sps:$4 sm:$0xff]   ;;  %v11409_v4 = vld [vmem:[%s16106_s1 + $0xac4] ss:$8 sps:$4 sm:$0xff]  }
 0x294   :  { %8588 = vmatpush1.bf16.msra.mxu0 %v11362_v33  ;;  %7851 = vmatprep.subr.bf16.mxu1 %v11367_v34  ;;  %v11404_v50 = vld [vmem:[%s16106_s1 + $0x1cb0] ss:$8 sps:$4 sm:$0xff]   ;;  %v11412_v17 = vld [vmem:[%s16106_s1 + $0x1cc4] ss:$8 sps:$4 sm:$0xff]   ;;  %v11407_v6 = vld [vmem:[%s16106_s1 + $0xac0] ss:$8 sps:$4 sm:$0xff]  }
 0x295   :  { %8589 = vmatprep.subr.bf16.mxu0 %v11370_v14  ;;  %v11410_v7 = vld [vmem:[%s16106_s1 + $0x1cc0] ss:$8 sps:$4 sm:$0xff]   ;;  %v11415_v8 = vld [vmem:[%s16106_s1 + $0xad4] ss:$8 sps:$4 sm:$0xff]   ;;  %v11413_v12 = vld [vmem:[%s16106_s1 + $0xad0] ss:$8 sps:$4 sm:$0xff]  }
 0x296   :  { %v11418_v9 = vld [vmem:[%s16106_s1 + $0x1cd4] ss:$8 sps:$4 sm:$0xff]   ;;  %v11416_v13 = vld [vmem:[%s16106_s1 + $0x1cd0] ss:$8 sps:$4 sm:$0xff]   ;;  %v11421_v16 = vld [vmem:[%s16106_s1 + $0xae4] ss:$8 sps:$4 sm:$0xff]  }
 0x297   :  { %7852 = vmatpush1.bf16.msra.mxu1 %v11365_v39  ;;  %v11424_v56 = vld [vmem:[%s16106_s1 + $0x1ce4] ss:$8 sps:$4 sm:$0xff]   ;;  %v11419_v20 = vld [vmem:[%s16106_s1 + $0xae0] ss:$8 sps:$4 sm:$0xff]   ;;  %v11427_v59 = vld [vmem:[%s16106_s1 + $0xaf4] ss:$8 sps:$4 sm:$0xff]  }
 0x298   :  { %8590 = vmatpush1.bf16.msra.mxu0 %v11368_v35  ;;  %7853 = vmatprep.subr.bf16.mxu1 %v11373_v42  ;;  %v11422_v38 = vld [vmem:[%s16106_s1 + $0x1ce0] ss:$8 sps:$4 sm:$0xff]   ;;  %v11430_v2 = vld [vmem:[%s16106_s1 + $0x1cf4] ss:$8 sps:$4 sm:$0xff]   ;;  %v11425_v22 = vld [vmem:[%s16106_s1 + $0xaf0] ss:$8 sps:$4 sm:$0xff]  }
 0x299   :  { %8591 = vmatprep.subr.bf16.mxu0 %v11376_v57  ;;  %v11428_v23 = vld [vmem:[%s16106_s1 + $0x1cf0] ss:$8 sps:$4 sm:$0xff]   ;;  %v11433_v24 = vld [vmem:[%s16106_s1 + $0xb04] ss:$8 sps:$4 sm:$0xff]   ;;  %v11431_v3 = vld [vmem:[%s16106_s1 + $0xb00] ss:$8 sps:$4 sm:$0xff]  }
 0x29a   :  { %v11436_v25 = vld [vmem:[%s16106_s1 + $0x1d04] ss:$8 sps:$4 sm:$0xff]   ;;  %v11434_v10 = vld [vmem:[%s16106_s1 + $0x1d00] ss:$8 sps:$4 sm:$0xff]   ;;  %v11439_v30 = vld [vmem:[%s16106_s1 + $0xb14] ss:$8 sps:$4 sm:$0xff]  }
 0x29b   :  { %7854 = vmatpush1.bf16.msra.mxu1 %v11371_v45  ;;  %v11442_v44 = vld [vmem:[%s16106_s1 + $0x1d14] ss:$8 sps:$4 sm:$0xff]   ;;  %v11437_v32 = vld [vmem:[%s16106_s1 + $0xb10] ss:$8 sps:$4 sm:$0xff]   ;;  %v11445_v34 = vld [vmem:[%s16106_s1 + $0xb24] ss:$8 sps:$4 sm:$0xff]  }
 0x29c   :  { %8592 = vmatpush1.bf16.msra.mxu0 %v11374_v46  ;;  %7855 = vmatprep.subr.bf16.mxu1 %v11379_v47  ;;  %v11440_v33 = vld [vmem:[%s16106_s1 + $0x1d10] ss:$8 sps:$4 sm:$0xff]   ;;  %v11448_v14 = vld [vmem:[%s16106_s1 + $0x1d24] ss:$8 sps:$4 sm:$0xff]   ;;  %v11443_v39 = vld [vmem:[%s16106_s1 + $0xb20] ss:$8 sps:$4 sm:$0xff]  }
 0x29d   :  { %8593 = vmatprep.subr.bf16.mxu0 %v11382_v48  ;;  %v11446_v35 = vld [vmem:[%s16106_s1 + $0x1d20] ss:$8 sps:$4 sm:$0xff]   ;;  %v11451_v42 = vld [vmem:[%s16106_s1 + $0xb34] ss:$8 sps:$4 sm:$0xff]   ;;  %v11449_v45 = vld [vmem:[%s16106_s1 + $0xb30] ss:$8 sps:$4 sm:$0xff]  }
 0x29e   :  { %v11454_v57 = vld [vmem:[%s16106_s1 + $0x1d34] ss:$8 sps:$4 sm:$0xff]   ;;  %v11452_v46 = vld [vmem:[%s16106_s1 + $0x1d30] ss:$8 sps:$4 sm:$0xff]   ;;  %v11457_v47 = vld [vmem:[%s16106_s1 + $0xb44] ss:$8 sps:$4 sm:$0xff]  }
 0x29f   :  { %7856 = vmatpush1.bf16.msra.mxu1 %v11377_v52  ;;  %v11460_v48 = vld [vmem:[%s16106_s1 + $0x1d44] ss:$8 sps:$4 sm:$0xff]   ;;  %v11455_v52 = vld [vmem:[%s16106_s1 + $0xb40] ss:$8 sps:$4 sm:$0xff]   ;;  %v11497_v18 = vld [vmem:[%s16106_s1 + $0xbb0] ss:$8 sps:$4 sm:$0xff]  }
 0x2a0   :  { %8594 = vmatpush1.bf16.msra.mxu0 %v11380_v53  ;;  %7857 = vmatprep.subr.bf16.mxu1 %v11385_v54  ;;  %v11458_v53 = vld [vmem:[%s16106_s1 + $0x1d40] ss:$8 sps:$4 sm:$0xff]   ;;  %v11463_v54 = vld [vmem:[%s16106_s1 + $0xb54] ss:$8 sps:$4 sm:$0xff]   ;;  %v11500_v19 = vld [vmem:[%s16106_s1 + $0x1db0] ss:$8 sps:$4 sm:$0xff]  }
 0x2a1   :  { %8595 = vmatprep.subr.bf16.mxu0 %v11388_v55  ;;  %v11466_v55 = vld [vmem:[%s16106_s1 + $0x1d54] ss:$8 sps:$4 sm:$0xff]   ;;  %v11517_v26 = vld [vmem:[%s16106_s1 + $0xbe4] ss:$8 sps:$4 sm:$0xff]   ;;  %vm8941_vm0 = vcmask 588800   ;;  %s12138_s21 = smov [#allocation2]  }
 0x2a2   :  { %v11520_v27 = vld [vmem:[%s16106_s1 + $0x1de4] ss:$8 sps:$4 sm:$0xff]   ;;  %s9023_s22 = sshll.u32 %s12138_s21, 4  ;;  %vm9015_vm1 = vcmask 17408   ;;  %s9024_s22 = int_to_ptr.vmem [resolvable:$true] %s9023_s22 }
 0x2a3   :  { %7858 = vmatpush1.bf16.msra.mxu1 %v11383_v15  ;;  %v11461_v15 = vld [vmem:[%s16106_s1 + $0xb50] ss:$8 sps:$4 sm:$0xff]   ;;  %p12116_p1 = scmp.lt.s32.totalorder %s9024_s22, %s9024_s22 }
 0x2a4   :  { %8596 = vmatpush1.bf16.msra.mxu0 %v11386_v40  ;;  %7859 = vmatprep.subr.bf16.mxu1 %v11391_v58  ;;  %v11464_v40 = vld [vmem:[%s16106_s1 + $0x1d50] ss:$8 sps:$4 sm:$0xff]   ;;  %v11469_v58 = vld [vmem:[%s16106_s1 + $0xb64] ss:$8 sps:$4 sm:$0xff]  }
 0x2a5   :  { %8597 = vmatprep.subr.bf16.mxu0 %v11394_v11  ;;  %v11472_v11 = vld [vmem:[%s16106_s1 + $0x1d64] ss:$8 sps:$4 sm:$0xff]  }
 0x2a7   :  { %7860 = vmatpush1.bf16.msra.mxu1 %v11389_v29  ;;  %v11467_v29 = vld [vmem:[%s16106_s1 + $0xb60] ss:$8 sps:$4 sm:$0xff]  }
 0x2a8   :  { %8598 = vmatpush1.bf16.msra.mxu0 %v11392_v37  ;;  %7861 = vmatprep.subr.bf16.mxu1 %v11397_v60  ;;  %v11470_v37 = vld [vmem:[%s16106_s1 + $0x1d60] ss:$8 sps:$4 sm:$0xff]   ;;  %v11475_v60 = vld [vmem:[%s16106_s1 + $0xb74] ss:$8 sps:$4 sm:$0xff]  }
 0x2a9   :  { %8599 = vmatprep.subr.bf16.mxu0 %v11400_v61  ;;  %v11478_v61 = vld [vmem:[%s16106_s1 + $0x1d74] ss:$8 sps:$4 sm:$0xff]  }
 0x2ab   :  { %7862 = vmatpush1.bf16.msra.mxu1 %v11395_v62  ;;  %v11473_v62 = vld [vmem:[%s16106_s1 + $0xb70] ss:$8 sps:$4 sm:$0xff]  }
 0x2ac   :  { %8600 = vmatpush1.bf16.msra.mxu0 %v11398_v63  ;;  %7863 = vmatprep.subr.bf16.mxu1 %v11403_v0  ;;  %v11476_v63 = vld [vmem:[%s16106_s1 + $0x1d70] ss:$8 sps:$4 sm:$0xff]   ;;  %v11481_v0 = vld [vmem:[%s16106_s1 + $0xb84] ss:$8 sps:$4 sm:$0xff]  }
 0x2ad   :  { %8601 = vmatprep.subr.bf16.mxu0 %v11406_v1  ;;  %v11484_v1 = vld [vmem:[%s16106_s1 + $0x1d84] ss:$8 sps:$4 sm:$0xff]  }
 0x2af   :  { %7864 = vmatpush1.bf16.msra.mxu1 %v11401_v41  ;;  %v11479_v41 = vld [vmem:[%s16106_s1 + $0xb80] ss:$8 sps:$4 sm:$0xff]  }
 0x2b0   :  { %8602 = vmatpush1.bf16.msra.mxu0 %v11404_v50  ;;  %7865 = vmatprep.subr.bf16.mxu1 %v11409_v4  ;;  %v11482_v50 = vld [vmem:[%s16106_s1 + $0x1d80] ss:$8 sps:$4 sm:$0xff]   ;;  %v11487_v4 = vld [vmem:[%s16106_s1 + $0xb94] ss:$8 sps:$4 sm:$0xff]  }
 0x2b1   :  { %8603 = vmatprep.subr.bf16.mxu0 %v11412_v17  ;;  %v11490_v17 = vld [vmem:[%s16106_s1 + $0x1d94] ss:$8 sps:$4 sm:$0xff]  }
 0x2b3   :  { %7866 = vmatpush1.bf16.msra.mxu1 %v11407_v6  ;;  %v11485_v6 = vld [vmem:[%s16106_s1 + $0xb90] ss:$8 sps:$4 sm:$0xff]  }
 0x2b4   :  { %8604 = vmatpush1.bf16.msra.mxu0 %v11410_v7  ;;  %7867 = vmatprep.subr.bf16.mxu1 %v11415_v8  ;;  %v11488_v7 = vld [vmem:[%s16106_s1 + $0x1d90] ss:$8 sps:$4 sm:$0xff]   ;;  %v11493_v8 = vld [vmem:[%s16106_s1 + $0xba4] ss:$8 sps:$4 sm:$0xff]  }
 0x2b5   :  { %8605 = vmatprep.subr.bf16.mxu0 %v11418_v9  ;;  %v11496_v9 = vld [vmem:[%s16106_s1 + $0x1da4] ss:$8 sps:$4 sm:$0xff]  }
 0x2b7   :  { %7868 = vmatpush1.bf16.msra.mxu1 %v11413_v12  ;;  %v11491_v12 = vld [vmem:[%s16106_s1 + $0xba0] ss:$8 sps:$4 sm:$0xff]  }
 0x2b8   :  { %8606 = vmatpush1.bf16.msra.mxu0 %v11416_v13  ;;  %7869 = vmatprep.subr.bf16.mxu1 %v11421_v16  ;;  %v11494_v13 = vld [vmem:[%s16106_s1 + $0x1da0] ss:$8 sps:$4 sm:$0xff]   ;;  %v11499_v16 = vld [vmem:[%s16106_s1 + $0xbb4] ss:$8 sps:$4 sm:$0xff]  }
 0x2b9   :  { %8607 = vmatprep.subr.bf16.mxu0 %v11424_v56  ;;  %v11502_v56 = vld [vmem:[%s16106_s1 + $0x1db4] ss:$8 sps:$4 sm:$0xff]  }
 0x2bb   :  { %7870 = vmatpush1.bf16.msra.mxu1 %v11419_v20  ;;  %v11505_v20 = vld [vmem:[%s16106_s1 + $0xbc4] ss:$8 sps:$4 sm:$0xff]  }
 0x2bc   :  { %8608 = vmatpush1.bf16.msra.mxu0 %v11422_v38  ;;  %7871 = vmatprep.subr.bf16.mxu1 %v11427_v59  ;;  %v11508_v38 = vld [vmem:[%s16106_s1 + $0x1dc4] ss:$8 sps:$4 sm:$0xff]   ;;  %v11503_v59 = vld [vmem:[%s16106_s1 + $0xbc0] ss:$8 sps:$4 sm:$0xff]  }
 0x2bd   :  { %8609 = vmatprep.subr.bf16.mxu0 %v11430_v2  ;;  %v11506_v2 = vld [vmem:[%s16106_s1 + $0x1dc0] ss:$8 sps:$4 sm:$0xff]  }
 0x2bf   :  { %7872 = vmatpush1.bf16.msra.mxu1 %v11425_v22  ;;  %v11511_v22 = vld [vmem:[%s16106_s1 + $0xbd4] ss:$8 sps:$4 sm:$0xff]  }
 0x2c0   :  { %8610 = vmatpush1.bf16.msra.mxu0 %v11428_v23  ;;  %7882 = vmatprep.subr.bf16.mxu1 %v11433_v24  ;;  %v11514_v23 = vld [vmem:[%s16106_s1 + $0x1dd4] ss:$8 sps:$4 sm:$0xff]   ;;  %v11509_v24 = vld [vmem:[%s16106_s1 + $0xbd0] ss:$8 sps:$4 sm:$0xff]  }
 0x2c1   :  { %8620 = vmatprep.subr.bf16.mxu0 %v11436_v25  ;;  %v11512_v25 = vld [vmem:[%s16106_s1 + $0x1dd0] ss:$8 sps:$4 sm:$0xff]  }
 0x2c2   :  { %7874 = vmatmul.mubr.bf16.vlgmr.msra.gmra.mrb[0].mxu1 %v455_v28  ;;  %v14707_v28 = vld [vmem:[%s16105_s0 + $0x30] sm:$0xff] }
 0x2c3   :  { %8612 = vmatmul.mubr.bf16.vlgmr.msra.gmra.mrb[0].mxu0 %v491_v51  ;;  %7883 = vmatpush1.bf16.msra.mxu1 %v11431_v3  ;;  %v14712_v51 = vld [vmem:[%s16105_s0 + $0x78] sm:$0xff]  ;;  %v11515_v3 = vld [vmem:[%s16106_s1 + $0xbe0] ss:$8 sps:$4 sm:$0xff]  }
 0x2c4   :  { %8621 = vmatpush1.bf16.msra.mxu0 %v11434_v10  ;;  %7884 = vmatprep.subr.bf16.mxu1 %v11439_v30  ;;  %v11518_v10 = vld [vmem:[%s16106_s1 + $0x1de0] ss:$8 sps:$4 sm:$0xff]   ;;  %v11523_v30 = vld [vmem:[%s16106_s1 + $0xbf4] ss:$8 sps:$4 sm:$0xff]  }
 0x2c5   :  { %8622 = vmatprep.subr.bf16.mxu0 %v11442_v44  ;;  %7914 = vmatprep.mubr.bf16.mxu1 %v458_v5  ;;  %v11526_v44 = vld [vmem:[%s16106_s1 + $0x1df4] ss:$8 sps:$4 sm:$0xff]   ;;  %v14728_v5 = vrot.slane %v14707_v28, %v12304_v49 }
 0x2c6   :  { %8652 = vmatprep.mubr.bf16.mxu0 %v494_v31  ;;  %v14732_v31 = vrot.slane %v14712_v51, %v12304_v49 }
 0x2c7   :  { %7885 = vmatpush1.bf16.msra.mxu1 %v11437_v32  ;;  %v11521_v32 = vld [vmem:[%s16106_s1 + $0xbf0] ss:$8 sps:$4 sm:$0xff]  }
 0x2c8   :  { %8623 = vmatpush1.bf16.msra.mxu0 %v11440_v33  ;;  %7886 = vmatprep.subr.bf16.mxu1 %v11445_v34  ;;  %v11524_v33 = vld [vmem:[%s16106_s1 + $0x1df0] ss:$8 sps:$4 sm:$0xff]   ;;  %v11530_v34 = vld [vmem:[%s16106_s1 + $0xc04] ss:$8 sps:$4 sm:$0xff]  }
 0x2c9   :  { %8624 = vmatprep.subr.bf16.mxu0 %v11448_v14  ;;  %v11534_v14 = vld [vmem:[%s16106_s1 + $0x1e04] ss:$8 sps:$4 sm:$0xff]  }
 0x2cb   :  { %7887 = vmatpush1.bf16.msra.mxu1 %v11443_v39  ;;  %v174_v39 = vcombine.high %v14728_v5, %v14728_v5 }
 0x2cc   :  { %8625 = vmatpush1.bf16.msra.mxu0 %v11446_v35  ;;  %7888 = vmatprep.subr.bf16.mxu1 %v11451_v42  ;;  %v327_v35 = vcombine.high %v14732_v31, %v14732_v31  ;;  %v457_v42 = vpack.c.bf16 %v14511_v36, %v14511_v36  ;;  %v11540_v36 = vld [vmem:[%s16106_s1 + $0x1e14] ss:$8 sps:$4 sm:$0xff]  }
 0x2cd   :  { %8626 = vmatprep.subr.bf16.mxu0 %v11454_v57  ;;  %v493_v57 = vpack.c.bf16 %v14514_v21, %v14514_v21  ;;  %v460_v21 = vpack.c.bf16 %v174_v39, %v174_v39  ;;  %v11607_v39 = vld [vmem:[%s16106_s1 + $0xcd0] ss:$8 sps:$4 sm:$0xff]  }
 0x2cf   :  { %7889 = vmatpush1.bf16.msra.mxu1 %v11449_v45  ;;  %v11528_v45 = vld [vmem:[%s16106_s1 + $0xc00] ss:$8 sps:$4 sm:$0xff]  }
 0x2d0   :  { %8627 = vmatpush1.bf16.msra.mxu0 %v11452_v46  ;;  %7890 = vmatprep.subr.bf16.mxu1 %v11457_v47  ;;  %v11532_v46 = vld [vmem:[%s16106_s1 + $0x1e00] ss:$8 sps:$4 sm:$0xff]   ;;  %v11537_v47 = vld [vmem:[%s16106_s1 + $0xc14] ss:$8 sps:$4 sm:$0xff]  }
 0x2d1   :  { %8628 = vmatprep.subr.bf16.mxu0 %v11460_v48  ;;  %v496_v48 = vpack.c.bf16 %v327_v35, %v327_v35  ;;  %v11610_v35 = vld [vmem:[%s16106_s1 + $0x1ed0] ss:$8 sps:$4 sm:$0xff]  }
 0x2d3   :  { %7891 = vmatpush1.bf16.msra.mxu1 %v11455_v52  ;;  %v11535_v52 = vld [vmem:[%s16106_s1 + $0xc10] ss:$8 sps:$4 sm:$0xff]  }
 0x2d4   :  { %8629 = vmatpush1.bf16.msra.mxu0 %v11458_v53  ;;  %7892 = vmatprep.subr.bf16.mxu1 %v11463_v54  ;;  %v11538_v53 = vld [vmem:[%s16106_s1 + $0x1e10] ss:$8 sps:$4 sm:$0xff]   ;;  %v11543_v54 = vld [vmem:[%s16106_s1 + $0xc24] ss:$8 sps:$4 sm:$0xff]  }
 0x2d5   :  { %8630 = vmatprep.subr.bf16.mxu0 %v11466_v55  ;;  %v11546_v55 = vld [vmem:[%s16106_s1 + $0x1e24] ss:$8 sps:$4 sm:$0xff]  }
 0x2d7   :  { %7893 = vmatpush1.bf16.msra.mxu1 %v11461_v15  ;;  %v11541_v15 = vld [vmem:[%s16106_s1 + $0xc20] ss:$8 sps:$4 sm:$0xff]  }
 0x2d8   :  { %8631 = vmatpush1.bf16.msra.mxu0 %v11464_v40  ;;  %7894 = vmatprep.subr.bf16.mxu1 %v11469_v58  ;;  %v11544_v40 = vld [vmem:[%s16106_s1 + $0x1e20] ss:$8 sps:$4 sm:$0xff]   ;;  %v11549_v58 = vld [vmem:[%s16106_s1 + $0xc34] ss:$8 sps:$4 sm:$0xff]  }
 0x2d9   :  { %8632 = vmatprep.subr.bf16.mxu0 %v11472_v11  ;;  %v11552_v11 = vld [vmem:[%s16106_s1 + $0x1e34] ss:$8 sps:$4 sm:$0xff]  }
 0x2db   :  { %7895 = vmatpush1.bf16.msra.mxu1 %v11467_v29  ;;  %v11547_v29 = vld [vmem:[%s16106_s1 + $0xc30] ss:$8 sps:$4 sm:$0xff]  }
 0x2dc   :  { %8633 = vmatpush1.bf16.msra.mxu0 %v11470_v37  ;;  %7896 = vmatprep.subr.bf16.mxu1 %v11475_v60  ;;  %v11550_v37 = vld [vmem:[%s16106_s1 + $0x1e30] ss:$8 sps:$4 sm:$0xff]   ;;  %v11555_v60 = vld [vmem:[%s16106_s1 + $0xc44] ss:$8 sps:$4 sm:$0xff]  }
 0x2dd   :  { %8634 = vmatprep.subr.bf16.mxu0 %v11478_v61  ;;  %v11558_v61 = vld [vmem:[%s16106_s1 + $0x1e44] ss:$8 sps:$4 sm:$0xff]  }
 0x2df   :  { %7897 = vmatpush1.bf16.msra.mxu1 %v11473_v62  ;;  %v11553_v62 = vld [vmem:[%s16106_s1 + $0xc40] ss:$8 sps:$4 sm:$0xff]  }
 0x2e0   :  { %8635 = vmatpush1.bf16.msra.mxu0 %v11476_v63  ;;  %7898 = vmatprep.subr.bf16.mxu1 %v11481_v0  ;;  %v11556_v63 = vld [vmem:[%s16106_s1 + $0x1e40] ss:$8 sps:$4 sm:$0xff]   ;;  %v11561_v0 = vld [vmem:[%s16106_s1 + $0xc54] ss:$8 sps:$4 sm:$0xff]  }
 0x2e1   :  { %8636 = vmatprep.subr.bf16.mxu0 %v11484_v1  ;;  %v11564_v1 = vld [vmem:[%s16106_s1 + $0x1e54] ss:$8 sps:$4 sm:$0xff]  }
 0x2e3   :  { %7899 = vmatpush1.bf16.msra.mxu1 %v11479_v41  ;;  %v11559_v41 = vld [vmem:[%s16106_s1 + $0xc50] ss:$8 sps:$4 sm:$0xff]  }
 0x2e4   :  { %8637 = vmatpush1.bf16.msra.mxu0 %v11482_v50  ;;  %7900 = vmatprep.subr.bf16.mxu1 %v11487_v4  ;;  %v11562_v50 = vld [vmem:[%s16106_s1 + $0x1e50] ss:$8 sps:$4 sm:$0xff]   ;;  %v11567_v4 = vld [vmem:[%s16106_s1 + $0xc64] ss:$8 sps:$4 sm:$0xff]  }
 0x2e5   :  { %8638 = vmatprep.subr.bf16.mxu0 %v11490_v17  ;;  %v11570_v17 = vld [vmem:[%s16106_s1 + $0x1e64] ss:$8 sps:$4 sm:$0xff]  }
 0x2e7   :  { %7901 = vmatpush1.bf16.msra.mxu1 %v11485_v6  ;;  %v11565_v6 = vld [vmem:[%s16106_s1 + $0xc60] ss:$8 sps:$4 sm:$0xff]  }
 0x2e8   :  { %8639 = vmatpush1.bf16.msra.mxu0 %v11488_v7  ;;  %7902 = vmatprep.subr.bf16.mxu1 %v11493_v8  ;;  %v11568_v7 = vld [vmem:[%s16106_s1 + $0x1e60] ss:$8 sps:$4 sm:$0xff]   ;;  %v11573_v8 = vld [vmem:[%s16106_s1 + $0xc74] ss:$8 sps:$4 sm:$0xff]  }
 0x2e9   :  { %8640 = vmatprep.subr.bf16.mxu0 %v11496_v9  ;;  %v11576_v9 = vld [vmem:[%s16106_s1 + $0x1e74] ss:$8 sps:$4 sm:$0xff]  }
 0x2eb   :  { %7903 = vmatpush1.bf16.msra.mxu1 %v11491_v12  ;;  %v11571_v12 = vld [vmem:[%s16106_s1 + $0xc70] ss:$8 sps:$4 sm:$0xff]  }
 0x2ec   :  { %8641 = vmatpush1.bf16.msra.mxu0 %v11494_v13  ;;  %7904 = vmatprep.subr.bf16.mxu1 %v11499_v16  ;;  %v11574_v13 = vld [vmem:[%s16106_s1 + $0x1e70] ss:$8 sps:$4 sm:$0xff]   ;;  %v11579_v16 = vld [vmem:[%s16106_s1 + $0xc84] ss:$8 sps:$4 sm:$0xff]  }
 0x2ed   :  { %8642 = vmatprep.subr.bf16.mxu0 %v11502_v56  ;;  %v11582_v56 = vld [vmem:[%s16106_s1 + $0x1e84] ss:$8 sps:$4 sm:$0xff]  }
 0x2ef   :  { %7905 = vmatpush1.bf16.msra.mxu1 %v11497_v18  ;;  %v11577_v18 = vld [vmem:[%s16106_s1 + $0xc80] ss:$8 sps:$4 sm:$0xff]  }
 0x2f0   :  { %8643 = vmatpush1.bf16.msra.mxu0 %v11500_v19  ;;  %7906 = vmatprep.subr.bf16.mxu1 %v11505_v20  ;;  %v11580_v19 = vld [vmem:[%s16106_s1 + $0x1e80] ss:$8 sps:$4 sm:$0xff]   ;;  %v11585_v20 = vld [vmem:[%s16106_s1 + $0xc94] ss:$8 sps:$4 sm:$0xff]  }
 0x2f1   :  { %8644 = vmatprep.subr.bf16.mxu0 %v11508_v38  ;;  %v11588_v38 = vld [vmem:[%s16106_s1 + $0x1e94] ss:$8 sps:$4 sm:$0xff]  }
 0x2f3   :  { %7907 = vmatpush1.bf16.msra.mxu1 %v11503_v59  ;;  %v11583_v59 = vld [vmem:[%s16106_s1 + $0xc90] ss:$8 sps:$4 sm:$0xff]  }
 0x2f4   :  { %8645 = vmatpush1.bf16.msra.mxu0 %v11506_v2  ;;  %7908 = vmatprep.subr.bf16.mxu1 %v11511_v22  ;;  %v11586_v2 = vld [vmem:[%s16106_s1 + $0x1e90] ss:$8 sps:$4 sm:$0xff]   ;;  %v11591_v22 = vld [vmem:[%s16106_s1 + $0xca4] ss:$8 sps:$4 sm:$0xff]  }
 0x2f5   :  { %8646 = vmatprep.subr.bf16.mxu0 %v11514_v23  ;;  %v11594_v23 = vld [vmem:[%s16106_s1 + $0x1ea4] ss:$8 sps:$4 sm:$0xff]  }
 0x2f7   :  { %7909 = vmatpush1.bf16.msra.mxu1 %v11509_v24  ;;  %v11589_v24 = vld [vmem:[%s16106_s1 + $0xca0] ss:$8 sps:$4 sm:$0xff]  }
 0x2f8   :  { %8647 = vmatpush1.bf16.msra.mxu0 %v11512_v25  ;;  %7910 = vmatprep.subr.bf16.mxu1 %v11517_v26  ;;  %v11592_v25 = vld [vmem:[%s16106_s1 + $0x1ea0] ss:$8 sps:$4 sm:$0xff]   ;;  %v11597_v26 = vld [vmem:[%s16106_s1 + $0xcb4] ss:$8 sps:$4 sm:$0xff]  }
 0x2f9   :  { %8648 = vmatprep.subr.bf16.mxu0 %v11520_v27  ;;  %v11600_v27 = vld [vmem:[%s16106_s1 + $0x1eb4] ss:$8 sps:$4 sm:$0xff]  }
 0x2fb   :  { %7911 = vmatpush1.bf16.msra.mxu1 %v11515_v3  ;;  %v11595_v3 = vld [vmem:[%s16106_s1 + $0xcb0] ss:$8 sps:$4 sm:$0xff]  }
 0x2fc   :  { %8649 = vmatpush1.bf16.msra.mxu0 %v11518_v10  ;;  %7912 = vmatprep.subr.bf16.mxu1 %v11523_v30  ;;  %v11598_v10 = vld [vmem:[%s16106_s1 + $0x1eb0] ss:$8 sps:$4 sm:$0xff]   ;;  %v11603_v30 = vld [vmem:[%s16106_s1 + $0xcc4] ss:$8 sps:$4 sm:$0xff]  }
 0x2fd   :  { %8650 = vmatprep.subr.bf16.mxu0 %v11526_v44  ;;  %v11606_v44 = vld [vmem:[%s16106_s1 + $0x1ec4] ss:$8 sps:$4 sm:$0xff]  }
 0x2ff   :  { %7913 = vmatpush1.bf16.msra.mxu1 %v11521_v32  ;;  %v11601_v32 = vld [vmem:[%s16106_s1 + $0xcc0] ss:$8 sps:$4 sm:$0xff]  }
 0x300   :  { %8651 = vmatpush1.bf16.msra.mxu0 %v11524_v33  ;;  %7923 = vmatprep.subr.bf16.mxu1 %v11530_v34  ;;  %v11604_v33 = vld [vmem:[%s16106_s1 + $0x1ec0] ss:$8 sps:$4 sm:$0xff]   ;;  %v11609_v34 = vld [vmem:[%s16106_s1 + $0xcd4] ss:$8 sps:$4 sm:$0xff]  }
 0x301   :  { %8661 = vmatprep.subr.bf16.mxu0 %v11534_v14  ;;  %v11612_v14 = vld [vmem:[%s16106_s1 + $0x1ed4] ss:$8 sps:$4 sm:$0xff]  }
 0x302   :  { %7915 = vmatmul.mubr.bf16.vlgmr.msra.gmra.mrb[0].mxu1 %v457_v42  ;;  %v11615_v42 = vld [vmem:[%s16106_s1 + $0xce4] ss:$8 sps:$4 sm:$0xff]  }
 0x303   :  { %8653 = vmatmul.mubr.bf16.vlgmr.msra.gmra.mrb[0].mxu0 %v493_v57  ;;  %7924 = vmatpush1.bf16.msra.mxu1 %v11528_v45  ;;  %v11618_v57 = vld [vmem:[%s16106_s1 + $0x1ee4] ss:$8 sps:$4 sm:$0xff]   ;;  %v159_v45 = vcombine.high %v14707_v28, %v14707_v28  ;;  %v11624_v28 = vld [vmem:[%s16106_s1 + $0x1ef4] ss:$8 sps:$4 sm:$0xff]  }
 0x304   :  { %8662 = vmatpush1.bf16.msra.mxu0 %v11532_v46  ;;  %7925 = vmatprep.subr.bf16.mxu1 %v11537_v47  ;;  %v312_v46 = vcombine.high %v14712_v51, %v14712_v51  ;;  %v11613_v47 = vld [vmem:[%s16106_s1 + $0xce0] ss:$8 sps:$4 sm:$0xff]  }
 0x305   :  { %8663 = vmatprep.subr.bf16.mxu0 %v11540_v36  ;;  %7955 = vmatprep.mubr.bf16.mxu1 %v460_v21  ;;  %v11616_v36 = vld [vmem:[%s16106_s1 + $0x1ee0] ss:$8 sps:$4 sm:$0xff]   ;;  %v11621_v21 = vld [vmem:[%s16106_s1 + $0xcf4] ss:$8 sps:$4 sm:$0xff]   ;;  %v14939_v51 = vrot.slane %v159_v45, %v12304_v49  ;;  %v11691_v45 = vld [vmem:[%s16106_s1 + $0xdb0] ss:$8 sps:$4 sm:$0xff]  }
 0x306   :  { %8693 = vmatprep.mubr.bf16.mxu0 %v496_v48  ;;  %v14942_v48 = vrot.slane %v312_v46, %v12304_v49  ;;  %v11694_v46 = vld [vmem:[%s16106_s1 + $0x1fb0] ss:$8 sps:$4 sm:$0xff]  }
 0x307   :  { %7926 = vmatpush1.bf16.msra.mxu1 %v11535_v52  ;;  %v11619_v52 = vld [vmem:[%s16106_s1 + $0xcf0] ss:$8 sps:$4 sm:$0xff]  }
 0x308   :  { %8664 = vmatpush1.bf16.msra.mxu0 %v11538_v53  ;;  %7927 = vmatprep.subr.bf16.mxu1 %v11543_v54  ;;  %v11622_v53 = vld [vmem:[%s16106_s1 + $0x1ef0] ss:$8 sps:$4 sm:$0xff]   ;;  %v11627_v54 = vld [vmem:[%s16106_s1 + $0xd04] ss:$8 sps:$4 sm:$0xff]  }
 0x309   :  { %8665 = vmatprep.subr.bf16.mxu0 %v11546_v55  ;;  %v11630_v55 = vld [vmem:[%s16106_s1 + $0x1f04] ss:$8 sps:$4 sm:$0xff]  }
 0x30b   :  { %7928 = vmatpush1.bf16.msra.mxu1 %v11541_v15  ;;  %v175_v15 = vcombine.high %v14939_v51, %v14939_v51 }
 0x30c   :  { %8666 = vmatpush1.bf16.msra.mxu0 %v11544_v40  ;;  %7929 = vmatprep.subr.bf16.mxu1 %v11549_v58  ;;  %v328_v40 = vcombine.high %v14942_v48, %v14942_v48  ;;  %v459_v58 = vpack.c.bf16 %v14728_v5, %v14728_v5  ;;  %v11636_v5 = vld [vmem:[%s16106_s1 + $0x1f14] ss:$8 sps:$4 sm:$0xff]  }
 0x30d   :  { %8667 = vmatprep.subr.bf16.mxu0 %v11552_v11  ;;  %v495_v11 = vpack.c.bf16 %v14732_v31, %v14732_v31  ;;  %v462_v31 = vpack.c.bf16 %v175_v15, %v175_v15  ;;  %v11711_v15 = vld [vmem:[%s16106_s1 + $0xde4] ss:$8 sps:$4 sm:$0xff]  }
 0x30f   :  { %7930 = vmatpush1.bf16.msra.mxu1 %v11547_v29  ;;  %v11625_v29 = vld [vmem:[%s16106_s1 + $0xd00] ss:$8 sps:$4 sm:$0xff]  }
 0x310   :  { %8668 = vmatpush1.bf16.msra.mxu0 %v11550_v37  ;;  %7931 = vmatprep.subr.bf16.mxu1 %v11555_v60  ;;  %v11628_v37 = vld [vmem:[%s16106_s1 + $0x1f00] ss:$8 sps:$4 sm:$0xff]   ;;  %v11633_v60 = vld [vmem:[%s16106_s1 + $0xd14] ss:$8 sps:$4 sm:$0xff]  }
 0x311   :  { %8669 = vmatprep.subr.bf16.mxu0 %v11558_v61  ;;  %v498_v61 = vpack.c.bf16 %v328_v40, %v328_v40  ;;  %v11714_v40 = vld [vmem:[%s16106_s1 + $0x1fe4] ss:$8 sps:$4 sm:$0xff]  }
 0x313   :  { %7932 = vmatpush1.bf16.msra.mxu1 %v11553_v62  ;;  %v11631_v62 = vld [vmem:[%s16106_s1 + $0xd10] ss:$8 sps:$4 sm:$0xff]  }
 0x314   :  { %8670 = vmatpush1.bf16.msra.mxu0 %v11556_v63  ;;  %7933 = vmatprep.subr.bf16.mxu1 %v11561_v0  ;;  %v11634_v63 = vld [vmem:[%s16106_s1 + $0x1f10] ss:$8 sps:$4 sm:$0xff]   ;;  %v11639_v0 = vld [vmem:[%s16106_s1 + $0xd24] ss:$8 sps:$4 sm:$0xff]  }
 0x315   :  { %8671 = vmatprep.subr.bf16.mxu0 %v11564_v1  ;;  %v11642_v1 = vld [vmem:[%s16106_s1 + $0x1f24] ss:$8 sps:$4 sm:$0xff]  }
 0x317   :  { %7934 = vmatpush1.bf16.msra.mxu1 %v11559_v41  ;;  %v11637_v41 = vld [vmem:[%s16106_s1 + $0xd20] ss:$8 sps:$4 sm:$0xff]  }
 0x318   :  { %8672 = vmatpush1.bf16.msra.mxu0 %v11562_v50  ;;  %7935 = vmatprep.subr.bf16.mxu1 %v11567_v4  ;;  %v11640_v50 = vld [vmem:[%s16106_s1 + $0x1f20] ss:$8 sps:$4 sm:$0xff]   ;;  %v11645_v4 = vld [vmem:[%s16106_s1 + $0xd34] ss:$8 sps:$4 sm:$0xff]  }
 0x319   :  { %8673 = vmatprep.subr.bf16.mxu0 %v11570_v17  ;;  %v11648_v17 = vld [vmem:[%s16106_s1 + $0x1f34] ss:$8 sps:$4 sm:$0xff]  }
 0x31b   :  { %7936 = vmatpush1.bf16.msra.mxu1 %v11565_v6  ;;  %v11643_v6 = vld [vmem:[%s16106_s1 + $0xd30] ss:$8 sps:$4 sm:$0xff]  }
 0x31c   :  { %8674 = vmatpush1.bf16.msra.mxu0 %v11568_v7  ;;  %7937 = vmatprep.subr.bf16.mxu1 %v11573_v8  ;;  %v11646_v7 = vld [vmem:[%s16106_s1 + $0x1f30] ss:$8 sps:$4 sm:$0xff]   ;;  %v11651_v8 = vld [vmem:[%s16106_s1 + $0xd44] ss:$8 sps:$4 sm:$0xff]  }
 0x31d   :  { %8675 = vmatprep.subr.bf16.mxu0 %v11576_v9  ;;  %v11654_v9 = vld [vmem:[%s16106_s1 + $0x1f44] ss:$8 sps:$4 sm:$0xff]  }
 0x31f   :  { %7938 = vmatpush1.bf16.msra.mxu1 %v11571_v12  ;;  %v11649_v12 = vld [vmem:[%s16106_s1 + $0xd40] ss:$8 sps:$4 sm:$0xff]  }
 0x320   :  { %8676 = vmatpush1.bf16.msra.mxu0 %v11574_v13  ;;  %7939 = vmatprep.subr.bf16.mxu1 %v11579_v16  ;;  %v11652_v13 = vld [vmem:[%s16106_s1 + $0x1f40] ss:$8 sps:$4 sm:$0xff]   ;;  %v11657_v16 = vld [vmem:[%s16106_s1 + $0xd54] ss:$8 sps:$4 sm:$0xff]  }
 0x321   :  { %8677 = vmatprep.subr.bf16.mxu0 %v11582_v56  ;;  %v11660_v56 = vld [vmem:[%s16106_s1 + $0x1f54] ss:$8 sps:$4 sm:$0xff]  }
 0x323   :  { %7940 = vmatpush1.bf16.msra.mxu1 %v11577_v18  ;;  %v11655_v18 = vld [vmem:[%s16106_s1 + $0xd50] ss:$8 sps:$4 sm:$0xff]  }
 0x324   :  { %8678 = vmatpush1.bf16.msra.mxu0 %v11580_v19  ;;  %7941 = vmatprep.subr.bf16.mxu1 %v11585_v20  ;;  %v11658_v19 = vld [vmem:[%s16106_s1 + $0x1f50] ss:$8 sps:$4 sm:$0xff]   ;;  %v11663_v20 = vld [vmem:[%s16106_s1 + $0xd64] ss:$8 sps:$4 sm:$0xff]  }
 0x325   :  { %8679 = vmatprep.subr.bf16.mxu0 %v11588_v38  ;;  %v11666_v38 = vld [vmem:[%s16106_s1 + $0x1f64] ss:$8 sps:$4 sm:$0xff]  }
 0x327   :  { %7942 = vmatpush1.bf16.msra.mxu1 %v11583_v59  ;;  %v11661_v59 = vld [vmem:[%s16106_s1 + $0xd60] ss:$8 sps:$4 sm:$0xff]  }
 0x328   :  { %8680 = vmatpush1.bf16.msra.mxu0 %v11586_v2  ;;  %7943 = vmatprep.subr.bf16.mxu1 %v11591_v22  ;;  %v11664_v2 = vld [vmem:[%s16106_s1 + $0x1f60] ss:$8 sps:$4 sm:$0xff]   ;;  %v11669_v22 = vld [vmem:[%s16106_s1 + $0xd74] ss:$8 sps:$4 sm:$0xff]  }
 0x329   :  { %8681 = vmatprep.subr.bf16.mxu0 %v11594_v23  ;;  %v11672_v23 = vld [vmem:[%s16106_s1 + $0x1f74] ss:$8 sps:$4 sm:$0xff]  }
 0x32b   :  { %7944 = vmatpush1.bf16.msra.mxu1 %v11589_v24  ;;  %v11667_v24 = vld [vmem:[%s16106_s1 + $0xd70] ss:$8 sps:$4 sm:$0xff]  }
 0x32c   :  { %8682 = vmatpush1.bf16.msra.mxu0 %v11592_v25  ;;  %7945 = vmatprep.subr.bf16.mxu1 %v11597_v26  ;;  %v11670_v25 = vld [vmem:[%s16106_s1 + $0x1f70] ss:$8 sps:$4 sm:$0xff]   ;;  %v11675_v26 = vld [vmem:[%s16106_s1 + $0xd84] ss:$8 sps:$4 sm:$0xff]  }
 0x32d   :  { %8683 = vmatprep.subr.bf16.mxu0 %v11600_v27  ;;  %v11678_v27 = vld [vmem:[%s16106_s1 + $0x1f84] ss:$8 sps:$4 sm:$0xff]  }
 0x32f   :  { %7946 = vmatpush1.bf16.msra.mxu1 %v11595_v3  ;;  %v11673_v3 = vld [vmem:[%s16106_s1 + $0xd80] ss:$8 sps:$4 sm:$0xff]  }
 0x330   :  { %8684 = vmatpush1.bf16.msra.mxu0 %v11598_v10  ;;  %7947 = vmatprep.subr.bf16.mxu1 %v11603_v30  ;;  %v11676_v10 = vld [vmem:[%s16106_s1 + $0x1f80] ss:$8 sps:$4 sm:$0xff]   ;;  %v11681_v30 = vld [vmem:[%s16106_s1 + $0xd94] ss:$8 sps:$4 sm:$0xff]  }
 0x331   :  { %8685 = vmatprep.subr.bf16.mxu0 %v11606_v44  ;;  %v11684_v44 = vld [vmem:[%s16106_s1 + $0x1f94] ss:$8 sps:$4 sm:$0xff]  }
 0x333   :  { %7948 = vmatpush1.bf16.msra.mxu1 %v11601_v32  ;;  %v11679_v32 = vld [vmem:[%s16106_s1 + $0xd90] ss:$8 sps:$4 sm:$0xff]  }
 0x334   :  { %8686 = vmatpush1.bf16.msra.mxu0 %v11604_v33  ;;  %7949 = vmatprep.subr.bf16.mxu1 %v11609_v34  ;;  %v11682_v33 = vld [vmem:[%s16106_s1 + $0x1f90] ss:$8 sps:$4 sm:$0xff]   ;;  %v11687_v34 = vld [vmem:[%s16106_s1 + $0xda4] ss:$8 sps:$4 sm:$0xff]  }
 0x335   :  { %8687 = vmatprep.subr.bf16.mxu0 %v11612_v14  ;;  %v11690_v14 = vld [vmem:[%s16106_s1 + $0x1fa4] ss:$8 sps:$4 sm:$0xff]  }
 0x337   :  { %7950 = vmatpush1.bf16.msra.mxu1 %v11607_v39  ;;  %v11685_v39 = vld [vmem:[%s16106_s1 + $0xda0] ss:$8 sps:$4 sm:$0xff]  }
 0x338   :  { %8688 = vmatpush1.bf16.msra.mxu0 %v11610_v35  ;;  %7951 = vmatprep.subr.bf16.mxu1 %v11615_v42  ;;  %v11688_v35 = vld [vmem:[%s16106_s1 + $0x1fa0] ss:$8 sps:$4 sm:$0xff]   ;;  %v11693_v42 = vld [vmem:[%s16106_s1 + $0xdb4] ss:$8 sps:$4 sm:$0xff]  }
 0x339   :  { %8689 = vmatprep.subr.bf16.mxu0 %v11618_v57  ;;  %v11696_v57 = vld [vmem:[%s16106_s1 + $0x1fb4] ss:$8 sps:$4 sm:$0xff]  }
 0x33b   :  { %7952 = vmatpush1.bf16.msra.mxu1 %v11613_v47  ;;  %v11699_v47 = vld [vmem:[%s16106_s1 + $0xdc4] ss:$8 sps:$4 sm:$0xff]  }
 0x33c   :  { %8690 = vmatpush1.bf16.msra.mxu0 %v11616_v36  ;;  %7953 = vmatprep.subr.bf16.mxu1 %v11621_v21  ;;  %v11702_v36 = vld [vmem:[%s16106_s1 + $0x1fc4] ss:$8 sps:$4 sm:$0xff]   ;;  %v11697_v21 = vld [vmem:[%s16106_s1 + $0xdc0] ss:$8 sps:$4 sm:$0xff]  }
 0x33d   :  { %8691 = vmatprep.subr.bf16.mxu0 %v11624_v28  ;;  %v11700_v28 = vld [vmem:[%s16106_s1 + $0x1fc0] ss:$8 sps:$4 sm:$0xff]  }
 0x33f   :  { %7954 = vmatpush1.bf16.msra.mxu1 %v11619_v52  ;;  %v11705_v52 = vld [vmem:[%s16106_s1 + $0xdd4] ss:$8 sps:$4 sm:$0xff]  }
 0x340   :  { %8692 = vmatpush1.bf16.msra.mxu0 %v11622_v53  ;;  %7964 = vmatprep.subr.bf16.mxu1 %v11627_v54  ;;  %v11708_v53 = vld [vmem:[%s16106_s1 + $0x1fd4] ss:$8 sps:$4 sm:$0xff]   ;;  %v11703_v54 = vld [vmem:[%s16106_s1 + $0xdd0] ss:$8 sps:$4 sm:$0xff]  }
 0x341   :  { %8702 = vmatprep.subr.bf16.mxu0 %v11630_v55  ;;  %v11706_v55 = vld [vmem:[%s16106_s1 + $0x1fd0] ss:$8 sps:$4 sm:$0xff]  }
 0x342   :  { %7956 = vmatmul.mubr.bf16.vlgmr.msra.gmra.mrb[0].mxu1 %v459_v58  ;;  %v15135_v58 = vld [vmem:[%s16105_s0 + $0x38] sm:$0xff] }
 0x343   :  { %8694 = vmatmul.mubr.bf16.vlgmr.msra.gmra.mrb[0].mxu0 %v495_v11  ;;  %7965 = vmatpush1.bf16.msra.mxu1 %v11625_v29  ;;  %v15140_v11 = vld [vmem:[%s16105_s0 + $0x80] sm:$0xff] }
 0x344   :  { %8703 = vmatpush1.bf16.msra.mxu0 %v11628_v37  ;;  %7966 = vmatprep.subr.bf16.mxu1 %v11633_v60  ;;  %v11709_v29 = vld [vmem:[%s16106_s1 + $0xde0] ss:$8 sps:$4 sm:$0xff]   ;;  %v11717_v60 = vld [vmem:[%s16106_s1 + $0xdf4] ss:$8 sps:$4 sm:$0xff]  }
 0x345   :  { %8704 = vmatprep.subr.bf16.mxu0 %v11636_v5  ;;  %7996 = vmatprep.mubr.bf16.mxu1 %v462_v31  ;;  %v11712_v37 = vld [vmem:[%s16106_s1 + $0x1fe0] ss:$8 sps:$4 sm:$0xff]   ;;  %v11720_v5 = vld [vmem:[%s16106_s1 + $0x1ff4] ss:$8 sps:$4 sm:$0xff]   ;;  %v15156_v31 = vrot.slane %v15135_v58, %v12304_v49 }
 0x346   :  { %8734 = vmatprep.mubr.bf16.mxu0 %v498_v61  ;;  %v15160_v61 = vrot.slane %v15140_v11, %v12304_v49 }
 0x347   :  { %7967 = vmatpush1.bf16.msra.mxu1 %v11631_v62  ;;  %v11715_v62 = vld [vmem:[%s16106_s1 + $0xdf0] ss:$8 sps:$4 sm:$0xff]  }
 0x348   :  { %8705 = vmatpush1.bf16.msra.mxu0 %v11634_v63  ;;  %7968 = vmatprep.subr.bf16.mxu1 %v11639_v0  ;;  %v11718_v63 = vld [vmem:[%s16106_s1 + $0x1ff0] ss:$8 sps:$4 sm:$0xff]   ;;  %v11724_v0 = vld [vmem:[%s16106_s1 + $0xe04] ss:$8 sps:$4 sm:$0xff]  }
 0x349   :  { %8706 = vmatprep.subr.bf16.mxu0 %v11642_v1  ;;  %v11728_v1 = vld [vmem:[%s16106_s1 + $0x2004] ss:$8 sps:$4 sm:$0xff]  }
 0x34b   :  { %7969 = vmatpush1.bf16.msra.mxu1 %v11637_v41  ;;  %v191_v41 = vcombine.high %v15156_v31, %v15156_v31 }
 0x34c   :  { %8707 = vmatpush1.bf16.msra.mxu0 %v11640_v50  ;;  %7970 = vmatprep.subr.bf16.mxu1 %v11645_v4  ;;  %v344_v50 = vcombine.high %v15160_v61, %v15160_v61  ;;  %v461_v4 = vpack.c.bf16 %v14939_v51, %v14939_v51  ;;  %v11734_v51 = vld [vmem:[%s16106_s1 + $0x2014] ss:$8 sps:$4 sm:$0xff]  }
 0x34d   :  { %8708 = vmatprep.subr.bf16.mxu0 %v11648_v17  ;;  %v497_v17 = vpack.c.bf16 %v14942_v48, %v14942_v48  ;;  %v464_v48 = vpack.c.bf16 %v191_v41, %v191_v41  ;;  %v11801_v41 = vld [vmem:[%s16106_s1 + $0xed0] ss:$8 sps:$4 sm:$0xff]  }
 0x34f   :  { %7971 = vmatpush1.bf16.msra.mxu1 %v11643_v6  ;;  %v11722_v6 = vld [vmem:[%s16106_s1 + $0xe00] ss:$8 sps:$4 sm:$0xff]  }
 0x350   :  { %8709 = vmatpush1.bf16.msra.mxu0 %v11646_v7  ;;  %7972 = vmatprep.subr.bf16.mxu1 %v11651_v8  ;;  %v11726_v7 = vld [vmem:[%s16106_s1 + $0x2000] ss:$8 sps:$4 sm:$0xff]   ;;  %v11731_v8 = vld [vmem:[%s16106_s1 + $0xe14] ss:$8 sps:$4 sm:$0xff]  }
 0x351   :  { %8710 = vmatprep.subr.bf16.mxu0 %v11654_v9  ;;  %v500_v9 = vpack.c.bf16 %v344_v50, %v344_v50  ;;  %v11804_v50 = vld [vmem:[%s16106_s1 + $0x20d0] ss:$8 sps:$4 sm:$0xff]  }
 0x353   :  { %7973 = vmatpush1.bf16.msra.mxu1 %v11649_v12  ;;  %v11729_v12 = vld [vmem:[%s16106_s1 + $0xe10] ss:$8 sps:$4 sm:$0xff]  }
 0x354   :  { %8711 = vmatpush1.bf16.msra.mxu0 %v11652_v13  ;;  %7974 = vmatprep.subr.bf16.mxu1 %v11657_v16  ;;  %v11732_v13 = vld [vmem:[%s16106_s1 + $0x2010] ss:$8 sps:$4 sm:$0xff]   ;;  %v11737_v16 = vld [vmem:[%s16106_s1 + $0xe24] ss:$8 sps:$4 sm:$0xff]  }
 0x355   :  { %8712 = vmatprep.subr.bf16.mxu0 %v11660_v56  ;;  %v11740_v56 = vld [vmem:[%s16106_s1 + $0x2024] ss:$8 sps:$4 sm:$0xff]  }
 0x357   :  { %7975 = vmatpush1.bf16.msra.mxu1 %v11655_v18  ;;  %v11735_v18 = vld [vmem:[%s16106_s1 + $0xe20] ss:$8 sps:$4 sm:$0xff]  }
 0x358   :  { %8713 = vmatpush1.bf16.msra.mxu0 %v11658_v19  ;;  %7976 = vmatprep.subr.bf16.mxu1 %v11663_v20  ;;  %v11738_v19 = vld [vmem:[%s16106_s1 + $0x2020] ss:$8 sps:$4 sm:$0xff]   ;;  %v11743_v20 = vld [vmem:[%s16106_s1 + $0xe34] ss:$8 sps:$4 sm:$0xff]  }
 0x359   :  { %8714 = vmatprep.subr.bf16.mxu0 %v11666_v38  ;;  %v11746_v38 = vld [vmem:[%s16106_s1 + $0x2034] ss:$8 sps:$4 sm:$0xff]  }
 0x35b   :  { %7977 = vmatpush1.bf16.msra.mxu1 %v11661_v59  ;;  %v11741_v59 = vld [vmem:[%s16106_s1 + $0xe30] ss:$8 sps:$4 sm:$0xff]  }
 0x35c   :  { %8715 = vmatpush1.bf16.msra.mxu0 %v11664_v2  ;;  %7978 = vmatprep.subr.bf16.mxu1 %v11669_v22  ;;  %v11744_v2 = vld [vmem:[%s16106_s1 + $0x2030] ss:$8 sps:$4 sm:$0xff]   ;;  %v11749_v22 = vld [vmem:[%s16106_s1 + $0xe44] ss:$8 sps:$4 sm:$0xff]  }
 0x35d   :  { %8716 = vmatprep.subr.bf16.mxu0 %v11672_v23  ;;  %v11752_v23 = vld [vmem:[%s16106_s1 + $0x2044] ss:$8 sps:$4 sm:$0xff]  }
 0x35f   :  { %7979 = vmatpush1.bf16.msra.mxu1 %v11667_v24  ;;  %v11747_v24 = vld [vmem:[%s16106_s1 + $0xe40] ss:$8 sps:$4 sm:$0xff]  }
 0x360   :  { %8717 = vmatpush1.bf16.msra.mxu0 %v11670_v25  ;;  %7980 = vmatprep.subr.bf16.mxu1 %v11675_v26  ;;  %v11750_v25 = vld [vmem:[%s16106_s1 + $0x2040] ss:$8 sps:$4 sm:$0xff]   ;;  %v11755_v26 = vld [vmem:[%s16106_s1 + $0xe54] ss:$8 sps:$4 sm:$0xff]  }
 0x361   :  { %8718 = vmatprep.subr.bf16.mxu0 %v11678_v27  ;;  %v11758_v27 = vld [vmem:[%s16106_s1 + $0x2054] ss:$8 sps:$4 sm:$0xff]  }
 0x363   :  { %7981 = vmatpush1.bf16.msra.mxu1 %v11673_v3  ;;  %v11753_v3 = vld [vmem:[%s16106_s1 + $0xe50] ss:$8 sps:$4 sm:$0xff]  }
 0x364   :  { %8719 = vmatpush1.bf16.msra.mxu0 %v11676_v10  ;;  %7982 = vmatprep.subr.bf16.mxu1 %v11681_v30  ;;  %v11756_v10 = vld [vmem:[%s16106_s1 + $0x2050] ss:$8 sps:$4 sm:$0xff]   ;;  %v11761_v30 = vld [vmem:[%s16106_s1 + $0xe64] ss:$8 sps:$4 sm:$0xff]  }
 0x365   :  { %8720 = vmatprep.subr.bf16.mxu0 %v11684_v44  ;;  %v11764_v44 = vld [vmem:[%s16106_s1 + $0x2064] ss:$8 sps:$4 sm:$0xff]  }
 0x367   :  { %7983 = vmatpush1.bf16.msra.mxu1 %v11679_v32  ;;  %v11759_v32 = vld [vmem:[%s16106_s1 + $0xe60] ss:$8 sps:$4 sm:$0xff]  }
 0x368   :  { %8721 = vmatpush1.bf16.msra.mxu0 %v11682_v33  ;;  %7984 = vmatprep.subr.bf16.mxu1 %v11687_v34  ;;  %v11762_v33 = vld [vmem:[%s16106_s1 + $0x2060] ss:$8 sps:$4 sm:$0xff]   ;;  %v11767_v34 = vld [vmem:[%s16106_s1 + $0xe74] ss:$8 sps:$4 sm:$0xff]  }
 0x369   :  { %8722 = vmatprep.subr.bf16.mxu0 %v11690_v14  ;;  %v11770_v14 = vld [vmem:[%s16106_s1 + $0x2074] ss:$8 sps:$4 sm:$0xff]  }
 0x36b   :  { %7985 = vmatpush1.bf16.msra.mxu1 %v11685_v39  ;;  %v11765_v39 = vld [vmem:[%s16106_s1 + $0xe70] ss:$8 sps:$4 sm:$0xff]  }
 0x36c   :  { %8723 = vmatpush1.bf16.msra.mxu0 %v11688_v35  ;;  %7986 = vmatprep.subr.bf16.mxu1 %v11693_v42  ;;  %v11768_v35 = vld [vmem:[%s16106_s1 + $0x2070] ss:$8 sps:$4 sm:$0xff]   ;;  %v11773_v42 = vld [vmem:[%s16106_s1 + $0xe84] ss:$8 sps:$4 sm:$0xff]  }
 0x36d   :  { %8724 = vmatprep.subr.bf16.mxu0 %v11696_v57  ;;  %v11776_v57 = vld [vmem:[%s16106_s1 + $0x2084] ss:$8 sps:$4 sm:$0xff]  }
 0x36f   :  { %7987 = vmatpush1.bf16.msra.mxu1 %v11691_v45  ;;  %v11771_v45 = vld [vmem:[%s16106_s1 + $0xe80] ss:$8 sps:$4 sm:$0xff]  }
 0x370   :  { %8725 = vmatpush1.bf16.msra.mxu0 %v11694_v46  ;;  %7988 = vmatprep.subr.bf16.mxu1 %v11699_v47  ;;  %v11774_v46 = vld [vmem:[%s16106_s1 + $0x2080] ss:$8 sps:$4 sm:$0xff]   ;;  %v11779_v47 = vld [vmem:[%s16106_s1 + $0xe94] ss:$8 sps:$4 sm:$0xff]  }
 0x371   :  { %8726 = vmatprep.subr.bf16.mxu0 %v11702_v36  ;;  %v11782_v36 = vld [vmem:[%s16106_s1 + $0x2094] ss:$8 sps:$4 sm:$0xff]  }
 0x373   :  { %7989 = vmatpush1.bf16.msra.mxu1 %v11697_v21  ;;  %v11777_v21 = vld [vmem:[%s16106_s1 + $0xe90] ss:$8 sps:$4 sm:$0xff]  }
 0x374   :  { %8727 = vmatpush1.bf16.msra.mxu0 %v11700_v28  ;;  %7990 = vmatprep.subr.bf16.mxu1 %v11705_v52  ;;  %v11780_v28 = vld [vmem:[%s16106_s1 + $0x2090] ss:$8 sps:$4 sm:$0xff]   ;;  %v11785_v52 = vld [vmem:[%s16106_s1 + $0xea4] ss:$8 sps:$4 sm:$0xff]  }
 0x375   :  { %8728 = vmatprep.subr.bf16.mxu0 %v11708_v53  ;;  %v11788_v53 = vld [vmem:[%s16106_s1 + $0x20a4] ss:$8 sps:$4 sm:$0xff]  }
 0x377   :  { %7991 = vmatpush1.bf16.msra.mxu1 %v11703_v54  ;;  %v11783_v54 = vld [vmem:[%s16106_s1 + $0xea0] ss:$8 sps:$4 sm:$0xff]  }
 0x378   :  { %8729 = vmatpush1.bf16.msra.mxu0 %v11706_v55  ;;  %7992 = vmatprep.subr.bf16.mxu1 %v11711_v15  ;;  %v11786_v55 = vld [vmem:[%s16106_s1 + $0x20a0] ss:$8 sps:$4 sm:$0xff]   ;;  %v11791_v15 = vld [vmem:[%s16106_s1 + $0xeb4] ss:$8 sps:$4 sm:$0xff]  }
 0x379   :  { %8730 = vmatprep.subr.bf16.mxu0 %v11714_v40  ;;  %v11794_v40 = vld [vmem:[%s16106_s1 + $0x20b4] ss:$8 sps:$4 sm:$0xff]  }
 0x37b   :  { %7993 = vmatpush1.bf16.msra.mxu1 %v11709_v29  ;;  %v11789_v29 = vld [vmem:[%s16106_s1 + $0xeb0] ss:$8 sps:$4 sm:$0xff]  }
 0x37c   :  { %8731 = vmatpush1.bf16.msra.mxu0 %v11712_v37  ;;  %7994 = vmatprep.subr.bf16.mxu1 %v11717_v60  ;;  %v11792_v37 = vld [vmem:[%s16106_s1 + $0x20b0] ss:$8 sps:$4 sm:$0xff]   ;;  %v11797_v60 = vld [vmem:[%s16106_s1 + $0xec4] ss:$8 sps:$4 sm:$0xff]  }
 0x37d   :  { %8732 = vmatprep.subr.bf16.mxu0 %v11720_v5  ;;  %v11800_v5 = vld [vmem:[%s16106_s1 + $0x20c4] ss:$8 sps:$4 sm:$0xff]  }
 0x37f   :  { %7995 = vmatpush1.bf16.msra.mxu1 %v11715_v62  ;;  %v11795_v62 = vld [vmem:[%s16106_s1 + $0xec0] ss:$8 sps:$4 sm:$0xff]  }
 0x380   :  { %8733 = vmatpush1.bf16.msra.mxu0 %v11718_v63  ;;  %8005 = vmatprep.subr.bf16.mxu1 %v11724_v0  ;;  %v11798_v63 = vld [vmem:[%s16106_s1 + $0x20c0] ss:$8 sps:$4 sm:$0xff]   ;;  %v11803_v0 = vld [vmem:[%s16106_s1 + $0xed4] ss:$8 sps:$4 sm:$0xff]  }
 0x381   :  { %8743 = vmatprep.subr.bf16.mxu0 %v11728_v1  ;;  %v11806_v1 = vld [vmem:[%s16106_s1 + $0x20d4] ss:$8 sps:$4 sm:$0xff]  }
 0x382   :  { %7997 = vmatmul.mubr.bf16.vlgmr.msra.gmra.mrb[0].mxu1 %v461_v4  ;;  %v11809_v4 = vld [vmem:[%s16106_s1 + $0xee4] ss:$8 sps:$4 sm:$0xff]  }
 0x383   :  { %8735 = vmatmul.mubr.bf16.vlgmr.msra.gmra.mrb[0].mxu0 %v497_v17  ;;  %8006 = vmatpush1.bf16.msra.mxu1 %v11722_v6  ;;  %v11812_v17 = vld [vmem:[%s16106_s1 + $0x20e4] ss:$8 sps:$4 sm:$0xff]   ;;  %v176_v6 = vcombine.high %v15135_v58, %v15135_v58  ;;  %v11818_v58 = vld [vmem:[%s16106_s1 + $0x20f4] ss:$8 sps:$4 sm:$0xff]  }
 0x384   :  { %8744 = vmatpush1.bf16.msra.mxu0 %v11726_v7  ;;  %8007 = vmatprep.subr.bf16.mxu1 %v11731_v8  ;;  %v329_v7 = vcombine.high %v15140_v11, %v15140_v11  ;;  %v11807_v8 = vld [vmem:[%s16106_s1 + $0xee0] ss:$8 sps:$4 sm:$0xff]  }
 0x385   :  { %8745 = vmatprep.subr.bf16.mxu0 %v11734_v51  ;;  %8037 = vmatprep.mubr.bf16.mxu1 %v464_v48  ;;  %v11810_v51 = vld [vmem:[%s16106_s1 + $0x20e0] ss:$8 sps:$4 sm:$0xff]   ;;  %v11815_v48 = vld [vmem:[%s16106_s1 + $0xef4] ss:$8 sps:$4 sm:$0xff]   ;;  %v15367_v11 = vrot.slane %v176_v6, %v12304_v49  ;;  %v11885_v6 = vld [vmem:[%s16106_s1 + $0xfb0] ss:$8 sps:$4 sm:$0xff]  }
 0x386   :  { %8775 = vmatprep.mubr.bf16.mxu0 %v500_v9  ;;  %v15370_v9 = vrot.slane %v329_v7, %v12304_v49  ;;  %v11888_v7 = vld [vmem:[%s16106_s1 + $0x21b0] ss:$8 sps:$4 sm:$0xff]  }
 0x387   :  { %8008 = vmatpush1.bf16.msra.mxu1 %v11729_v12  ;;  %v11813_v12 = vld [vmem:[%s16106_s1 + $0xef0] ss:$8 sps:$4 sm:$0xff]  }
 0x388   :  { %8746 = vmatpush1.bf16.msra.mxu0 %v11732_v13  ;;  %8009 = vmatprep.subr.bf16.mxu1 %v11737_v16  ;;  %v11816_v13 = vld [vmem:[%s16106_s1 + $0x20f0] ss:$8 sps:$4 sm:$0xff]   ;;  %v11821_v16 = vld [vmem:[%s16106_s1 + $0xf04] ss:$8 sps:$4 sm:$0xff]  }
 0x389   :  { %8747 = vmatprep.subr.bf16.mxu0 %v11740_v56  ;;  %v11824_v56 = vld [vmem:[%s16106_s1 + $0x2104] ss:$8 sps:$4 sm:$0xff]  }
 0x38b   :  { %8010 = vmatpush1.bf16.msra.mxu1 %v11735_v18  ;;  %v192_v18 = vcombine.high %v15367_v11, %v15367_v11 }
 0x38c   :  { %8748 = vmatpush1.bf16.msra.mxu0 %v11738_v19  ;;  %8011 = vmatprep.subr.bf16.mxu1 %v11743_v20  ;;  %v345_v19 = vcombine.high %v15370_v9, %v15370_v9  ;;  %v463_v20 = vpack.c.bf16 %v15156_v31, %v15156_v31  ;;  %v11830_v31 = vld [vmem:[%s16106_s1 + $0x2114] ss:$8 sps:$4 sm:$0xff]  }
 0x38d   :  { %8749 = vmatprep.subr.bf16.mxu0 %v11746_v38  ;;  %v499_v38 = vpack.c.bf16 %v15160_v61, %v15160_v61  ;;  %v466_v61 = vpack.c.bf16 %v192_v18, %v192_v18  ;;  %v11905_v18 = vld [vmem:[%s16106_s1 + $0xfe4] ss:$8 sps:$4 sm:$0xff]  }
 0x38f   :  { %8012 = vmatpush1.bf16.msra.mxu1 %v11741_v59  ;;  %v11819_v59 = vld [vmem:[%s16106_s1 + $0xf00] ss:$8 sps:$4 sm:$0xff]  }
 0x390   :  { %8750 = vmatpush1.bf16.msra.mxu0 %v11744_v2  ;;  %8013 = vmatprep.subr.bf16.mxu1 %v11749_v22  ;;  %v11822_v2 = vld [vmem:[%s16106_s1 + $0x2100] ss:$8 sps:$4 sm:$0xff]   ;;  %v11827_v22 = vld [vmem:[%s16106_s1 + $0xf14] ss:$8 sps:$4 sm:$0xff]  }
 0x391   :  { %8751 = vmatprep.subr.bf16.mxu0 %v11752_v23  ;;  %v502_v23 = vpack.c.bf16 %v345_v19, %v345_v19  ;;  %v11908_v19 = vld [vmem:[%s16106_s1 + $0x21e4] ss:$8 sps:$4 sm:$0xff]  }
 0x393   :  { %8014 = vmatpush1.bf16.msra.mxu1 %v11747_v24  ;;  %v11825_v24 = vld [vmem:[%s16106_s1 + $0xf10] ss:$8 sps:$4 sm:$0xff]  }
 0x394   :  { %8752 = vmatpush1.bf16.msra.mxu0 %v11750_v25  ;;  %8015 = vmatprep.subr.bf16.mxu1 %v11755_v26  ;;  %v11828_v25 = vld [vmem:[%s16106_s1 + $0x2110] ss:$8 sps:$4 sm:$0xff]   ;;  %v11833_v26 = vld [vmem:[%s16106_s1 + $0xf24] ss:$8 sps:$4 sm:$0xff]  }
 0x395   :  { %8753 = vmatprep.subr.bf16.mxu0 %v11758_v27  ;;  %v11836_v27 = vld [vmem:[%s16106_s1 + $0x2124] ss:$8 sps:$4 sm:$0xff]  }
 0x397   :  { %8016 = vmatpush1.bf16.msra.mxu1 %v11753_v3  ;;  %v11831_v3 = vld [vmem:[%s16106_s1 + $0xf20] ss:$8 sps:$4 sm:$0xff]  }
 0x398   :  { %8754 = vmatpush1.bf16.msra.mxu0 %v11756_v10  ;;  %8017 = vmatprep.subr.bf16.mxu1 %v11761_v30  ;;  %v11834_v10 = vld [vmem:[%s16106_s1 + $0x2120] ss:$8 sps:$4 sm:$0xff]   ;;  %v11839_v30 = vld [vmem:[%s16106_s1 + $0xf34] ss:$8 sps:$4 sm:$0xff]  }
 0x399   :  { %8755 = vmatprep.subr.bf16.mxu0 %v11764_v44  ;;  %v11842_v44 = vld [vmem:[%s16106_s1 + $0x2134] ss:$8 sps:$4 sm:$0xff]  }
 0x39b   :  { %8018 = vmatpush1.bf16.msra.mxu1 %v11759_v32  ;;  %v11837_v32 = vld [vmem:[%s16106_s1 + $0xf30] ss:$8 sps:$4 sm:$0xff]  }
 0x39c   :  { %8756 = vmatpush1.bf16.msra.mxu0 %v11762_v33  ;;  %8019 = vmatprep.subr.bf16.mxu1 %v11767_v34  ;;  %v11840_v33 = vld [vmem:[%s16106_s1 + $0x2130] ss:$8 sps:$4 sm:$0xff]   ;;  %v11845_v34 = vld [vmem:[%s16106_s1 + $0xf44] ss:$8 sps:$4 sm:$0xff]  }
 0x39d   :  { %8757 = vmatprep.subr.bf16.mxu0 %v11770_v14  ;;  %v11848_v14 = vld [vmem:[%s16106_s1 + $0x2144] ss:$8 sps:$4 sm:$0xff]  }
 0x39f   :  { %8020 = vmatpush1.bf16.msra.mxu1 %v11765_v39  ;;  %v11843_v39 = vld [vmem:[%s16106_s1 + $0xf40] ss:$8 sps:$4 sm:$0xff]  }
 0x3a0   :  { %8758 = vmatpush1.bf16.msra.mxu0 %v11768_v35  ;;  %8021 = vmatprep.subr.bf16.mxu1 %v11773_v42  ;;  %v11846_v35 = vld [vmem:[%s16106_s1 + $0x2140] ss:$8 sps:$4 sm:$0xff]   ;;  %v11851_v42 = vld [vmem:[%s16106_s1 + $0xf54] ss:$8 sps:$4 sm:$0xff]  }
 0x3a1   :  { %8759 = vmatprep.subr.bf16.mxu0 %v11776_v57  ;;  %v11854_v57 = vld [vmem:[%s16106_s1 + $0x2154] ss:$8 sps:$4 sm:$0xff]  }
 0x3a3   :  { %8022 = vmatpush1.bf16.msra.mxu1 %v11771_v45  ;;  %v11849_v45 = vld [vmem:[%s16106_s1 + $0xf50] ss:$8 sps:$4 sm:$0xff]  }
 0x3a4   :  { %8760 = vmatpush1.bf16.msra.mxu0 %v11774_v46  ;;  %8023 = vmatprep.subr.bf16.mxu1 %v11779_v47  ;;  %v11852_v46 = vld [vmem:[%s16106_s1 + $0x2150] ss:$8 sps:$4 sm:$0xff]   ;;  %v11857_v47 = vld [vmem:[%s16106_s1 + $0xf64] ss:$8 sps:$4 sm:$0xff]  }
 0x3a5   :  { %8761 = vmatprep.subr.bf16.mxu0 %v11782_v36  ;;  %v11860_v36 = vld [vmem:[%s16106_s1 + $0x2164] ss:$8 sps:$4 sm:$0xff]  }
 0x3a7   :  { %8024 = vmatpush1.bf16.msra.mxu1 %v11777_v21  ;;  %v11855_v21 = vld [vmem:[%s16106_s1 + $0xf60] ss:$8 sps:$4 sm:$0xff]  }
 0x3a8   :  { %8762 = vmatpush1.bf16.msra.mxu0 %v11780_v28  ;;  %8025 = vmatprep.subr.bf16.mxu1 %v11785_v52  ;;  %v11858_v28 = vld [vmem:[%s16106_s1 + $0x2160] ss:$8 sps:$4 sm:$0xff]   ;;  %v11863_v52 = vld [vmem:[%s16106_s1 + $0xf74] ss:$8 sps:$4 sm:$0xff]  }
 0x3a9   :  { %8763 = vmatprep.subr.bf16.mxu0 %v11788_v53  ;;  %v11866_v53 = vld [vmem:[%s16106_s1 + $0x2174] ss:$8 sps:$4 sm:$0xff]  }
 0x3ab   :  { %8026 = vmatpush1.bf16.msra.mxu1 %v11783_v54  ;;  %v11861_v54 = vld [vmem:[%s16106_s1 + $0xf70] ss:$8 sps:$4 sm:$0xff]  }
 0x3ac   :  { %8764 = vmatpush1.bf16.msra.mxu0 %v11786_v55  ;;  %8027 = vmatprep.subr.bf16.mxu1 %v11791_v15  ;;  %v11864_v55 = vld [vmem:[%s16106_s1 + $0x2170] ss:$8 sps:$4 sm:$0xff]   ;;  %v11869_v15 = vld [vmem:[%s16106_s1 + $0xf84] ss:$8 sps:$4 sm:$0xff]  }
 0x3ad   :  { %8765 = vmatprep.subr.bf16.mxu0 %v11794_v40  ;;  %v11872_v40 = vld [vmem:[%s16106_s1 + $0x2184] ss:$8 sps:$4 sm:$0xff]  }
 0x3af   :  { %8028 = vmatpush1.bf16.msra.mxu1 %v11789_v29  ;;  %v11867_v29 = vld [vmem:[%s16106_s1 + $0xf80] ss:$8 sps:$4 sm:$0xff]  }
 0x3b0   :  { %8766 = vmatpush1.bf16.msra.mxu0 %v11792_v37  ;;  %8029 = vmatprep.subr.bf16.mxu1 %v11797_v60  ;;  %v11870_v37 = vld [vmem:[%s16106_s1 + $0x2180] ss:$8 sps:$4 sm:$0xff]   ;;  %v11875_v60 = vld [vmem:[%s16106_s1 + $0xf94] ss:$8 sps:$4 sm:$0xff]  }
 0x3b1   :  { %8767 = vmatprep.subr.bf16.mxu0 %v11800_v5  ;;  %v11878_v5 = vld [vmem:[%s16106_s1 + $0x2194] ss:$8 sps:$4 sm:$0xff]  }
 0x3b3   :  { %8030 = vmatpush1.bf16.msra.mxu1 %v11795_v62  ;;  %v11873_v62 = vld [vmem:[%s16106_s1 + $0xf90] ss:$8 sps:$4 sm:$0xff]  }
 0x3b4   :  { %8768 = vmatpush1.bf16.msra.mxu0 %v11798_v63  ;;  %8031 = vmatprep.subr.bf16.mxu1 %v11803_v0  ;;  %v11876_v63 = vld [vmem:[%s16106_s1 + $0x2190] ss:$8 sps:$4 sm:$0xff]   ;;  %v11881_v0 = vld [vmem:[%s16106_s1 + $0xfa4] ss:$8 sps:$4 sm:$0xff]  }
 0x3b5   :  { %8769 = vmatprep.subr.bf16.mxu0 %v11806_v1  ;;  %v11884_v1 = vld [vmem:[%s16106_s1 + $0x21a4] ss:$8 sps:$4 sm:$0xff]  }
 0x3b7   :  { %8032 = vmatpush1.bf16.msra.mxu1 %v11801_v41  ;;  %v11879_v41 = vld [vmem:[%s16106_s1 + $0xfa0] ss:$8 sps:$4 sm:$0xff]  }
 0x3b8   :  { %8770 = vmatpush1.bf16.msra.mxu0 %v11804_v50  ;;  %8033 = vmatprep.subr.bf16.mxu1 %v11809_v4  ;;  %v11882_v50 = vld [vmem:[%s16106_s1 + $0x21a0] ss:$8 sps:$4 sm:$0xff]   ;;  %v11887_v4 = vld [vmem:[%s16106_s1 + $0xfb4] ss:$8 sps:$4 sm:$0xff]  }
 0x3b9   :  { %8771 = vmatprep.subr.bf16.mxu0 %v11812_v17  ;;  %v11890_v17 = vld [vmem:[%s16106_s1 + $0x21b4] ss:$8 sps:$4 sm:$0xff]  }
 0x3bb   :  { %8034 = vmatpush1.bf16.msra.mxu1 %v11807_v8  ;;  %v11893_v8 = vld [vmem:[%s16106_s1 + $0xfc4] ss:$8 sps:$4 sm:$0xff]  }
 0x3bc   :  { %8772 = vmatpush1.bf16.msra.mxu0 %v11810_v51  ;;  %8035 = vmatprep.subr.bf16.mxu1 %v11815_v48  ;;  %v11896_v51 = vld [vmem:[%s16106_s1 + $0x21c4] ss:$8 sps:$4 sm:$0xff]   ;;  %v11891_v48 = vld [vmem:[%s16106_s1 + $0xfc0] ss:$8 sps:$4 sm:$0xff]  }
 0x3bd   :  { %8773 = vmatprep.subr.bf16.mxu0 %v11818_v58  ;;  %v11894_v58 = vld [vmem:[%s16106_s1 + $0x21c0] ss:$8 sps:$4 sm:$0xff]  }
 0x3bf   :  { %8036 = vmatpush1.bf16.msra.mxu1 %v11813_v12  ;;  %v11899_v12 = vld [vmem:[%s16106_s1 + $0xfd4] ss:$8 sps:$4 sm:$0xff]  }
 0x3c0   :  { %8774 = vmatpush1.bf16.msra.mxu0 %v11816_v13  ;;  %8046 = vmatprep.subr.bf16.mxu1 %v11821_v16  ;;  %v11902_v13 = vld [vmem:[%s16106_s1 + $0x21d4] ss:$8 sps:$4 sm:$0xff]   ;;  %v11897_v16 = vld [vmem:[%s16106_s1 + $0xfd0] ss:$8 sps:$4 sm:$0xff]  }
 0x3c1   :  { %8784 = vmatprep.subr.bf16.mxu0 %v11824_v56  ;;  %v11900_v56 = vld [vmem:[%s16106_s1 + $0x21d0] ss:$8 sps:$4 sm:$0xff]  }
 0x3c2   :  { %8038 = vmatmul.mubr.bf16.vlgmr.msra.gmra.mrb[0].mxu1 %v463_v20  ;;  %v15563_v20 = vld [vmem:[%s16105_s0 + $0x40] sm:$0xff] }
 0x3c3   :  { %8776 = vmatmul.mubr.bf16.vlgmr.msra.gmra.mrb[0].mxu0 %v499_v38  ;;  %8047 = vmatpush1.bf16.msra.mxu1 %v11819_v59  ;;  %v15568_v38 = vld [vmem:[%s16105_s0 + $0x88] sm:$0xff]  ;;  %s12111_s0 = scalar_lea.vmem %s9024_s22, 32 }
 0x3c4   :  { %8785 = vmatpush1.bf16.msra.mxu0 %v11822_v2  ;;  %8048 = vmatprep.subr.bf16.mxu1 %v11827_v22  ;;  %v11903_v59 = vld [vmem:[%s16106_s1 + $0xfe0] ss:$8 sps:$4 sm:$0xff]   ;;  %v11911_v22 = vld [vmem:[%s16106_s1 + $0xff4] ss:$8 sps:$4 sm:$0xff]   ;;  %p12112_p0 = scmp.ne.s32.totalorder %s9024_s22, %s12111_s0  ;;  %p12117_p2 = scmp.lt.s32.totalorder %s12111_s0, %s12111_s0 }
 0x3c5   :  { %8786 = vmatprep.subr.bf16.mxu0 %v11830_v31  ;;  %8078 = vmatprep.mubr.bf16.mxu1 %v466_v61  ;;  %v11906_v2 = vld [vmem:[%s16106_s1 + $0x21e0] ss:$8 sps:$4 sm:$0xff]   ;;  %v11914_v31 = vld [vmem:[%s16106_s1 + $0x21f4] ss:$8 sps:$4 sm:$0xff]   ;;  %v15584_v61 = vrot.slane %v15563_v20, %v12304_v49 }
 0x3c6   :  { %8816 = vmatprep.mubr.bf16.mxu0 %v502_v23  ;;  %v15588_v23 = vrot.slane %v15568_v38, %v12304_v49  ;;  %p12118_p3 = por %p12117_p2, %p12116_p1 }
 0x3c7   :  { %8049 = vmatpush1.bf16.msra.mxu1 %v11825_v24  ;;  %v11909_v24 = vld [vmem:[%s16106_s1 + $0xff0] ss:$8 sps:$4 sm:$0xff]  }
 0x3c8   :  { %8787 = vmatpush1.bf16.msra.mxu0 %v11828_v25  ;;  %8050 = vmatprep.subr.bf16.mxu1 %v11833_v26  ;;  %v11912_v25 = vld [vmem:[%s16106_s1 + $0x21f0] ss:$8 sps:$4 sm:$0xff]   ;;  %v11918_v26 = vld [vmem:[%s16106_s1 + $0x1004] ss:$8 sps:$4 sm:$0xff]   ;;  %p12119_p4 = pnand %p12118_p3, %p12112_p0 }
 0x3c9   :  { %8788 = vmatprep.subr.bf16.mxu0 %v11836_v27  ;;  %v11922_v27 = vld [vmem:[%s16106_s1 + $0x2204] ss:$8 sps:$4 sm:$0xff]  }
 0x3cb   :  { %8051 = vmatpush1.bf16.msra.mxu1 %v11831_v3  ;;  %v208_v3 = vcombine.high %v15584_v61, %v15584_v61 }
 0x3cc   :  { %8789 = vmatpush1.bf16.msra.mxu0 %v11834_v10  ;;  %8052 = vmatprep.subr.bf16.mxu1 %v11839_v30  ;;  %v361_v10 = vcombine.high %v15588_v23, %v15588_v23  ;;  %v465_v30 = vpack.c.bf16 %v15367_v11, %v15367_v11  ;;  %v11928_v11 = vld [vmem:[%s16106_s1 + $0x2214] ss:$8 sps:$4 sm:$0xff]  }
 0x3cd   :  { %8790 = vmatprep.subr.bf16.mxu0 %v11842_v44  ;;  %v501_v44 = vpack.c.bf16 %v15370_v9, %v15370_v9  ;;  %v468_v9 = vpack.c.bf16 %v208_v3, %v208_v3  ;;  %v11995_v3 = vld [vmem:[%s16106_s1 + $0x10d0] ss:$8 sps:$4 sm:$0xff]  }
 0x3cf   :  { %8053 = vmatpush1.bf16.msra.mxu1 %v11837_v32  ;;  %v11916_v32 = vld [vmem:[%s16106_s1 + $0x1000] ss:$8 sps:$4 sm:$0xff]  }
 0x3d0   :  { %8791 = vmatpush1.bf16.msra.mxu0 %v11840_v33  ;;  %8054 = vmatprep.subr.bf16.mxu1 %v11845_v34  ;;  %v11920_v33 = vld [vmem:[%s16106_s1 + $0x2200] ss:$8 sps:$4 sm:$0xff]   ;;  %v11925_v34 = vld [vmem:[%s16106_s1 + $0x1014] ss:$8 sps:$4 sm:$0xff]  }
 0x3d1   :  { %8792 = vmatprep.subr.bf16.mxu0 %v11848_v14  ;;  %v504_v14 = vpack.c.bf16 %v361_v10, %v361_v10  ;;  %v11998_v10 = vld [vmem:[%s16106_s1 + $0x22d0] ss:$8 sps:$4 sm:$0xff]  }
 0x3d3   :  { %8055 = vmatpush1.bf16.msra.mxu1 %v11843_v39  ;;  %v11923_v39 = vld [vmem:[%s16106_s1 + $0x1010] ss:$8 sps:$4 sm:$0xff]  }
 0x3d4   :  { %8793 = vmatpush1.bf16.msra.mxu0 %v11846_v35  ;;  %8056 = vmatprep.subr.bf16.mxu1 %v11851_v42  ;;  %v11926_v35 = vld [vmem:[%s16106_s1 + $0x2210] ss:$8 sps:$4 sm:$0xff]   ;;  %v11931_v42 = vld [vmem:[%s16106_s1 + $0x1024] ss:$8 sps:$4 sm:$0xff]  }
 0x3d5   :  { %8794 = vmatprep.subr.bf16.mxu0 %v11854_v57  ;;  %v11934_v57 = vld [vmem:[%s16106_s1 + $0x2224] ss:$8 sps:$4 sm:$0xff]  }
 0x3d7   :  { %8057 = vmatpush1.bf16.msra.mxu1 %v11849_v45  ;;  %v11929_v45 = vld [vmem:[%s16106_s1 + $0x1020] ss:$8 sps:$4 sm:$0xff]  }
 0x3d8   :  { %8795 = vmatpush1.bf16.msra.mxu0 %v11852_v46  ;;  %8058 = vmatprep.subr.bf16.mxu1 %v11857_v47  ;;  %v11932_v46 = vld [vmem:[%s16106_s1 + $0x2220] ss:$8 sps:$4 sm:$0xff]   ;;  %v11937_v47 = vld [vmem:[%s16106_s1 + $0x1034] ss:$8 sps:$4 sm:$0xff]  }
 0x3d9   :  { %8796 = vmatprep.subr.bf16.mxu0 %v11860_v36  ;;  %v11940_v36 = vld [vmem:[%s16106_s1 + $0x2234] ss:$8 sps:$4 sm:$0xff]  }
 0x3db   :  { %8059 = vmatpush1.bf16.msra.mxu1 %v11855_v21  ;;  %v11935_v21 = vld [vmem:[%s16106_s1 + $0x1030] ss:$8 sps:$4 sm:$0xff]  }
 0x3dc   :  { %8797 = vmatpush1.bf16.msra.mxu0 %v11858_v28  ;;  %8060 = vmatprep.subr.bf16.mxu1 %v11863_v52  ;;  %v11938_v28 = vld [vmem:[%s16106_s1 + $0x2230] ss:$8 sps:$4 sm:$0xff]   ;;  %v11943_v52 = vld [vmem:[%s16106_s1 + $0x1044] ss:$8 sps:$4 sm:$0xff]  }
 0x3dd   :  { %8798 = vmatprep.subr.bf16.mxu0 %v11866_v53  ;;  %v11946_v53 = vld [vmem:[%s16106_s1 + $0x2244] ss:$8 sps:$4 sm:$0xff]  }
 0x3df   :  { %8061 = vmatpush1.bf16.msra.mxu1 %v11861_v54  ;;  %v11941_v54 = vld [vmem:[%s16106_s1 + $0x1040] ss:$8 sps:$4 sm:$0xff]  }
 0x3e0   :  { %8799 = vmatpush1.bf16.msra.mxu0 %v11864_v55  ;;  %8062 = vmatprep.subr.bf16.mxu1 %v11869_v15  ;;  %v11944_v55 = vld [vmem:[%s16106_s1 + $0x2240] ss:$8 sps:$4 sm:$0xff]   ;;  %v11949_v15 = vld [vmem:[%s16106_s1 + $0x1054] ss:$8 sps:$4 sm:$0xff]  }
 0x3e1   :  { %8800 = vmatprep.subr.bf16.mxu0 %v11872_v40  ;;  %v11952_v40 = vld [vmem:[%s16106_s1 + $0x2254] ss:$8 sps:$4 sm:$0xff]  }
 0x3e3   :  { %8063 = vmatpush1.bf16.msra.mxu1 %v11867_v29  ;;  %v11947_v29 = vld [vmem:[%s16106_s1 + $0x1050] ss:$8 sps:$4 sm:$0xff]  }
 0x3e4   :  { %8801 = vmatpush1.bf16.msra.mxu0 %v11870_v37  ;;  %8064 = vmatprep.subr.bf16.mxu1 %v11875_v60  ;;  %v11950_v37 = vld [vmem:[%s16106_s1 + $0x2250] ss:$8 sps:$4 sm:$0xff]   ;;  %v11955_v60 = vld [vmem:[%s16106_s1 + $0x1064] ss:$8 sps:$4 sm:$0xff]  }
 0x3e5   :  { %8802 = vmatprep.subr.bf16.mxu0 %v11878_v5  ;;  %v11958_v5 = vld [vmem:[%s16106_s1 + $0x2264] ss:$8 sps:$4 sm:$0xff]  }
 0x3e7   :  { %8065 = vmatpush1.bf16.msra.mxu1 %v11873_v62  ;;  %v11953_v62 = vld [vmem:[%s16106_s1 + $0x1060] ss:$8 sps:$4 sm:$0xff]  }
 0x3e8   :  { %8803 = vmatpush1.bf16.msra.mxu0 %v11876_v63  ;;  %8066 = vmatprep.subr.bf16.mxu1 %v11881_v0  ;;  %v11956_v63 = vld [vmem:[%s16106_s1 + $0x2260] ss:$8 sps:$4 sm:$0xff]   ;;  %v11961_v0 = vld [vmem:[%s16106_s1 + $0x1074] ss:$8 sps:$4 sm:$0xff]  }
 0x3e9   :  { %8804 = vmatprep.subr.bf16.mxu0 %v11884_v1  ;;  %v11964_v1 = vld [vmem:[%s16106_s1 + $0x2274] ss:$8 sps:$4 sm:$0xff]  }
 0x3eb   :  { %8067 = vmatpush1.bf16.msra.mxu1 %v11879_v41  ;;  %v11959_v41 = vld [vmem:[%s16106_s1 + $0x1070] ss:$8 sps:$4 sm:$0xff]  }
 0x3ec   :  { %8805 = vmatpush1.bf16.msra.mxu0 %v11882_v50  ;;  %8068 = vmatprep.subr.bf16.mxu1 %v11887_v4  ;;  %v11962_v50 = vld [vmem:[%s16106_s1 + $0x2270] ss:$8 sps:$4 sm:$0xff]   ;;  %v11967_v4 = vld [vmem:[%s16106_s1 + $0x1084] ss:$8 sps:$4 sm:$0xff]  }
 0x3ed   :  { %8806 = vmatprep.subr.bf16.mxu0 %v11890_v17  ;;  %v11970_v17 = vld [vmem:[%s16106_s1 + $0x2284] ss:$8 sps:$4 sm:$0xff]  }
 0x3ef   :  { %8069 = vmatpush1.bf16.msra.mxu1 %v11885_v6  ;;  %v11965_v6 = vld [vmem:[%s16106_s1 + $0x1080] ss:$8 sps:$4 sm:$0xff]  }
 0x3f0   :  { %8807 = vmatpush1.bf16.msra.mxu0 %v11888_v7  ;;  %8070 = vmatprep.subr.bf16.mxu1 %v11893_v8  ;;  %v11968_v7 = vld [vmem:[%s16106_s1 + $0x2280] ss:$8 sps:$4 sm:$0xff]   ;;  %v11973_v8 = vld [vmem:[%s16106_s1 + $0x1094] ss:$8 sps:$4 sm:$0xff]  }
 0x3f1   :  { %8808 = vmatprep.subr.bf16.mxu0 %v11896_v51  ;;  %v11976_v51 = vld [vmem:[%s16106_s1 + $0x2294] ss:$8 sps:$4 sm:$0xff]  }
 0x3f3   :  { %8071 = vmatpush1.bf16.msra.mxu1 %v11891_v48  ;;  %v11971_v48 = vld [vmem:[%s16106_s1 + $0x1090] ss:$8 sps:$4 sm:$0xff]  }
 0x3f4   :  { %8809 = vmatpush1.bf16.msra.mxu0 %v11894_v58  ;;  %8072 = vmatprep.subr.bf16.mxu1 %v11899_v12  ;;  %v11974_v58 = vld [vmem:[%s16106_s1 + $0x2290] ss:$8 sps:$4 sm:$0xff]   ;;  %v11979_v12 = vld [vmem:[%s16106_s1 + $0x10a4] ss:$8 sps:$4 sm:$0xff]  }
 0x3f5   :  { %8810 = vmatprep.subr.bf16.mxu0 %v11902_v13  ;;  %v11982_v13 = vld [vmem:[%s16106_s1 + $0x22a4] ss:$8 sps:$4 sm:$0xff]  }
 0x3f7   :  { %8073 = vmatpush1.bf16.msra.mxu1 %v11897_v16  ;;  %v11977_v16 = vld [vmem:[%s16106_s1 + $0x10a0] ss:$8 sps:$4 sm:$0xff]  }
 0x3f8   :  { %8811 = vmatpush1.bf16.msra.mxu0 %v11900_v56  ;;  %8074 = vmatprep.subr.bf16.mxu1 %v11905_v18  ;;  %v11980_v56 = vld [vmem:[%s16106_s1 + $0x22a0] ss:$8 sps:$4 sm:$0xff]   ;;  %v11985_v18 = vld [vmem:[%s16106_s1 + $0x10b4] ss:$8 sps:$4 sm:$0xff]  }
 0x3f9   :  { %8812 = vmatprep.subr.bf16.mxu0 %v11908_v19  ;;  %v11988_v19 = vld [vmem:[%s16106_s1 + $0x22b4] ss:$8 sps:$4 sm:$0xff]  }
 0x3fb   :  { %8075 = vmatpush1.bf16.msra.mxu1 %v11903_v59  ;;  %v11983_v59 = vld [vmem:[%s16106_s1 + $0x10b0] ss:$8 sps:$4 sm:$0xff]  }
 0x3fc   :  { %8813 = vmatpush1.bf16.msra.mxu0 %v11906_v2  ;;  %8076 = vmatprep.subr.bf16.mxu1 %v11911_v22  ;;  %v11986_v2 = vld [vmem:[%s16106_s1 + $0x22b0] ss:$8 sps:$4 sm:$0xff]   ;;  %v11991_v22 = vld [vmem:[%s16106_s1 + $0x10c4] ss:$8 sps:$4 sm:$0xff]  }
 0x3fd   :  { %8814 = vmatprep.subr.bf16.mxu0 %v11914_v31  ;;  %v11994_v31 = vld [vmem:[%s16106_s1 + $0x22c4] ss:$8 sps:$4 sm:$0xff]  }
 0x3ff   :  { %8077 = vmatpush1.bf16.msra.mxu1 %v11909_v24  ;;  %v11989_v24 = vld [vmem:[%s16106_s1 + $0x10c0] ss:$8 sps:$4 sm:$0xff]  }
 0x400   :  { %8815 = vmatpush1.bf16.msra.mxu0 %v11912_v25  ;;  %8087 = vmatprep.subr.bf16.mxu1 %v11918_v26  ;;  %v11992_v25 = vld [vmem:[%s16106_s1 + $0x22c0] ss:$8 sps:$4 sm:$0xff]   ;;  %v11997_v26 = vld [vmem:[%s16106_s1 + $0x10d4] ss:$8 sps:$4 sm:$0xff]  }
 0x401   :  { %8825 = vmatprep.subr.bf16.mxu0 %v11922_v27  ;;  %v12000_v27 = vld [vmem:[%s16106_s1 + $0x22d4] ss:$8 sps:$4 sm:$0xff]  }
 0x402   :  { %8079 = vmatmul.mubr.bf16.vlgmr.msra.gmra.mrb[0].mxu1 %v465_v30  ;;  %v12003_v30 = vld [vmem:[%s16106_s1 + $0x10e4] ss:$8 sps:$4 sm:$0xff]  }
 0x403   :  { %8817 = vmatmul.mubr.bf16.vlgmr.msra.gmra.mrb[0].mxu0 %v501_v44  ;;  %8088 = vmatpush1.bf16.msra.mxu1 %v11916_v32  ;;  %v12006_v44 = vld [vmem:[%s16106_s1 + $0x22e4] ss:$8 sps:$4 sm:$0xff]   ;;  %v193_v32 = vcombine.high %v15563_v20, %v15563_v20  ;;  %v12012_v20 = vld [vmem:[%s16106_s1 + $0x22f4] ss:$8 sps:$4 sm:$0xff]  }
 0x404   :  { %8826 = vmatpush1.bf16.msra.mxu0 %v11920_v33  ;;  %8089 = vmatprep.subr.bf16.mxu1 %v11925_v34  ;;  %v346_v33 = vcombine.high %v15568_v38, %v15568_v38  ;;  %v12001_v34 = vld [vmem:[%s16106_s1 + $0x10e0] ss:$8 sps:$4 sm:$0xff]  }
 0x405   :  { %8827 = vmatprep.subr.bf16.mxu0 %v11928_v11  ;;  %8119 = vmatprep.mubr.bf16.mxu1 %v468_v9  ;;  %v12004_v11 = vld [vmem:[%s16106_s1 + $0x22e0] ss:$8 sps:$4 sm:$0xff]   ;;  %v12009_v9 = vld [vmem:[%s16106_s1 + $0x10f4] ss:$8 sps:$4 sm:$0xff]   ;;  %v15795_v38 = vrot.slane %v193_v32, %v12304_v49  ;;  %v12082_v32 = vld [vmem:[%s16106_s1 + $0x23b0] ss:$8 sps:$4 sm:$0xff]  }
 0x406   :  { %8857 = vmatprep.mubr.bf16.mxu0 %v504_v14  ;;  %v15798_v14 = vrot.slane %v346_v33, %v12304_v49  ;;  %v12018_v49 = vld [vmem:[%s16106_s1 + $0x2304] ss:$8 sps:$4 sm:$0xff]  }
 0x407   :  { %8090 = vmatpush1.bf16.msra.mxu1 %v11923_v39  ;;  %v12007_v39 = vld [vmem:[%s16106_s1 + $0x10f0] ss:$8 sps:$4 sm:$0xff]   ;;  %v12087_v33 = vld [vmem:[%s16106_s1 + $0x11c4] ss:$8 sps:$4 sm:$0xff]  }
 0x408   :  { %8828 = vmatpush1.bf16.msra.mxu0 %v11926_v35  ;;  %8091 = vmatprep.subr.bf16.mxu1 %v11931_v42  ;;  %v12010_v35 = vld [vmem:[%s16106_s1 + $0x22f0] ss:$8 sps:$4 sm:$0xff]   ;;  %v12015_v42 = vld [vmem:[%s16106_s1 + $0x1104] ss:$8 sps:$4 sm:$0xff]  }
 0x409   :  { %8829 = vmatprep.subr.bf16.mxu0 %v11934_v57  ;;  %v209_v57 = vcombine.high %v15795_v38, %v15795_v38 }
 0x40b   :  { %8092 = vmatpush1.bf16.msra.mxu1 %v11929_v45  ;;  %v362_v45 = vcombine.high %v15798_v14, %v15798_v14 }
 0x40c   :  { %8830 = vmatpush1.bf16.msra.mxu0 %v11932_v46  ;;  %8093 = vmatprep.subr.bf16.mxu1 %v11937_v47  ;;  %v467_v46 = vpack.c.bf16 %v15584_v61, %v15584_v61  ;;  %v503_v47 = vpack.c.bf16 %v15588_v23, %v15588_v23  ;;  %v12024_v61 = vld [vmem:[%s16106_s1 + $0x2314] ss:$8 sps:$4 sm:$0xff]   ;;  %v470_v23 = vpack.c.bf16 %v209_v57, %v209_v57  ;;  %v12102_v57 = vld [vmem:[%s16106_s1 + $0x23e4] ss:$8 sps:$4 sm:$0xff]  }
 0x40d   :  { %8831 = vmatprep.subr.bf16.mxu0 %v11940_v36  ;;  %v12013_v36 = vld [vmem:[%s16106_s1 + $0x1100] ss:$8 sps:$4 sm:$0xff]  }
 0x40f   :  { %8094 = vmatpush1.bf16.msra.mxu1 %v11935_v21  ;;  %v12016_v21 = vld [vmem:[%s16106_s1 + $0x2300] ss:$8 sps:$4 sm:$0xff]  }
 0x410   :  { %8832 = vmatpush1.bf16.msra.mxu0 %v11938_v28  ;;  %8095 = vmatprep.subr.bf16.mxu1 %v11943_v52  ;;  %v12021_v28 = vld [vmem:[%s16106_s1 + $0x1114] ss:$8 sps:$4 sm:$0xff]   ;;  %v506_v52 = vpack.c.bf16 %v362_v45, %v362_v45  ;;  %v12097_v45 = vld [vmem:[%s16106_s1 + $0x11e0] ss:$8 sps:$4 sm:$0xff]  }
 0x411   :  { %8833 = vmatprep.subr.bf16.mxu0 %v11946_v53  ;;  %v12019_v53 = vld [vmem:[%s16106_s1 + $0x1110] ss:$8 sps:$4 sm:$0xff]  }
 0x413   :  { %8096 = vmatpush1.bf16.msra.mxu1 %v11941_v54  ;;  %v12022_v54 = vld [vmem:[%s16106_s1 + $0x2310] ss:$8 sps:$4 sm:$0xff]  }
 0x414   :  { %8834 = vmatpush1.bf16.msra.mxu0 %v11944_v55  ;;  %8097 = vmatprep.subr.bf16.mxu1 %v11949_v15  ;;  %v12027_v55 = vld [vmem:[%s16106_s1 + $0x1124] ss:$8 sps:$4 sm:$0xff]  }
 0x415   :  { %8835 = vmatprep.subr.bf16.mxu0 %v11952_v40  ;;  %v12030_v15 = vld [vmem:[%s16106_s1 + $0x2324] ss:$8 sps:$4 sm:$0xff]   ;;  %v12025_v40 = vld [vmem:[%s16106_s1 + $0x1120] ss:$8 sps:$4 sm:$0xff]  }
 0x417   :  { %8098 = vmatpush1.bf16.msra.mxu1 %v11947_v29  ;;  %v12028_v29 = vld [vmem:[%s16106_s1 + $0x2320] ss:$8 sps:$4 sm:$0xff]  }
 0x418   :  { %8836 = vmatpush1.bf16.msra.mxu0 %v11950_v37  ;;  %8099 = vmatprep.subr.bf16.mxu1 %v11955_v60  ;;  %v12033_v37 = vld [vmem:[%s16106_s1 + $0x1134] ss:$8 sps:$4 sm:$0xff]  }
 0x419   :  { %8837 = vmatprep.subr.bf16.mxu0 %v11958_v5  ;;  %v12036_v60 = vld [vmem:[%s16106_s1 + $0x2334] ss:$8 sps:$4 sm:$0xff]   ;;  %v12031_v5 = vld [vmem:[%s16106_s1 + $0x1130] ss:$8 sps:$4 sm:$0xff]  }
 0x41b   :  { %8100 = vmatpush1.bf16.msra.mxu1 %v11953_v62  ;;  %v12034_v62 = vld [vmem:[%s16106_s1 + $0x2330] ss:$8 sps:$4 sm:$0xff]  }
 0x41c   :  { %8838 = vmatpush1.bf16.msra.mxu0 %v11956_v63  ;;  %8101 = vmatprep.subr.bf16.mxu1 %v11961_v0  ;;  %v12039_v63 = vld [vmem:[%s16106_s1 + $0x1144] ss:$8 sps:$4 sm:$0xff]  }
 0x41d   :  { %8839 = vmatprep.subr.bf16.mxu0 %v11964_v1  ;;  %v12042_v0 = vld [vmem:[%s16106_s1 + $0x2344] ss:$8 sps:$4 sm:$0xff]   ;;  %v12037_v1 = vld [vmem:[%s16106_s1 + $0x1140] ss:$8 sps:$4 sm:$0xff]  }
 0x41f   :  { %8102 = vmatpush1.bf16.msra.mxu1 %v11959_v41  ;;  %v12040_v41 = vld [vmem:[%s16106_s1 + $0x2340] ss:$8 sps:$4 sm:$0xff]  }
 0x420   :  { %8840 = vmatpush1.bf16.msra.mxu0 %v11962_v50  ;;  %8103 = vmatprep.subr.bf16.mxu1 %v11967_v4  ;;  %v12045_v50 = vld [vmem:[%s16106_s1 + $0x1154] ss:$8 sps:$4 sm:$0xff]  }
 0x421   :  { %8841 = vmatprep.subr.bf16.mxu0 %v11970_v17  ;;  %v12048_v4 = vld [vmem:[%s16106_s1 + $0x2354] ss:$8 sps:$4 sm:$0xff]   ;;  %v12043_v17 = vld [vmem:[%s16106_s1 + $0x1150] ss:$8 sps:$4 sm:$0xff]  }
 0x423   :  { %8104 = vmatpush1.bf16.msra.mxu1 %v11965_v6  ;;  %v12046_v6 = vld [vmem:[%s16106_s1 + $0x2350] ss:$8 sps:$4 sm:$0xff]  }
 0x424   :  { %8842 = vmatpush1.bf16.msra.mxu0 %v11968_v7  ;;  %8105 = vmatprep.subr.bf16.mxu1 %v11973_v8  ;;  %v12051_v7 = vld [vmem:[%s16106_s1 + $0x1164] ss:$8 sps:$4 sm:$0xff]  }
 0x425   :  { %8843 = vmatprep.subr.bf16.mxu0 %v11976_v51  ;;  %v12054_v8 = vld [vmem:[%s16106_s1 + $0x2364] ss:$8 sps:$4 sm:$0xff]   ;;  %v12049_v51 = vld [vmem:[%s16106_s1 + $0x1160] ss:$8 sps:$4 sm:$0xff]  }
 0x427   :  { %8106 = vmatpush1.bf16.msra.mxu1 %v11971_v48  ;;  %v12052_v48 = vld [vmem:[%s16106_s1 + $0x2360] ss:$8 sps:$4 sm:$0xff]  }
 0x428   :  { %8844 = vmatpush1.bf16.msra.mxu0 %v11974_v58  ;;  %8107 = vmatprep.subr.bf16.mxu1 %v11979_v12  ;;  %v12057_v58 = vld [vmem:[%s16106_s1 + $0x1174] ss:$8 sps:$4 sm:$0xff]  }
 0x429   :  { %8845 = vmatprep.subr.bf16.mxu0 %v11982_v13  ;;  %v12060_v12 = vld [vmem:[%s16106_s1 + $0x2374] ss:$8 sps:$4 sm:$0xff]   ;;  %v12055_v13 = vld [vmem:[%s16106_s1 + $0x1170] ss:$8 sps:$4 sm:$0xff]  }
 0x42b   :  { %8108 = vmatpush1.bf16.msra.mxu1 %v11977_v16  ;;  %v12058_v16 = vld [vmem:[%s16106_s1 + $0x2370] ss:$8 sps:$4 sm:$0xff]  }
 0x42c   :  { %8846 = vmatpush1.bf16.msra.mxu0 %v11980_v56  ;;  %8109 = vmatprep.subr.bf16.mxu1 %v11985_v18  ;;  %v12063_v56 = vld [vmem:[%s16106_s1 + $0x1184] ss:$8 sps:$4 sm:$0xff]  }
 0x42d   :  { %8847 = vmatprep.subr.bf16.mxu0 %v11988_v19  ;;  %v12066_v18 = vld [vmem:[%s16106_s1 + $0x2384] ss:$8 sps:$4 sm:$0xff]   ;;  %v12061_v19 = vld [vmem:[%s16106_s1 + $0x1180] ss:$8 sps:$4 sm:$0xff]  }
 0x42f   :  { %8110 = vmatpush1.bf16.msra.mxu1 %v11983_v59  ;;  %v12064_v59 = vld [vmem:[%s16106_s1 + $0x2380] ss:$8 sps:$4 sm:$0xff]  }
 0x430   :  { %8848 = vmatpush1.bf16.msra.mxu0 %v11986_v2  ;;  %8111 = vmatprep.subr.bf16.mxu1 %v11991_v22  ;;  %v12069_v2 = vld [vmem:[%s16106_s1 + $0x1194] ss:$8 sps:$4 sm:$0xff]  }
 0x431   :  { %8849 = vmatprep.subr.bf16.mxu0 %v11994_v31  ;;  %v12072_v22 = vld [vmem:[%s16106_s1 + $0x2394] ss:$8 sps:$4 sm:$0xff]   ;;  %v12067_v31 = vld [vmem:[%s16106_s1 + $0x1190] ss:$8 sps:$4 sm:$0xff]  }
 0x433   :  { %8112 = vmatpush1.bf16.msra.mxu1 %v11989_v24  ;;  %v12070_v24 = vld [vmem:[%s16106_s1 + $0x2390] ss:$8 sps:$4 sm:$0xff]  }
 0x434   :  { %8850 = vmatpush1.bf16.msra.mxu0 %v11992_v25  ;;  %8113 = vmatprep.subr.bf16.mxu1 %v11997_v26  ;;  %v12075_v25 = vld [vmem:[%s16106_s1 + $0x11a4] ss:$8 sps:$4 sm:$0xff]  }
 0x435   :  { %8851 = vmatprep.subr.bf16.mxu0 %v12000_v27  ;;  %v12078_v26 = vld [vmem:[%s16106_s1 + $0x23a4] ss:$8 sps:$4 sm:$0xff]   ;;  %v12073_v27 = vld [vmem:[%s16106_s1 + $0x11a0] ss:$8 sps:$4 sm:$0xff]  }
 0x437   :  { %8114 = vmatpush1.bf16.msra.mxu1 %v11995_v3  ;;  %v12076_v3 = vld [vmem:[%s16106_s1 + $0x23a0] ss:$8 sps:$4 sm:$0xff]  }
 0x438   :  { %8852 = vmatpush1.bf16.msra.mxu0 %v11998_v10  ;;  %8115 = vmatprep.subr.bf16.mxu1 %v12003_v30  ;;  %v12081_v10 = vld [vmem:[%s16106_s1 + $0x11b4] ss:$8 sps:$4 sm:$0xff]  }
 0x439   :  { %8853 = vmatprep.subr.bf16.mxu0 %v12006_v44  ;;  %v12084_v30 = vld [vmem:[%s16106_s1 + $0x23b4] ss:$8 sps:$4 sm:$0xff]   ;;  %v12079_v44 = vld [vmem:[%s16106_s1 + $0x11b0] ss:$8 sps:$4 sm:$0xff]  }
 0x43b   :  { %8116 = vmatpush1.bf16.msra.mxu1 %v12001_v34  ;;  %v12090_v34 = vld [vmem:[%s16106_s1 + $0x23c4] ss:$8 sps:$4 sm:$0xff]  }
 0x43c   :  { %8854 = vmatpush1.bf16.msra.mxu0 %v12004_v11  ;;  %8117 = vmatprep.subr.bf16.mxu1 %v12009_v9  ;;  %v12085_v11 = vld [vmem:[%s16106_s1 + $0x11c0] ss:$8 sps:$4 sm:$0xff]  }
 0x43d   :  { %8855 = vmatprep.subr.bf16.mxu0 %v12012_v20  ;;  %v12088_v9 = vld [vmem:[%s16106_s1 + $0x23c0] ss:$8 sps:$4 sm:$0xff]   ;;  %v12093_v20 = vld [vmem:[%s16106_s1 + $0x11d4] ss:$8 sps:$4 sm:$0xff]  }
 0x43f   :  { %8118 = vmatpush1.bf16.msra.mxu1 %v12007_v39  ;;  %v12096_v39 = vld [vmem:[%s16106_s1 + $0x23d4] ss:$8 sps:$4 sm:$0xff]  }
 0x440   :  { %8856 = vmatpush1.bf16.msra.mxu0 %v12010_v35  ;;  %8128 = vmatprep.subr.bf16.mxu1 %v12015_v42  ;;  %v12091_v35 = vld [vmem:[%s16106_s1 + $0x11d0] ss:$8 sps:$4 sm:$0xff]  }
 0x441   :  { %8866 = vmatprep.subr.bf16.mxu0 %v12018_v49  ;;  %v12094_v42 = vld [vmem:[%s16106_s1 + $0x23d0] ss:$8 sps:$4 sm:$0xff]   ;;  %v12099_v49 = vld [vmem:[%s16106_s1 + $0x11e4] ss:$8 sps:$4 sm:$0xff]  }
 0x442   :  { %8120 = vmatmul.mubr.bf16.vlgmr.msra.gmra.mrb[0].mxu1 %v467_v46  ;;  %v12100_v46 = vld [vmem:[%s16106_s1 + $0x23e0] ss:$8 sps:$4 sm:$0xff]  }
 0x443   :  { %8858 = vmatmul.mubr.bf16.vlgmr.msra.gmra.mrb[0].mxu0 %v503_v47  ;;  %8129 = vmatpush1.bf16.msra.mxu1 %v12013_v36  ;;  %v12105_v47 = vld [vmem:[%s16106_s1 + $0x11f4] ss:$8 sps:$4 sm:$0xff]  }
 0x444   :  { %8867 = vmatpush1.bf16.msra.mxu0 %v12016_v21  ;;  %8130 = vmatprep.subr.bf16.mxu1 %v12021_v28  ;;  %v12108_v36 = vld [vmem:[%s16106_s1 + $0x23f4] ss:$8 sps:$4 sm:$0xff]   ;;  %v12103_v21 = vld [vmem:[%s16106_s1 + $0x11f0] ss:$8 sps:$4 sm:$0xff]  }
 0x445   :  { %8868 = vmatprep.subr.bf16.mxu0 %v12024_v61  ;;  %8160 = vmatprep.mubr.bf16.mxu1 %v470_v23  ;;  %v12106_v28 = vld [vmem:[%s16106_s1 + $0x23f0] ss:$8 sps:$4 sm:$0xff]   ;;  %v8909_v61 = vld [vmem:[%s16108_s3] sm:$0xff]  ;;  %v8910_v23 = vld [vmem:[%s16108_s3 + $0x8] sm:$0xff] }
 0x446   :  { %8898 = vmatprep.mubr.bf16.mxu0 %v506_v52  ;;  %v469_v52 = vpack.c.bf16 %v15795_v38, %v15795_v38 }
 0x447   :  { %8131 = vmatpush1.bf16.msra.mxu1 %v12019_v53  ;;  %v505_v53 = vpack.c.bf16 %v15798_v14, %v15798_v14  ;;  %v8913_v14 = vld [vmem:[%s16108_s3 + $0x20] sm:$0xff] }
 0x448   :  { %8869 = vmatpush1.bf16.msra.mxu0 %v12022_v54  ;;  %8132 = vmatprep.subr.bf16.mxu1 %v12027_v55  ;;  %v10186_v54 = vpack.c.bf16 %v8910_v23, %v8909_v61  ;;  %v12136_v55 = vmov 0.0|0.0  }
 0x449   :  { %8870 = vmatprep.subr.bf16.mxu0 %v12030_v15  ;;  %v8911_v15 = vld [vmem:[%s16108_s3 + $0x10] sm:$0xff] }
 0x44b   :  { %8133 = vmatpush1.bf16.msra.mxu1 %v12025_v40  ;;  %v8912_v40 = vld [vmem:[%s16108_s3 + $0x18] sm:$0xff] }
 0x44c   :  { %8871 = vmatpush1.bf16.msra.mxu0 %v12028_v29  ;;  %8134 = vmatprep.subr.bf16.mxu1 %v12033_v37  ;;  %v10189_v38 = vpack.c.bf16 %v8912_v40, %v8911_v15  ;;  %v8914_v29 = vld [vmem:[%s16108_s3 + $0x28] sm:$0xff] }
 0x44d   :  { %8872 = vmatprep.subr.bf16.mxu0 %v12036_v60  ;;  %v10192_v37 = vpack.c.bf16 %v8914_v29, %v8913_v14  ;;  %v8915_v60 = vld [vmem:[%s16108_s3 + $0x30] sm:$0xff] }
 0x44f   :  { %8135 = vmatpush1.bf16.msra.mxu1 %v12031_v5  ;;  %v8916_v5 = vld [vmem:[%s16108_s3 + $0x38] sm:$0xff] }
 0x450   :  { %8873 = vmatpush1.bf16.msra.mxu0 %v12034_v62  ;;  %8136 = vmatprep.subr.bf16.mxu1 %v12039_v63  ;;  %v10195_v62 = vpack.c.bf16 %v8916_v5, %v8915_v60  ;;  %v8917_v63 = vld [vmem:[%s16108_s3 + $0x40] sm:$0xff] }
 0x451   :  { %8874 = vmatprep.subr.bf16.mxu0 %v12042_v0  ;;  %v8918_v0 = vld [vmem:[%s16108_s3 + $0x48] sm:$0xff] }
 0x453   :  { %8137 = vmatpush1.bf16.msra.mxu1 %v12037_v1  ;;  %v10198_v1 = vpack.c.bf16 %v8918_v0, %v8917_v63 }
 0x454   :  { %8875 = vmatpush1.bf16.msra.mxu0 %v12040_v41  ;;  %8138 = vmatprep.subr.bf16.mxu1 %v12045_v50  ;;  %v8919_v41 = vld [vmem:[%s16108_s3 + $0x50] sm:$0xff]  ;;  %v8920_v50 = vld [vmem:[%s16108_s3 + $0x58] sm:$0xff] }
 0x455   :  { %8876 = vmatprep.subr.bf16.mxu0 %v12048_v4  ;;  %v10201_v4 = vpack.c.bf16 %v8920_v50, %v8919_v41 }
 0x457   :  { %8139 = vmatpush1.bf16.msra.mxu1 %v12043_v17  ;;  %v8921_v17 = vld [vmem:[%s16108_s3 + $0x60] sm:$0xff] }
 0x458   :  { %8877 = vmatpush1.bf16.msra.mxu0 %v12046_v6  ;;  %8140 = vmatprep.subr.bf16.mxu1 %v12051_v7  ;;  %v8922_v6 = vld [vmem:[%s16108_s3 + $0x68] sm:$0xff] }
 0x459   :  { %8878 = vmatprep.subr.bf16.mxu0 %v12054_v8  ;;  %v10204_v7 = vpack.c.bf16 %v8922_v6, %v8921_v17  ;;  %v8923_v8 = vld [vmem:[%s16108_s3 + $0x70] sm:$0xff] }
 0x45b   :  { %8141 = vmatpush1.bf16.msra.mxu1 %v12049_v51  ;;  %v8924_v51 = vld [vmem:[%s16108_s3 + $0x78] sm:$0xff] }
 0x45c   :  { %8879 = vmatpush1.bf16.msra.mxu0 %v12052_v48  ;;  %8142 = vmatprep.subr.bf16.mxu1 %v12057_v58  ;;  %v10207_v48 = vpack.c.bf16 %v8924_v51, %v8923_v8  ;;  %v8925_v58 = vld [vmem:[%s16108_s3 + $0x80] sm:$0xff] }
 0x45d   :  { %8880 = vmatprep.subr.bf16.mxu0 %v12060_v12  ;;  %v8926_v12 = vld [vmem:[%s16108_s3 + $0x88] sm:$0xff] }
 0x45f   :  { %8143 = vmatpush1.bf16.msra.mxu1 %v12055_v13  ;;  %v10210_v13 = vpack.c.bf16 %v8926_v12, %v8925_v58 }
 0x460   :  { %8881 = vmatpush1.bf16.msra.mxu0 %v12058_v16  ;;  %8144 = vmatprep.subr.bf16.mxu1 %v12063_v56  ;;  %v8927_v16 = vld [vmem:[%s16108_s3 + $0x90] sm:$0xff]  ;;  %v8928_v56 = vld [vmem:[%s16108_s3 + $0x98] sm:$0xff] }
 0x461   :  { %8882 = vmatprep.subr.bf16.mxu0 %v12066_v18  ;;  %v10213_v18 = vpack.c.bf16 %v8928_v56, %v8927_v16 }
 0x463   :  { %8145 = vmatpush1.bf16.msra.mxu1 %v12061_v19  ;;  %v8929_v19 = vld [vmem:[%s16108_s3 + $0xa0] sm:$0xff] }
 0x464   :  { %8883 = vmatpush1.bf16.msra.mxu0 %v12064_v59  ;;  %8146 = vmatprep.subr.bf16.mxu1 %v12069_v2  ;;  %v8930_v59 = vld [vmem:[%s16108_s3 + $0xa8] sm:$0xff] }
 0x465   :  { %8884 = vmatprep.subr.bf16.mxu0 %v12072_v22  ;;  %v10216_v2 = vpack.c.bf16 %v8930_v59, %v8929_v19  ;;  %v8931_v22 = vld [vmem:[%s16108_s3 + $0xb0] sm:$0xff] }
 0x467   :  { %8147 = vmatpush1.bf16.msra.mxu1 %v12067_v31  ;;  %v8932_v31 = vld [vmem:[%s16108_s3 + $0xb8] sm:$0xff] }
 0x468   :  { %8885 = vmatpush1.bf16.msra.mxu0 %v12070_v24  ;;  %8148 = vmatprep.subr.bf16.mxu1 %v12075_v25  ;;  %v10219_v24 = vpack.c.bf16 %v8932_v31, %v8931_v22  ;;  %v8933_v25 = vld [vmem:[%s16108_s3 + $0xc0] sm:$0xff] }
 0x469   :  { %8886 = vmatprep.subr.bf16.mxu0 %v12078_v26  ;;  %v12137_v26 = vmov 0.0  }
 0x46b   :  { %8149 = vmatpush1.bf16.msra.mxu1 %v12073_v27  ;;  %v1663_v27 = vsub.s32 0, %v12286_v43 }
 0x46c   :  { %8887 = vmatpush1.bf16.msra.mxu0 %v12076_v3  ;;  %8150 = vmatprep.subr.bf16.mxu1 %v12081_v10  ;;  %v1659_v3 = vld [vmem:[%s16107_s2] sm:$0x3]  ;;  %v1667_v10 = vsub.s32 1, %v12286_v43 }
 0x46d   :  { %8888 = vmatprep.subr.bf16.mxu0 %v12084_v30  ;;  %v1664_v30 = vrot.slane %v1659_v3, %v1663_v27  ;;  %v10183_v43 = vld [vmem:[%s16109_s4] ss:$0 sm:$0xff] }
 0x46f   :  { %8151 = vmatpush1.bf16.msra.mxu1 %v12079_v44  ;;  %v1668_v44 = vrot.slane %v1659_v3, %v1667_v10 }
 0x470   :  { %8889 = vmatpush1.bf16.msra.mxu0 %v12082_v32  ;;  %8152 = vmatprep.subr.bf16.mxu1 %v12087_v33 }
 0x471   :  { %8890 = vmatprep.subr.bf16.mxu0 %v12090_v34 }
 0x473   :  { %8153 = vmatpush1.bf16.msra.mxu1 %v12085_v11 }
 0x474   :  { %8891 = vmatpush1.bf16.msra.mxu0 %v12088_v9  ;;  %8154 = vmatprep.subr.bf16.mxu1 %v12093_v20 }
 0x475   :  { %8892 = vmatprep.subr.bf16.mxu0 %v12096_v39 }
 0x477   :  { %8155 = vmatpush1.bf16.msra.mxu1 %v12091_v35 }
 0x478   :  { %8893 = vmatpush1.bf16.msra.mxu0 %v12094_v42  ;;  %8156 = vmatprep.subr.bf16.mxu1 %v12099_v49 }
 0x479   :  { %8894 = vmatprep.subr.bf16.mxu0 %v12102_v57 }
 0x47b   :  { %8157 = vmatpush1.bf16.msra.mxu1 %v12097_v45 }
 0x47c   :  { %8895 = vmatpush1.bf16.msra.mxu0 %v12100_v46  ;;  %8158 = vmatprep.subr.bf16.mxu1 %v12105_v47 }
 0x47d   :  { %8896 = vmatprep.subr.bf16.mxu0 %v12108_v36 }
 0x47f   :  { %8159 = vmatpush1.bf16.msra.mxu1 %v12103_v21 }
 0x480   :  { %8897 = vmatpush1.bf16.msra.mxu0 %v12106_v28  ;;  %10185 = vmatprep.subr.bf16.mxu1 %v12136_v55 }
 0x482   :  { %8161 = vmatmul.mubr.bf16.vlgmr.msra.gmra.mrb[0].mxu1 %v469_v52 }
 0x483   :  { %8899 = vmatmul.mubr.bf16.vlgmr.msra.gmra.mrb[0].mxu0 %v505_v53  ;;  %10187 = vmatpush1.bf16.msra.mxu1 %v10186_v54 }
 0x484   :  { %10188 = vmatprep.subr.bf16.mxu1 %v12136_v55 }
 0x487   :  { %10190 = vmatpush1.bf16.msra.mxu1 %v10189_v38 }
 0x488   :  { %10191 = vmatprep.subr.bf16.mxu1 %v12136_v55 }
 0x48b   :  { %10193 = vmatpush1.bf16.msra.mxu1 %v10192_v37 }
 0x48c   :  { %10194 = vmatprep.subr.bf16.mxu1 %v12136_v55 }
 0x48f   :  { %10196 = vmatpush1.bf16.msra.mxu1 %v10195_v62 }
 0x490   :  { %10197 = vmatprep.subr.bf16.mxu1 %v12136_v55 }
 0x493   :  { %10199 = vmatpush1.bf16.msra.mxu1 %v10198_v1 }
 0x494   :  { %10200 = vmatprep.subr.bf16.mxu1 %v12136_v55 }
 0x497   :  { %10202 = vmatpush1.bf16.msra.mxu1 %v10201_v4 }
 0x498   :  { %10203 = vmatprep.subr.bf16.mxu1 %v12136_v55 }
 0x49b   :  { %10205 = vmatpush1.bf16.msra.mxu1 %v10204_v7 }
 0x49c   :  { %10206 = vmatprep.subr.bf16.mxu1 %v12136_v55 }
 0x49f   :  { %10208 = vmatpush1.bf16.msra.mxu1 %v10207_v48 }
 0x4a0   :  { %10209 = vmatprep.subr.bf16.mxu1 %v12136_v55 }
 0x4a3   :  { %10211 = vmatpush1.bf16.msra.mxu1 %v10210_v13 }
 0x4a4   :  { %10212 = vmatprep.subr.bf16.mxu1 %v12136_v55 }
 0x4a7   :  { %10214 = vmatpush1.bf16.msra.mxu1 %v10213_v18 }
 0x4a8   :  { %10215 = vmatprep.subr.bf16.mxu1 %v12136_v55 }
 0x4ab   :  { %10217 = vmatpush1.bf16.msra.mxu1 %v10216_v2 }
 0x4ac   :  { %10218 = vmatprep.subr.bf16.mxu1 %v12136_v55 }
 0x4af   :  { %10220 = vmatpush1.bf16.msra.mxu1 %v10219_v24 }
 0x4b0   :  { %8993 = vmatprep.subr.mxu1 %v12137_v26 }
 0x4b3   :  { %8994 = vmatpush1.msra.mxu1 %v8933_v25 }
 0x555   :  { %v8162_v32 = vpop.f32.mrb[0].mxu1 }
 0x556   :  { %v8900_v33 = vpop.f32.mrb[0].mxu0  ;;  %v10221_v34 = vadd.f32 %v8162_v32, %v1664_v30  ;;  %v8164_v11 = vpop.f32.mrb[1].mxu1 }
 0x557   :  { %v8902_v9 = vpop.f32.mrb[1].mxu0  ;;  %v10223_v20 = vadd.f32 %v8164_v11, %v1668_v44  ;;  %v8166_v39 = vpop.f32.mrb[2].mxu1 }
 0x558   :  { %v8904_v35 = vpop.f32.mrb[2].mxu0  ;;  %v10222_v42 = vadd.f32 %v10221_v34, %v8900_v33  ;;  %v8167_v49 = vpop.f32.mrb[3].mxu1 }
 0x559   :  { %v8905_v57 = vpop.f32.mrb[3].mxu0  ;;  %v10224_v45 = vadd.f32 %v10223_v20, %v8902_v9 }
 0x55a   :  { %v8907_v47 = vmax.f32 %v10222_v42, 0.0 }
 0x55b   :  { %v8908_v46 = vmax.f32 %v10224_v45, 0.0 }
 0x55d   :  { %10184 = vmatprep.mubr.msk.f32.mxu1 %vm8941_vm0, %v8908_v46 }
 0x55e   :  { %9010 = vmatmul.mubr.f32.vlgmr.msra.gmra.mrb[4].mxu1 %v8907_v47 }
 0x631   :  { %v9011_v36 = vpop.f32.mrb[4].mxu1 }
 0x632   :  { %v9012_v21 = vadd.f32 %v10183_v43, %v9011_v36  ;;  %v9013_v28 = vpop.f32.mrb[5].mxu1 }
 0x634   :  { %9016 = vst.msk [vmem:[#allocation2] sm:$0x3] %vm9015_vm1, %v9012_v21 }
 0x635   :  { %12122 = shalt.err (!%p12119_p4)
}
 0x636   :  { %s12123_s25 = scalar_lea.hbm %s16110_s5, 32 }
 0x637   :  { %p12124_p5 = scmp.ne.s32.totalorder %s16110_s5, %s12123_s25  ;;  %p12127_p6 = scmp.lt.u32.totalorder %s12123_s25, %s16110_s5 }
 0x639   :  { %p12129_p7 = pnand %p12127_p6, %p12124_p5 }
 0x63b   :  { %12132 = shalt.err (!%p12129_p7)
}
 0x63c   :  { %9026 = dma.vmem_to_hbm [thread:$0]  %s9024_s22, 32, %s16110_s5, [#allocation3]  }
 0x63d   :  { %12133 = dma.done.wait [#allocation3], 32  }
 0x63e   :  { %12134 = vsyncadd [#allocation3], 4294967264 }
 0x63f   :  { %9030 = vsyncpa [#allocation3], 1 }

</bundles_post_ra>
